<compile_context>
chip_gen: v5e
topology: v5e:2x2
jax: 0.10.0
libtpu: 0.0.40
codegen_flags: <defaults>
</compile_context>

<pallas_src>
import functools

import jax
import jax.numpy as jnp
from jax.experimental import pallas as pl
from jax.experimental.pallas import tpu as pltpu


def _layernorm(x, gamma, beta, eps=1e-5):
    # LN statistics stay in f32 (only matmul operands are cast to bf16).
    mu = jnp.mean(x, axis=-1, keepdims=True)
    var = jnp.mean((x - mu) ** 2, axis=-1, keepdims=True)
    return (x - mu) * jax.lax.rsqrt(var + eps) * gamma + beta


def _bf16_vector_math_ok():
    # bf16 VPU/EUP exists on v6e/v7x but NOT on v5e and earlier (would be emulated and slower).
    try:
        kind = jax.devices()[0].device_kind.lower()
    except Exception:
        return False
    return ("v6" in kind) or ("v7" in kind)


def seq_encoder_kernel(tok_ref,      # VMEM (Bt, S)   int32
                       emb_ref,      # VMEM (V, D)    f32   (const, single-buffered)
                       wqkv_ref,     # VMEM (D, 3D)   bf16  fused Wq|Wk|Wv
                       wo_ref,       # VMEM (D, D)    bf16
                       w1_ref,       # VMEM (D, F)    bf16
                       w2_ref,       # VMEM (F, D)    bf16
                       vec_ref,      # VMEM (8, F)    f32   packed LN gammas/betas + biases
                       out_ref,      # VMEM (Bt, S, D) f32
                       *, bf16_act):
    Bt, S, D = out_ref.shape
    V = emb_ref.shape[0]
    N = Bt * S
    bf16 = jnp.bfloat16
    f32 = jnp.float32

    # ---- embedding lookup: in-VMEM one-hot matmul (table is VMEM-resident; V is tiny) ----
    tok = tok_ref[...]                                                     # (Bt, S) int32
    onehot = (tok[:, :, None] ==
              jax.lax.broadcasted_iota(jnp.int32, (Bt, S, V), 2)).astype(f32)
    x = jnp.dot(onehot.reshape(N, V), emb_ref[...],
                preferred_element_type=f32)                                # (N, D) f32 residual
    # nn.Dropout(emb_dropout): eval-mode identity.
    # TODO(synk): training-mode dropout via pltpu.prng_seed / pltpu.prng_random_bits.

    ln1_g, ln1_b = vec_ref[0:1, :D], vec_ref[1:2, :D]
    ln2_g, ln2_b = vec_ref[2:3, :D], vec_ref[3:4, :D]
    lnf_g, lnf_b = vec_ref[4:5, :D], vec_ref[5:6, :D]
    b1 = vec_ref[6:7, :]                                                   # (1, F)
    b2 = vec_ref[7:8, :D]                                                  # (1, D)

    # ---- pre-LN single-head self-attention (fused QKV) + residual ----
    xn = _layernorm(x, ln1_g, ln1_b)
    qkv = jnp.dot(xn.astype(bf16), wqkv_ref[...],
                  preferred_element_type=f32).astype(bf16)                 # (N, 3D) bf16 once
    q = qkv[:, :D].reshape(Bt, S, D)
    k = qkv[:, D:2 * D].reshape(Bt, S, D)
    v = qkv[:, 2 * D:].reshape(Bt, S, D)
    s = jnp.einsum("bqd,bkd->bqk", q, k, preferred_element_type=f32)
    s = s * (1.0 / jnp.sqrt(jnp.float32(D)))
    s = s - jnp.max(s, axis=-1, keepdims=True)
    p = jnp.exp(s)
    p = p * pl.reciprocal(jnp.sum(p, axis=-1, keepdims=True), approx=True)
    # TODO(synk): padding/length mask and multi-head attention (this matches heads=1 config).
    attn = jnp.einsum("bqk,bkd->bqd", p.astype(bf16), v, preferred_element_type=f32)
    attn = jnp.dot(attn.reshape(N, D).astype(bf16), wo_ref[...], preferred_element_type=f32)
    x = x + attn

    # ---- pre-LN feed-forward (GELU) + residual ----
    xn = _layernorm(x, ln2_g, ln2_b)
    h = jnp.dot(xn.astype(bf16), w1_ref[...], preferred_element_type=f32) + b1
    # TODO(synk): erf GELU for bit-exact torch nn.GELU match (tanh approx used here).
    if bf16_act:
        h = jax.nn.gelu(h.astype(bf16))                 # bf16 VPU/EUP path (v6e/v7x only)
    else:
        h = jax.nn.gelu(h).astype(bf16)                 # f32 vector math (v5e-safe)
    y = jnp.dot(h, w2_ref[...], preferred_element_type=f32) + b2
    x = x + y

    # ---- final LayerNorm (pre-norm encoder applies a final norm) ----
    x = _layernorm(x, lnf_g, lnf_b)
    out_ref[...] = x.reshape(Bt, S, D).astype(out_ref.dtype)


def seq_encoder(tokens, params, *, block_b=8, bf16_act=None):
    """tokens: [B, S] int32.  Returns encoding [B, S, D] float32."""
    B, S = tokens.shape
    V, D = params["emb"].shape
    F = params["w1"].shape[1]
    assert B % block_b == 0
    assert D % 128 == 0 and F % 128 == 0 and S % 8 == 0 and F >= D, \
        "D/F must be multiples of 128 lanes and S a multiple of 8 sublanes"
    nsteps = B // block_b            # keep >= 2 (and even) so both v7x TCs get work
    if bf16_act is None:
        bf16_act = _bf16_vector_math_ok()

    def const_spec(shape):
        # Whole-array block, same block every grid step -> single-buffer the constant weights.
        nd = len(shape)
        return pl.BlockSpec(shape, lambda b, nd=nd: (0,) * nd,
                            pipeline_mode=pl.Buffered(1))

    in_specs = [
        pl.BlockSpec((block_b, S), lambda b: (b, 0)),   # tokens (VMEM int32 block)
        const_spec((V, D)),                             # embedding table (VMEM-resident)
        const_spec((D, 3 * D)),                         # fused W_qkv
        const_spec((D, D)),                             # Wo
        const_spec((D, F)),                             # FFN W1
        const_spec((F, D)),                             # FFN W2
        const_spec((8, F)),                             # packed LN gammas/betas + b1/b2
    ]
    out_spec = pl.BlockSpec((block_b, S, D), lambda b: (b, 0, 0))

    # VMEM budget from the actual resident byte count (+ activation/internal headroom),
    # capped so the same budget is valid on v7x's 64 MiB VMEM.
    resident = (params["emb"].nbytes + params["w_qkv"].nbytes + params["wo"].nbytes +
                params["w1"].nbytes + params["w2"].nbytes + params["vecs"].nbytes)
    per_step = block_b * S * (2 * D * 4                 # out block (double-buffered)
                              + 4                       # tokens block
                              + (3 * D + F + 4 * D) * 4)  # rough activation working set
    vmem_limit = min(max(int(resident + 2 * per_step) + (8 << 20), 24 << 20), 64 << 20)

    kernel = functools.partial(seq_encoder_kernel, bf16_act=bool(bf16_act))

    return pl.pallas_call(
        kernel,
        out_shape=jax.ShapeDtypeStruct((B, S, D), jnp.float32),
        grid_spec=pltpu.PrefetchScalarGridSpec(
            num_scalar_prefetch=0,
            grid=(nsteps,),
            in_specs=in_specs,
            out_specs=out_spec,
        ),
        compiler_params=pltpu.CompilerParams(
            dimension_semantics=("parallel",),
            vmem_limit_bytes=vmem_limit,
        ),
    )(tokens.astype(jnp.int32), params["emb"], params["w_qkv"], params["wo"],
      params["w1"], params["w2"], params["vecs"])


def make_params(key, V, D, F):
    ks = jax.random.split(key, 8)
    isd = 1.0 / jnp.sqrt(jnp.float32(D))
    isf = 1.0 / jnp.sqrt(jnp.float32(F))
    # torch.nn.init.kaiming_normal_(embedding.weight): std = sqrt(2 / fan_in) = sqrt(2 / D)
    emb = jax.random.normal(ks[0], (V, D), jnp.float32) * jnp.sqrt(2.0 / D)
    wq = jax.random.normal(ks[1], (D, D), jnp.float32) * isd
    wk = jax.random.normal(ks[2], (D, D), jnp.float32) * isd
    wv = jax.random.normal(ks[3], (D, D), jnp.float32) * isd
    wo = jax.random.normal(ks[4], (D, D), jnp.float32) * isd
    w1 = jax.random.normal(ks[5], (D, F), jnp.float32) * isd
    w2 = jax.random.normal(ks[6], (F, D), jnp.float32) * isf
    b1 = jax.random.normal(ks[7], (F,), jnp.float32) * 0.02
    b2 = jnp.zeros((D,), jnp.float32)

    def row(v):  # pad a (<=F,) vector to one (1, F) row
        return jnp.pad(v, (0, F - v.shape[0]))[None, :]

    vecs = jnp.concatenate([
        row(jnp.ones((D,), jnp.float32)),   # 0: ln1 gamma
        row(jnp.zeros((D,), jnp.float32)),  # 1: ln1 beta
        row(jnp.ones((D,), jnp.float32)),   # 2: ln2 gamma
        row(jnp.zeros((D,), jnp.float32)),  # 3: ln2 beta
        row(jnp.ones((D,), jnp.float32)),   # 4: final ln gamma
        row(jnp.zeros((D,), jnp.float32)),  # 5: final ln beta
        row(b1),                            # 6: FFN bias 1 (F lanes)
        row(b2),                            # 7: FFN bias 2 (first D lanes)
    ], axis=0)

    return {
        "emb": emb,                                                    # f32, VMEM-resident (tiny)
        "w_qkv": jnp.concatenate([wq, wk, wv], axis=1).astype(jnp.bfloat16),
        "wo": wo.astype(jnp.bfloat16),
        "w1": w1.astype(jnp.bfloat16),
        "w2": w2.astype(jnp.bfloat16),
        "vecs": vecs,                                                  # f32
    }


def seq_encoder_ref(tokens, params):
    """Pure-JAX f32 reference (bf16 weights up-cast; same math)."""
    v = params["vecs"]
    D = params["emb"].shape[1]

    def ln(x, g, b, eps=1e-5):
        mu = jnp.mean(x, -1, keepdims=True)
        var = jnp.mean((x - mu) ** 2, -1, keepdims=True)
        return (x - mu) * jax.lax.rsqrt(var + eps) * g + b

    wqkv = params["w_qkv"].astype(jnp.float32)
    wo = params["wo"].astype(jnp.float32)
    w1 = params["w1"].astype(jnp.float32)
    w2 = params["w2"].astype(jnp.float32)

    x = params["emb"][tokens]                               # (B, S, D)
    xn = ln(x, v[0, :D], v[1, :D])
    qkv = xn @ wqkv
    q, k, vv = qkv[..., :D], qkv[..., D:2 * D], qkv[..., 2 * D:]
    s = jnp.einsum("bqd,bkd->bqk", q, k) / jnp.sqrt(jnp.float32(D))
    p = jax.nn.softmax(s, axis=-1)
    x = x + jnp.einsum("bqk,bkd->bqd", p, vv) @ wo
    xn = ln(x, v[2, :D], v[3, :D])
    h = jax.nn.gelu(xn @ w1 + v[6])
    x = x + h @ w2 + v[7, :D]
    return ln(x, v[4, :D], v[5, :D])


if __name__ == "__main__":
    # Lane/sublane-aligned shapes: S % 8 == 0, D/F % 128 == 0.
    # B=16, block_b=8 -> M = block_b*S = 128 rows per step, nsteps = 2 (even, both v7x TCs busy).
    B, S = 16, 16           # batch, max_seq_len
    V, D, F = 32, 128, 256  # vocab (bioseq-style small alphabet), d_model, ffn hidden

    key = jax.random.PRNGKey(0)
    k_tok, k_par = jax.random.split(key)
    tokens = jax.random.randint(k_tok, (B, S), 0, V, dtype=jnp.int32)
    params = make_params(k_par, V, D, F)

    out = seq_encoder(tokens, params, block_b=8)
    jax.block_until_ready(out)
    assert out.shape == (B, S, D) and out.dtype == jnp.float32

    ref = seq_encoder_ref(tokens, params)
    err = float(jnp.max(jnp.abs(out - ref)))
    assert err < 0.15, f"max abs error vs f32 reference too large: {err}"
    print("KERNEL_OK")
</pallas_src>

<mosaic_0001>
module attributes {stable_mosaic.version = 11 : i64} {
  func.func @seq_encoder_kernel(%arg0: i32, %arg1: memref<8x16xi32, #tpu.memory_space<vmem>>, %arg2: memref<32x128xf32, #tpu.memory_space<vmem>>, %arg3: memref<128x384xbf16, #tpu.memory_space<vmem>>, %arg4: memref<128x128xbf16, #tpu.memory_space<vmem>>, %arg5: memref<128x256xbf16, #tpu.memory_space<vmem>>, %arg6: memref<256x128xbf16, #tpu.memory_space<vmem>>, %arg7: memref<8x256xf32, #tpu.memory_space<vmem>>, %arg8: memref<8x16x128xf32, #tpu.memory_space<vmem>>) attributes {dimension_semantics = [#tpu.dimension_semantics<parallel>], iteration_bounds = array<i64: 2>, scalar_prefetch = 0 : i64, scratch_operands = 0 : i64, tpu.core_type = #tpu.core_type<tc>, window_params = [{transform_indices = @transform_0, window_bounds = array<i64: 8, 16>}, {pipeline_mode = #tpu.pipeline_mode<synchronous>, transform_indices = @transform_1, window_bounds = array<i64: 32, 128>}, {pipeline_mode = #tpu.pipeline_mode<synchronous>, transform_indices = @transform_2, window_bounds = array<i64: 128, 384>}, {pipeline_mode = #tpu.pipeline_mode<synchronous>, transform_indices = @transform_3, window_bounds = array<i64: 128, 128>}, {pipeline_mode = #tpu.pipeline_mode<synchronous>, transform_indices = @transform_4, window_bounds = array<i64: 128, 256>}, {pipeline_mode = #tpu.pipeline_mode<synchronous>, transform_indices = @transform_5, window_bounds = array<i64: 256, 128>}, {pipeline_mode = #tpu.pipeline_mode<synchronous>, transform_indices = @transform_6, window_bounds = array<i64: 8, 256>}, {transform_indices = @transform_7, window_bounds = array<i64: 8, 16, 128>}]} {
    %c0 = arith.constant 0 : index
    %c0_0 = arith.constant 0 : index
    %0 = vector.load %arg1[%c0, %c0_0] : memref<8x16xi32, #tpu.memory_space<vmem>>, vector<8x16xi32>
    %1 = vector.shape_cast %0 : vector<8x16xi32> to vector<8x16x1xi32>
    %2 = tpu.iota {dimensions = array<i32: 2>} : vector<8x16x32xi32>
    %3 = vector.broadcast %1 : vector<8x16x1xi32> to vector<8x16x32xi32>
    %4 = arith.cmpi eq, %3, %2 : vector<8x16x32xi32>
    %5 = arith.extui %4 : vector<8x16x32xi1> to vector<8x16x32xi32>
    %6 = arith.sitofp %5 : vector<8x16x32xi32> to vector<8x16x32xf32>
    %7 = vector.shape_cast %6 : vector<8x16x32xf32> to vector<128x32xf32>
    %c0_1 = arith.constant 0 : index
    %c0_2 = arith.constant 0 : index
    %8 = vector.load %arg2[%c0_1, %c0_2] : memref<32x128xf32, #tpu.memory_space<vmem>>, vector<32x128xf32>
    %cst = arith.constant dense<0.000000e+00> : vector<128x128xf32>
    %9 = tpu.matmul %7, %8, %cst {dimension_numbers = #tpu.dot_dimension_numbers<[1], [0], [0], [1], [0, 0, 1, 1], [], []>} : vector<128x32xf32>, vector<32x128xf32>, vector<128x128xf32> -> vector<128x128xf32>
    %c0_3 = arith.constant 0 : index
    %c0_4 = arith.constant 0 : index
    %10 = vector.load %arg7[%c0_3, %c0_4] : memref<8x256xf32, #tpu.memory_space<vmem>>, vector<1x128xf32>
    %c1 = arith.constant 1 : index
    %c0_5 = arith.constant 0 : index
    %11 = vector.load %arg7[%c1, %c0_5] : memref<8x256xf32, #tpu.memory_space<vmem>>, vector<1x128xf32>
    %c2 = arith.constant 2 : index
    %c0_6 = arith.constant 0 : index
    %12 = vector.load %arg7[%c2, %c0_6] : memref<8x256xf32, #tpu.memory_space<vmem>>, vector<1x128xf32>
    %c3 = arith.constant 3 : index
    %c0_7 = arith.constant 0 : index
    %13 = vector.load %arg7[%c3, %c0_7] : memref<8x256xf32, #tpu.memory_space<vmem>>, vector<1x128xf32>
    %c4 = arith.constant 4 : index
    %c0_8 = arith.constant 0 : index
    %14 = vector.load %arg7[%c4, %c0_8] : memref<8x256xf32, #tpu.memory_space<vmem>>, vector<1x128xf32>
    %c5 = arith.constant 5 : index
    %c0_9 = arith.constant 0 : index
    %15 = vector.load %arg7[%c5, %c0_9] : memref<8x256xf32, #tpu.memory_space<vmem>>, vector<1x128xf32>
    %c6 = arith.constant 6 : index
    %c0_10 = arith.constant 0 : index
    %16 = vector.load %arg7[%c6, %c0_10] : memref<8x256xf32, #tpu.memory_space<vmem>>, vector<1x256xf32>
    %c7 = arith.constant 7 : index
    %c0_11 = arith.constant 0 : index
    %17 = vector.load %arg7[%c7, %c0_11] : memref<8x256xf32, #tpu.memory_space<vmem>>, vector<1x128xf32>
    %cst_12 = arith.constant dense<0.000000e+00> : vector<128xf32>
    %18 = vector.multi_reduction <add>, %9, %cst_12 [1] : vector<128x128xf32> to vector<128xf32>
    %19 = vector.shape_cast %18 : vector<128xf32> to vector<128x1xf32>
    %cst_13 = arith.constant 1.280000e+02 : f32
    %20 = vector.broadcast %cst_13 : f32 to vector<128x1xf32>
    %21 = arith.divf %19, %20 : vector<128x1xf32>
    %22 = vector.broadcast %21 : vector<128x1xf32> to vector<128x128xf32>
    %23 = arith.subf %9, %22 : vector<128x128xf32>
    %24 = arith.mulf %23, %23 : vector<128x128xf32>
    %cst_14 = arith.constant dense<0.000000e+00> : vector<128xf32>
    %25 = vector.multi_reduction <add>, %24, %cst_14 [1] : vector<128x128xf32> to vector<128xf32>
    %26 = vector.shape_cast %25 : vector<128xf32> to vector<128x1xf32>
    %cst_15 = arith.constant 1.280000e+02 : f32
    %27 = vector.broadcast %cst_15 : f32 to vector<128x1xf32>
    %28 = arith.divf %26, %27 : vector<128x1xf32>
    %29 = vector.broadcast %21 : vector<128x1xf32> to vector<128x128xf32>
    %30 = arith.subf %9, %29 : vector<128x128xf32>
    %cst_16 = arith.constant 9.99999974E-6 : f32
    %31 = vector.broadcast %cst_16 : f32 to vector<128x1xf32>
    %32 = arith.addf %28, %31 : vector<128x1xf32>
    %33 = math.rsqrt %32 : vector<128x1xf32>
    %34 = vector.broadcast %33 : vector<128x1xf32> to vector<128x128xf32>
    %35 = arith.mulf %30, %34 : vector<128x128xf32>
    %36 = vector.broadcast %10 : vector<1x128xf32> to vector<128x128xf32>
    %37 = arith.mulf %35, %36 : vector<128x128xf32>
    %38 = vector.broadcast %11 : vector<1x128xf32> to vector<128x128xf32>
    %39 = arith.addf %37, %38 : vector<128x128xf32>
    %40 = arith.truncf %39 : vector<128x128xf32> to vector<128x128xbf16>
    %c0_17 = arith.constant 0 : index
    %c0_18 = arith.constant 0 : index
    %41 = vector.load %arg3[%c0_17, %c0_18] : memref<128x384xbf16, #tpu.memory_space<vmem>>, vector<128x384xbf16>
    %cst_19 = arith.constant dense<0.000000e+00> : vector<128x384xf32>
    %42 = tpu.matmul %40, %41, %cst_19 {dimension_numbers = #tpu.dot_dimension_numbers<[1], [0], [0], [1], [0, 0, 1, 1], [], []>} : vector<128x128xbf16>, vector<128x384xbf16>, vector<128x384xf32> -> vector<128x384xf32>
    %43 = arith.truncf %42 : vector<128x384xf32> to vector<128x384xbf16>
    %44 = vector.extract_strided_slice %43 {offsets = [0, 0], sizes = [128, 128], strides = [1, 1]} : vector<128x384xbf16> to vector<128x128xbf16>
    %45 = vector.shape_cast %44 : vector<128x128xbf16> to vector<8x16x128xbf16>
    %46 = vector.extract_strided_slice %43 {offsets = [0, 128], sizes = [128, 128], strides = [1, 1]} : vector<128x384xbf16> to vector<128x128xbf16>
    %47 = vector.shape_cast %46 : vector<128x128xbf16> to vector<8x16x128xbf16>
    %48 = vector.extract_strided_slice %43 {offsets = [0, 256], sizes = [128, 128], strides = [1, 1]} : vector<128x384xbf16> to vector<128x128xbf16>
    %49 = vector.shape_cast %48 : vector<128x128xbf16> to vector<8x16x128xbf16>
    "tpu.trace_start"() <{level = 10 : i32, message = "bqd,bkd->bqk"}> : () -> ()
    %cst_20 = arith.constant dense<0.000000e+00> : vector<8x16x16xf32>
    %50 = tpu.matmul %45, %47, %cst_20 {dimension_numbers = #tpu.dot_dimension_numbers<[2], [2], [1], [1], [0, 0, 0, 1, 1, 1], [0], [0]>} : vector<8x16x128xbf16>, vector<8x16x128xbf16>, vector<8x16x16xf32> -> vector<8x16x16xf32>
    %cst_21 = arith.constant 1.280000e+02 : f32
    "tpu.trace_stop"() : () -> ()
    %51 = math.sqrt %cst_21 : f32
    %cst_22 = arith.constant 1.000000e+00 : f32
    %52 = arith.divf %cst_22, %51 : f32
    %53 = vector.broadcast %52 : f32 to vector<8x16x16xf32>
    %54 = arith.mulf %50, %53 : vector<8x16x16xf32>
    %cst_23 = arith.constant dense<0xFF800000> : vector<8x16xf32>
    %55 = vector.multi_reduction <maximumf>, %54, %cst_23 [2] : vector<8x16x16xf32> to vector<8x16xf32>
    %56 = vector.shape_cast %55 : vector<8x16xf32> to vector<8x16x1xf32>
    %57 = vector.broadcast %56 : vector<8x16x1xf32> to vector<8x16x16xf32>
    %58 = arith.subf %54, %57 : vector<8x16x16xf32>
    %59 = math.exp %58 : vector<8x16x16xf32>
    %cst_24 = arith.constant dense<0.000000e+00> : vector<8x16xf32>
    %60 = vector.multi_reduction <add>, %59, %cst_24 [2] : vector<8x16x16xf32> to vector<8x16xf32>
    %61 = vector.shape_cast %60 : vector<8x16xf32> to vector<8x16x1xf32>
    %62 = tpu.reciprocal %61 {approx = true} : vector<8x16x1xf32> -> vector<8x16x1xf32>
    %63 = vector.broadcast %62 : vector<8x16x1xf32> to vector<8x16x16xf32>
    %64 = arith.mulf %59, %63 : vector<8x16x16xf32>
    %65 = arith.truncf %64 : vector<8x16x16xf32> to vector<8x16x16xbf16>
    "tpu.trace_start"() <{level = 10 : i32, message = "bqk,bkd->bqd"}> : () -> ()
    %cst_25 = arith.constant dense<0.000000e+00> : vector<8x16x128xf32>
    %66 = tpu.matmul %65, %49, %cst_25 {dimension_numbers = #tpu.dot_dimension_numbers<[2], [1], [1], [2], [0, 0, 0, 1, 1, 2], [0], [0]>} : vector<8x16x16xbf16>, vector<8x16x128xbf16>, vector<8x16x128xf32> -> vector<8x16x128xf32>
    "tpu.trace_stop"() : () -> ()
    %67 = vector.shape_cast %66 : vector<8x16x128xf32> to vector<128x128xf32>
    %68 = arith.truncf %67 : vector<128x128xf32> to vector<128x128xbf16>
    %c0_26 = arith.constant 0 : index
    %c0_27 = arith.constant 0 : index
    %69 = vector.load %arg4[%c0_26, %c0_27] : memref<128x128xbf16, #tpu.memory_space<vmem>>, vector<128x128xbf16>
    %cst_28 = arith.constant dense<0.000000e+00> : vector<128x128xf32>
    %70 = tpu.matmul %68, %69, %cst_28 {dimension_numbers = #tpu.dot_dimension_numbers<[1], [0], [0], [1], [0, 0, 1, 1], [], []>} : vector<128x128xbf16>, vector<128x128xbf16>, vector<128x128xf32> -> vector<128x128xf32>
    %71 = arith.addf %9, %70 : vector<128x128xf32>
    %cst_29 = arith.constant dense<0.000000e+00> : vector<128xf32>
    %72 = vector.multi_reduction <add>, %71, %cst_29 [1] : vector<128x128xf32> to vector<128xf32>
    %73 = vector.shape_cast %72 : vector<128xf32> to vector<128x1xf32>
    %cst_30 = arith.constant 1.280000e+02 : f32
    %74 = vector.broadcast %cst_30 : f32 to vector<128x1xf32>
    %75 = arith.divf %73, %74 : vector<128x1xf32>
    %76 = vector.broadcast %75 : vector<128x1xf32> to vector<128x128xf32>
    %77 = arith.subf %71, %76 : vector<128x128xf32>
    %78 = arith.mulf %77, %77 : vector<128x128xf32>
    %cst_31 = arith.constant dense<0.000000e+00> : vector<128xf32>
    %79 = vector.multi_reduction <add>, %78, %cst_31 [1] : vector<128x128xf32> to vector<128xf32>
    %80 = vector.shape_cast %79 : vector<128xf32> to vector<128x1xf32>
    %cst_32 = arith.constant 1.280000e+02 : f32
    %81 = vector.broadcast %cst_32 : f32 to vector<128x1xf32>
    %82 = arith.divf %80, %81 : vector<128x1xf32>
    %83 = vector.broadcast %75 : vector<128x1xf32> to vector<128x128xf32>
    %84 = arith.subf %71, %83 : vector<128x128xf32>
    %cst_33 = arith.constant 9.99999974E-6 : f32
    %85 = vector.broadcast %cst_33 : f32 to vector<128x1xf32>
    %86 = arith.addf %82, %85 : vector<128x1xf32>
    %87 = math.rsqrt %86 : vector<128x1xf32>
    %88 = vector.broadcast %87 : vector<128x1xf32> to vector<128x128xf32>
    %89 = arith.mulf %84, %88 : vector<128x128xf32>
    %90 = vector.broadcast %12 : vector<1x128xf32> to vector<128x128xf32>
    %91 = arith.mulf %89, %90 : vector<128x128xf32>
    %92 = vector.broadcast %13 : vector<1x128xf32> to vector<128x128xf32>
    %93 = arith.addf %91, %92 : vector<128x128xf32>
    %94 = arith.truncf %93 : vector<128x128xf32> to vector<128x128xbf16>
    %c0_34 = arith.constant 0 : index
    %c0_35 = arith.constant 0 : index
    %95 = vector.load %arg5[%c0_34, %c0_35] : memref<128x256xbf16, #tpu.memory_space<vmem>>, vector<128x256xbf16>
    %cst_36 = arith.constant dense<0.000000e+00> : vector<128x256xf32>
    %96 = tpu.matmul %94, %95, %cst_36 {dimension_numbers = #tpu.dot_dimension_numbers<[1], [0], [0], [1], [0, 0, 1, 1], [], []>} : vector<128x128xbf16>, vector<128x256xbf16>, vector<128x256xf32> -> vector<128x256xf32>
    %97 = vector.broadcast %16 : vector<1x256xf32> to vector<128x256xf32>
    %98 = arith.addf %96, %97 : vector<128x256xf32>
    %99 = arith.mulf %98, %98 : vector<128x256xf32>
    %100 = arith.mulf %98, %99 : vector<128x256xf32>
    %cst_37 = arith.constant 4.471500e-02 : f32
    %101 = vector.broadcast %cst_37 : f32 to vector<128x256xf32>
    %102 = arith.mulf %101, %100 : vector<128x256xf32>
    %103 = arith.addf %98, %102 : vector<128x256xf32>
    %cst_38 = arith.constant 0.797884583 : f32
    %104 = vector.broadcast %cst_38 : f32 to vector<128x256xf32>
    %105 = arith.mulf %104, %103 : vector<128x256xf32>
    %106 = math.tanh %105 : vector<128x256xf32>
    %cst_39 = arith.constant 1.000000e+00 : f32
    %107 = vector.broadcast %cst_39 : f32 to vector<128x256xf32>
    %108 = arith.addf %107, %106 : vector<128x256xf32>
    %cst_40 = arith.constant 5.000000e-01 : f32
    %109 = vector.broadcast %cst_40 : f32 to vector<128x256xf32>
    %110 = arith.mulf %109, %108 : vector<128x256xf32>
    %111 = arith.mulf %98, %110 : vector<128x256xf32>
    %112 = arith.truncf %111 : vector<128x256xf32> to vector<128x256xbf16>
    %c0_41 = arith.constant 0 : index
    %c0_42 = arith.constant 0 : index
    %113 = vector.load %arg6[%c0_41, %c0_42] : memref<256x128xbf16, #tpu.memory_space<vmem>>, vector<256x128xbf16>
    %cst_43 = arith.constant dense<0.000000e+00> : vector<128x128xf32>
    %114 = tpu.matmul %112, %113, %cst_43 {dimension_numbers = #tpu.dot_dimension_numbers<[1], [0], [0], [1], [0, 0, 1, 1], [], []>} : vector<128x256xbf16>, vector<256x128xbf16>, vector<128x128xf32> -> vector<128x128xf32>
    %115 = vector.broadcast %17 : vector<1x128xf32> to vector<128x128xf32>
    %116 = arith.addf %114, %115 : vector<128x128xf32>
    %117 = arith.addf %71, %116 : vector<128x128xf32>
    %cst_44 = arith.constant dense<0.000000e+00> : vector<128xf32>
    %118 = vector.multi_reduction <add>, %117, %cst_44 [1] : vector<128x128xf32> to vector<128xf32>
    %119 = vector.shape_cast %118 : vector<128xf32> to vector<128x1xf32>
    %cst_45 = arith.constant 1.280000e+02 : f32
    %120 = vector.broadcast %cst_45 : f32 to vector<128x1xf32>
    %121 = arith.divf %119, %120 : vector<128x1xf32>
    %122 = vector.broadcast %121 : vector<128x1xf32> to vector<128x128xf32>
    %123 = arith.subf %117, %122 : vector<128x128xf32>
    %124 = arith.mulf %123, %123 : vector<128x128xf32>
    %cst_46 = arith.constant dense<0.000000e+00> : vector<128xf32>
    %125 = vector.multi_reduction <add>, %124, %cst_46 [1] : vector<128x128xf32> to vector<128xf32>
    %126 = vector.shape_cast %125 : vector<128xf32> to vector<128x1xf32>
    %cst_47 = arith.constant 1.280000e+02 : f32
    %127 = vector.broadcast %cst_47 : f32 to vector<128x1xf32>
    %128 = arith.divf %126, %127 : vector<128x1xf32>
    %129 = vector.broadcast %121 : vector<128x1xf32> to vector<128x128xf32>
    %130 = arith.subf %117, %129 : vector<128x128xf32>
    %cst_48 = arith.constant 9.99999974E-6 : f32
    %131 = vector.broadcast %cst_48 : f32 to vector<128x1xf32>
    %132 = arith.addf %128, %131 : vector<128x1xf32>
    %133 = math.rsqrt %132 : vector<128x1xf32>
    %134 = vector.broadcast %133 : vector<128x1xf32> to vector<128x128xf32>
    %135 = arith.mulf %130, %134 : vector<128x128xf32>
    %136 = vector.broadcast %14 : vector<1x128xf32> to vector<128x128xf32>
    %137 = arith.mulf %135, %136 : vector<128x128xf32>
    %138 = vector.broadcast %15 : vector<1x128xf32> to vector<128x128xf32>
    %139 = arith.addf %137, %138 : vector<128x128xf32>
    %140 = vector.shape_cast %139 : vector<128x128xf32> to vector<8x16x128xf32>
    %c0_49 = arith.constant 0 : index
    %c0_50 = arith.constant 0 : index
    %c0_51 = arith.constant 0 : index
    %141 = vector.load %arg8[%c0_49, %c0_50, %c0_51] : memref<8x16x128xf32, #tpu.memory_space<vmem>>, vector<8x16x128xf32>
    tpu.vector_store %arg8[%c0_49, %c0_50, %c0_51], %140 {strides = array<i32>} : memref<8x16x128xf32, #tpu.memory_space<vmem>>, vector<8x16x128xf32>,
    return
  }
  func.func @transform_0(%arg0: i32) -> (i32, i32) {
    %c0_i32 = arith.constant 0 : i32
    %c0_i32_0 = arith.constant 0 : i32
    return %arg0, %c0_i32 : i32, i32
  }
  func.func @transform_1(%arg0: i32) -> (i32, i32) {
    %c0_i32 = arith.constant 0 : i32
    %c0_i32_0 = arith.constant 0 : i32
    %c0_i32_1 = arith.constant 0 : i32
    return %c0_i32, %c0_i32_0 : i32, i32
  }
  func.func @transform_2(%arg0: i32) -> (i32, i32) {
    %c0_i32 = arith.constant 0 : i32
    %c0_i32_0 = arith.constant 0 : i32
    %c0_i32_1 = arith.constant 0 : i32
    return %c0_i32, %c0_i32_0 : i32, i32
  }
  func.func @transform_3(%arg0: i32) -> (i32, i32) {
    %c0_i32 = arith.constant 0 : i32
    %c0_i32_0 = arith.constant 0 : i32
    %c0_i32_1 = arith.constant 0 : i32
    return %c0_i32, %c0_i32_0 : i32, i32
  }
  func.func @transform_4(%arg0: i32) -> (i32, i32) {
    %c0_i32 = arith.constant 0 : i32
    %c0_i32_0 = arith.constant 0 : i32
    %c0_i32_1 = arith.constant 0 : i32
    return %c0_i32, %c0_i32_0 : i32, i32
  }
  func.func @transform_5(%arg0: i32) -> (i32, i32) {
    %c0_i32 = arith.constant 0 : i32
    %c0_i32_0 = arith.constant 0 : i32
    %c0_i32_1 = arith.constant 0 : i32
    return %c0_i32, %c0_i32_0 : i32, i32
  }
  func.func @transform_6(%arg0: i32) -> (i32, i32) {
    %c0_i32 = arith.constant 0 : i32
    %c0_i32_0 = arith.constant 0 : i32
    %c0_i32_1 = arith.constant 0 : i32
    return %c0_i32, %c0_i32_0 : i32, i32
  }
  func.func @transform_7(%arg0: i32) -> (i32, i32, i32) {
    %c0_i32 = arith.constant 0 : i32
    %c0_i32_0 = arith.constant 0 : i32
    %c0_i32_1 = arith.constant 0 : i32
    return %arg0, %c0_i32, %c0_i32_0 : i32, i32, i32
  }
}

</mosaic_0001>

<bundles_post_ra>
// kernel: tpu_custom_call.1
= control target key start
LH: loop header
LB: loop body
LE: loop exit
PB: predicated region body
PF: predicated region fallthrough
CT: control target
= control target key end

     0   :  { %s6228_s0 = inlined_call_operand.hbm [shape: s32[16,16], index: 0, kind: input, shape index: {}]   ;;  %s6229_s1 = inlined_call_operand.hbm [shape: f32[32,128], index: 1, kind: input, shape index: {}]   ;;  %s6230_s2 = inlined_call_operand.hbm [shape: bf16[128,384], index: 2, kind: input, shape index: {}]   ;;  %s6231_s3 = inlined_call_operand.hbm [shape: bf16[128,128], index: 3, kind: input, shape index: {}]   ;;  %s6232_s4 = inlined_call_operand.hbm [shape: bf16[128,256], index: 4, kind: input, shape index: {}]   ;;  %s6233_s5 = inlined_call_operand.hbm [shape: bf16[256,128], index: 5, kind: input, shape index: {}]   ;;  %s6234_s6 = inlined_call_operand.hbm [shape: f32[8,256], index: 6, kind: input, shape index: {}]   ;;  %s6235_s7 = inlined_call_operand.hbm [shape: f32[16,16,128], index: 7, kind: output, shape index: {}]  }
   0x1   :  { %6236 = sst [smem:[#allocation20_spill]] %s6229_s1 }
   0x2   :  { %6237 = sst [smem:[#allocation21_spill]] %s6230_s2 }
   0x3   :  { %12 = vsyncpa [#allocation3], 0 }
   0x4   :  { %14 = vsyncpa [#allocation3 + $0x1], 0 }
   0x5   :  { %15 = vsyncpa [#allocation6], 0 }
   0x6   :  { %16 = vsyncpa [#allocation9], 0 }
   0x7   :  { %17 = vsyncpa [#allocation12], 0 }
   0x8   :  { %18 = vsyncpa [#allocation4], 0 }
   0x9   :  { %20 = vsyncpa [#allocation4 + $0x1], 0  ;;  %s4883_s24 = smov 0   ;;  %s4885_s25 = smov 0  }
   0xa   :  { %s4887_s26 = smov 0   ;;  %s4889_s27 = smov 0  }
   0xb LB: > { %s6238_s1 = sld [smem:[#allocation20_spill]]  ;;  %s4907_s8 = sadd.s32 4294967295, %s4825_s27   ;;  %s4825_s27 = sphi %s4889_s27, %s6253_s27   ;;  %s4821_s26 = sphi %s4887_s26, %s6252_s26   ;;  %s4817_s25 = sphi %s4885_s25, %s6251_s25   ;;  %s4813_s24 = sphi %s4883_s24, %s6250_s24  }
   0xc   : > { %p3782_p0 = scmp.ge.s32.totalorder %s4825_s27, 1  ;;  %p47_p1 = scmp.eq.s32.totalorder %s4907_s8, 0 }
   0xd   : > { %p209_p2 = scmp.lt.s32.totalorder %s4825_s27, 3  ;;  %s4827_s10 = smov [#allocation5]  }
   0xe   : > { %s222_s11 = sshll.u32 %s4827_s10, 4  ;;  %s248_s14 = sshll.u32 %s6231_s3, 4  ;;  %s223_s11 = int_to_ptr.vmem [resolvable:$true] %s222_s11  ;;  %s249_s14 = int_to_ptr.hbm [resolvable:$true] %s248_s14 }
   0xf   : > { %p4912_p3 = pnand %p3782_p0, %p209_p2  ;;  %s4828_s16 = smov [#allocation8]  }
  0x10   : > { %s250_s17 = sshll.u32 %s4828_s16, 4  ;;  %s4829_s18 = smov 128   ;;  %s251_s17 = int_to_ptr.vmem [resolvable:$true] %s250_s17 }
  0x11   : > { %s220_s30 = sshll.u32 %s6238_s1, 4  ;;  %p4209_p4 = pneg %p4912_p3  ;;  %s221_s30 = int_to_ptr.hbm [resolvable:$true] %s220_s30 }
  0x12   : > { %s4830_s19 = smov 8   ;;  %s4831_s20 = smov 64  }
  0x13   : > { %p4924_p6 = pnand %p4209_p4, %p47_p1  ;;  %s4832_s21 = smov 4  }
  0x14   : > { %s276_s28 = sshll.u32 %s6233_s5, 4  ;;  %s4833_s29 = smov [#allocation11]   ;;  %s277_s28 = int_to_ptr.hbm [resolvable:$true] %s276_s28 }
  0x15   : > { %4212 = dma.hbm_to_vmem [thread:$0]  (!%p4924_p6), %s221_s30, 512, %s223_s11, [#allocation6], %s4829_s18, %s4829_s18, %s4830_s19  }
  0x16   : > { %4218 = dma.hbm_to_vmem [thread:$0]  (!%p4924_p6), %s249_s14, 1024, %s251_s17, [#allocation9], %s4831_s20, %s4831_s20, %s4832_s21  }
  0x17   : > { %s278_s10 = sshll.u32 %s4833_s29, 4  ;;  %s6241_s2 = sld [smem:[#allocation21_spill]]  ;;  %s279_s10 = int_to_ptr.vmem [resolvable:$true] %s278_s10 }
  0x18   : > { %4224 = dma.hbm_to_vmem [thread:$0]  (!%p4924_p6), %s277_s28, 2048, %s279_s10, [#allocation12], %s4831_s20, %s4831_s20, %s4832_s21  }
  0x19   : > { %s4834_s30 = smov [#allocation7]   ;;  %s4835_s14 = smov 192  }
  0x1a   : > { %s236_s11 = sshll.u32 %s4834_s30, 4  ;;  %s4836_s17 = smov 12   ;;  %s237_s11 = int_to_ptr.vmem [resolvable:$true] %s236_s11 }
  0x1b   : > { %s262_s29 = sshll.u32 %s6232_s4, 4  ;;  %s4837_s20 = smov [#allocation10]   ;;  %s263_s29 = int_to_ptr.hbm [resolvable:$true] %s262_s29 }
  0x1c   : > { %s264_s21 = sshll.u32 %s4837_s20, 4  ;;  %s291_s12 = sshll.u32 %s6234_s6, 4  ;;  %s265_s21 = int_to_ptr.vmem [resolvable:$true] %s264_s21  ;;  %s292_s12 = int_to_ptr.hbm [resolvable:$true] %s291_s12 }
  0x1d   : > { %s234_s16 = sshll.u32 %s6241_s2, 4  ;;  %s4838_s13 = smov [#allocation13]   ;;  %s235_s16 = int_to_ptr.hbm [resolvable:$true] %s234_s16 }
  0x1e   : > { %4215 = dma.hbm_to_vmem [thread:$0]  (!%p4924_p6), %s235_s16, 3072, %s237_s11, [#allocation6], %s4835_s14, %s4835_s14, %s4836_s17  }
  0x1f   : > { %4221 = dma.hbm_to_vmem [thread:$0]  (!%p4924_p6), %s263_s29, 2048, %s265_s21, [#allocation9], %s4829_s18, %s4829_s18, %s4830_s19  }
  0x20   : > { %s293_s16 = sshll.u32 %s4838_s13, 4  ;;  %s3781_s30 = sadd.s32 4294967294, %s4825_s27   ;;  %s294_s16 = int_to_ptr.vmem [resolvable:$true] %s293_s16 }
  0x21   : > { %4227 = dma.hbm_to_vmem [thread:$0]  (!%p4924_p6), %s292_s12, 256, %s294_s16, [#allocation12]  }
  0x22   : > { %s4960_s11 = sadd.s32 1, %s4825_s27   ;;  %s33_s17 = sadd.s32 1, %s4821_s26 }
  0x23   : > { %s30_s14 = ssub.s32 %s4825_s27, %s4960_s11  ;;  %p40_p8 = scmp.ne.s32.totalorder %s4821_s26, %s4817_s25 }
  0x24   : > { %p31_p7 = scmp.eq.s32.totalorder %s30_s14, 0  ;;  %p41_p9 = scmp.eq.s32.totalorder %s4825_s27, 0 }
  0x25   : > { %p46_p10 = scmp.ne.s32.totalorder %s4817_s25, %s4813_s24  ;;  %p196_p13 = scmp.eq.s32.totalorder %s4907_s8, 1 }
  0x26   : > { %s4971_s18 = scalar_select %p31_p7, %s4821_s26, %s33_s17  }
  0x27   : > { %p4973_p11 = por %p41_p9, %p40_p8  ;;  %p4979_p12 = por %p47_p1, %p46_p10 }
  0x28   : > { %p202_p0 = scmp.eq.s32.totalorder %s3781_s30, 1  ;;  %p4242_p2 = scmp.lt.s32.totalorder %s4825_s27, 2 }
  0x29   : > { %s304_s22 = sand.u32 1, %s4821_s26   ;;  %p4986_p4 = por %p196_p13, %p40_p8 }
  0x2a   : > { %p4990_p6 = por %p202_p0, %p46_p10  ;;  %s3790_s20 = sshll.u32 %s304_s22, 3 }
  0x2b   : > { %s3791_s21 = sshll.u32 %s4825_s27, 3  ;;  %s308_s13 = scalar_lea.vmem [#allocation2], %s3790_s20 }
  0x2c   : > { %s312_s12 = scalar_lea.hbm %s6228_s0, %s3791_s21  ;;  %s316_s16 = sshll.u32 %s308_s13, 4  ;;  %s317_s16 = int_to_ptr.vmem [resolvable:$true] %s316_s16 }
  0x2d   : > { %s314_s14 = sshll.u32 %s312_s12, 4  ;;  %p5000_p7 = pnand %p4242_p2, %p4973_p11  ;;  %s315_s14 = int_to_ptr.hbm [resolvable:$true] %s314_s14 }
  0x2e   : > { %s305_s17 = scalar_lea.sflag [#allocation3], %s304_s22  ;;  %s4717_s1 = sshra.s32 %s315_s14, 4  ;;  %s4718_s1 = int_to_ptr.hbm [resolvable:$true] %s4717_s1 }
  0x2f   : > { %s4719_s2 = scalar_lea.hbm %s4718_s1, 8  ;;  %p4721_p9 = pneg %p5000_p7 }
  0x30   : > { %p4720_p8 = scmp.ne.s32.totalorder %s4718_s1, %s4719_s2  ;;  %s4724_s28 = scalar_lea.hbm %s6228_s0, 16 }
  0x31   : > { %p4725_p11 = scmp.lt.s32.totalorder %s4718_s1, %s6228_s0  ;;  %p4726_p0 = scmp.lt.s32.totalorder %s4724_s28, %s4719_s2 }
  0x32   : > { %p4722_p10 = pnand %p4721_p9, %p4720_p8 }
  0x33   : > { %p4727_p2 = por %p4726_p0, %p4725_p11 }
  0x34   : > { %p4723_p13 = pneg %p4722_p10 }
  0x36   : > { %p4728_p5 = pnand %p4727_p2, %p4723_p13 }
  0x38   : > { %4731 = shalt.err (!%p4728_p5)
}
  0x39   : > { %4231 = dma.hbm_to_vmem [thread:$0]  (!%p5000_p7), %s315_s14, 128, %s317_s16, %s305_s17  }
  0x3a   : > { %325 = sbr.rel (%p4912_p3) target bundleno = 2571 (0xa0b), region = 48  ;;  %s5017_s22 = sand.u32 (!%p4912_p3), 1, %s4817_s25  }
  0x3b   : > { %s3793_s12 = sshll.u32 (!%p4912_p3), %s5017_s22, 3  ;;  %s328_s13 = scalar_lea.sflag (!%p4912_p3), [#allocation3], %s5017_s22 }
  0x3c   : > { %s331_s20 = scalar_lea.vmem (!%p4912_p3), [#allocation2], %s3793_s12 }
  0x3f   : > { %4792 = dma.done.wait (%p4979_p12), %s328_s13, 128  }
  0x40   : > { %4794 = vsyncadd (%p4979_p12), %s328_s13, 4294967168 }
  0x41   : > { %4796 = dma.done.wait (%p47_p1), [#allocation6], 3584  }
  0x42   : > { %4798 = vsyncadd (%p47_p1), [#allocation6], 4294963712 }
  0x43   : > { %4800 = dma.done.wait (%p47_p1), [#allocation9], 3072  }
  0x44   : > { %4802 = vsyncadd (%p47_p1), [#allocation9], 4294964224 }
  0x45   : > { %4804 = dma.done.wait (%p47_p1), [#allocation12], 2304  }
  0x46   : > { %4806 = vsyncadd (%p47_p1), [#allocation12], 4294964992  ;;  %v397_v0 = vlaneseq  ;;  %v5037_v2 = vld [vmem:[%s331_s20] sm:$0xff]  ;;  %v551_v8 = vld [vmem:[#allocation5 + $0x8] sm:$0xff]  ;;  %vm554_vm0 = vcmask 261120   ;;  %v4839_v15 = vmov 0.0  }
  0x47   : > { %v396_v3 = vperm.slane %v5037_v2, 0  ;;  %v409_v4 = vperm.slane %v5037_v2, 1  ;;  %v422_v5 = vperm.slane %v5037_v2, 2  ;;  %v553_v6 = vld [vmem:[#allocation5 + $0x18] sm:$0xff]  ;;  %v552_v7 = vld [vmem:[#allocation5 + $0x10] sm:$0xff]  ;;  %v435_v10 = vperm.slane %v5037_v2, 3 }
  0x48   : > { %v398_v1 = vshrl.u32 %v397_v0, 7  ;;  %615 = vmatpush.msra.mxu0 %v553_v6  ;;  %4169 = vmatpush.msra.mxu1 %v553_v6  ;;  %v550_v11 = vld [vmem:[#allocation5] sm:$0xff]  ;;  %v448_v12 = vperm.slane %v5037_v2, 4  ;;  %v5044_v13 = vand.u32 127, %v397_v0  ;;  %v461_v17 = vperm.slane %v5037_v2, 5  ;;  %s3800_s1 = sshll.u32 %s5017_s22, 7 }
  0x49   : > { %v474_v23 = vperm.slane %v5037_v2, 6  ;;  %v487_v24 = vperm.slane %v5037_v2, 7  ;;  %v4840_v57 = vmov 128.0   ;;  %s6098_s2 = scalar_lea.vmem [#allocation14], %s3800_s1  ;;  %s4168_s9 = sshll.u32 %s4907_s8, 7 }
  0x4a   : > { %4298 = vset.pattern.permute.xlu0 %v398_v1  ;;  %4300 = vset.pattern.permute.xlu1 %v398_v1  ;;  %v405_v9 = vadd.s32 8, %v398_v1  ;;  %4311 = vrcp.f32 %v4840_v57  ;;  %v3915_v57 = vld [vmem:[#allocation7 + $0x98] sm:$0xf]  ;;  %s3647_s14 = scalar_lea.hbm %s6235_s7, %s4168_s9  ;;  %s3648_s30 = sshll.u32 %s6098_s2, 4  ;;  %s3649_s30 = int_to_ptr.vmem [resolvable:$true] %s3648_s30 }
  0x4b   : > { %4302 = vset.pattern.permute.xlu2 %v398_v1  ;;  %616 = vmatpush.msra.mxu0 %v552_v7  ;;  %s3650_s8 = sshll.u32 %s3647_s14, 4  ;;  %s3635_s17 = scalar_lea.sflag [#allocation4], %s5017_s22  ;;  %s3651_s8 = int_to_ptr.hbm [resolvable:$true] %s3650_s8 }
  0x4c   : > { %4170 = vmatpush.msra.mxu1 %v552_v7  ;;  %s4761_s21 = sshra.s32 %s3651_s8, 4  ;;  %s4767_s12 = scalar_lea.hbm %s6235_s7, 256  ;;  %s4762_s21 = int_to_ptr.hbm [resolvable:$true] %s4761_s21 }
  0x4d   : > { %617 = vmatpush.msra.mxu0 %v551_v8  ;;  %s4763_s28 = scalar_lea.hbm %s4762_s21, 128  ;;  %p4768_p12 = scmp.lt.s32.totalorder %s4762_s21, %s6235_s7 }
  0x4e   : > { %4171 = vmatpush.msra.mxu1 %v551_v8  ;;  %p4764_p1 = scmp.ne.s32.totalorder %s4762_s21, %s4763_s28  ;;  %p4769_p7 = scmp.lt.s32.totalorder %s4767_s12, %s4763_s28 }
  0x4f   : > { %618 = vmatpush.msra.mxu0 %v550_v11 }
  0x50   : > { %4172 = vmatpush.msra.mxu1 %v550_v11  ;;  %v4312_v58 = vpop.eup %4311  ;;  %p4765_p3 = pnand %p4764_p1, %p4986_p4  ;;  %p4770_p8 = por %p4769_p7, %p4768_p12 }
  0x51   : > { %v710_v59 = vmul.f32 128.0, %v4312_v58 }
  0x52   : > { %401 = vperm.xlu0 %4298, %v396_v3   ;;  %414 = vperm.xlu1 %4300, %v409_v4   ;;  %p4766_p5 = pneg %p4765_p3 }
  0x53   : > { %427 = vperm.xlu2 %4302, %v422_v5   ;;  %v711_v60 = vsub.f32 1.0, %v710_v59 }
  0x54   : > { %p4771_p9 = pnand %p4770_p8, %p4766_p5 }
  0x55   : > { %v712_v61 = vmul.f32 %v4312_v58, %v711_v60 }
  0x57   : > { %v713_v62 = vadd.f32 %v4312_v58, %v712_v61  ;;  %v3895_v61 = vld [vmem:[#allocation7 + $0x78] sm:$0xf] }
  0x5a   : > { %4299 = vset.pattern.permute.xlu0 %v405_v9  ;;  %4301 = vset.pattern.permute.xlu1 %v405_v9 }
  0x5b   : > { %4303 = vset.pattern.permute.xlu2 %v405_v9 }
  0x62   : > { %407 = vperm.xlu0 %4299, %v396_v3   ;;  %420 = vperm.xlu1 %4301, %v409_v4  }
  0x63   : > { %433 = vperm.xlu2 %4303, %v422_v5  }
  0x6a   : > { %4304 = vset.pattern.permute.xlu1 %v398_v1  ;;  %4305 = vset.pattern.permute.xlu0 %v398_v1 }
  0x6b   : > { %446 = vperm.xlu2 %4303, %v435_v10  }
  0x72   : > { %440 = vperm.xlu1 %4304, %v435_v10   ;;  %453 = vperm.xlu0 %4305, %v448_v12  }
  0x73   : > { %4307 = vset.pattern.permute.xlu2 %v398_v1 }
  0x7a   : > { %4306 = vset.pattern.permute.xlu1 %v405_v9  ;;  %4308 = vset.pattern.permute.xlu0 %v405_v9 }
  0x7b   : > { %466 = vperm.xlu2 %4307, %v461_v17  }
  0x82   : > { %459 = vperm.xlu1 %4306, %v448_v12   ;;  %485 = vperm.xlu0 %4308, %v474_v23  }
  0x83   : > { %479 = vperm.xlu2 %4307, %v474_v23  }
  0x8a   : > { %472 = vperm.xlu1 %4306, %v461_v17  }
  0x8b   : > { %4310 = vset.pattern.permute.xlu2 %v405_v9 }
  0x92   : > { %4309 = vset.pattern.permute.xlu1 %v398_v1 }
  0x93   : > { %498 = vperm.xlu2 %4310, %v487_v24  }
  0x9a   : > { %492 = vperm.xlu1 %4309, %v487_v24  }
  0xad   : > { %v428_v26 = vpop.permute.xlu2 %427 }
  0xae   : > { %vm506_vm5 = vcmp.eq.s32.totalorder %v428_v26, %v5044_v13 }
  0xaf   : > { %v3805_v27 = vsel %vm506_vm5, 1.0, %v4839_v15 }
  0xbd   : > { %v434_v28 = vpop.permute.xlu2 %433 }
  0xbe   : > { %vm507_vm6 = vcmp.eq.s32.totalorder %v434_v28, %v5044_v13 }
  0xbf   : > { %v3806_v29 = vsel %vm507_vm6, 1.0, %v4839_v15 }
  0xc4   : > { %v402_v14 = vpop.permute.xlu0 %401  ;;  %v415_v19 = vpop.permute.xlu1 %414 }
  0xc5   : > { %vm502_vm1 = vcmp.eq.s32.totalorder %v402_v14, %v5044_v13  ;;  %vm504_vm3 = vcmp.eq.s32.totalorder %v415_v19, %v5044_v13  ;;  %v447_v32 = vpop.permute.xlu2 %446 }
  0xc6   : > { %v3801_v16 = vsel %vm502_vm1, 1.0, %v4839_v15  ;;  %v3803_v21 = vsel %vm504_vm3, 1.0, %v4839_v15  ;;  %vm509_vm8 = vcmp.eq.s32.totalorder %v447_v32, %v5044_v13 }
  0xc7   : > { %3817 = vmatmul.msk.f32.vlgmr.msra.gmra.mxu0 %vm554_vm0, %v3801_v16  ;;  %v3808_v33 = vsel %vm509_vm8, 1.0, %v4839_v15 }
  0xd4   : > { %v408_v18 = vpop.permute.xlu0 %407  ;;  %v421_v22 = vpop.permute.xlu1 %420 }
  0xd5   : > { %vm503_vm2 = vcmp.eq.s32.totalorder %v408_v18, %v5044_v13  ;;  %vm505_vm4 = vcmp.eq.s32.totalorder %v421_v22, %v5044_v13  ;;  %v467_v37 = vpop.permute.xlu2 %466 }
  0xd6   : > { %v3802_v20 = vsel %vm503_vm2, 1.0, %v4839_v15  ;;  %v3804_v25 = vsel %vm505_vm4, 1.0, %v4839_v15  ;;  %vm512_vm10 = vcmp.eq.s32.totalorder %v467_v37, %v5044_v13  ;;  %v4125_v37 = vld [vmem:[#allocation7 + $0xb0] sm:$0xf0] }
  0xd7   : > { %3818 = vmatmul.msk.f32.gmra.mxu0 %vm554_vm0, %v3802_v20  ;;  %v3811_v38 = vsel %vm512_vm10, 1.0, %v4839_v15 }
  0xd8   : > { %3827 = vmatmul.msk.f32.vlgmr.msra.gmra.mxu1 %vm554_vm0, %v3811_v38  ;;  %v4124_v38 = vld [vmem:[#allocation7 + $0xac] sm:$0xf] }
  0xdd   : > { %v480_v43 = vpop.permute.xlu2 %479 }
  0xde   : > { %vm514_vm13 = vcmp.eq.s32.totalorder %v480_v43, %v5044_v13  ;;  %v4126_v43 = vld [vmem:[#allocation7 + $0xb8] sm:$0xf0] }
  0xdf   : > { %3819 = vmatmul.msk.f32.gmra.mxu0 %vm554_vm0, %v3803_v21  ;;  %v3813_v44 = vsel %vm514_vm13, 1.0, %v4839_v15 }
  0xe4   : > { %v441_v30 = vpop.permute.xlu1 %440  ;;  %v454_v34 = vpop.permute.xlu0 %453 }
  0xe5   : > { %vm508_vm7 = vcmp.eq.s32.totalorder %v441_v30, %v5044_v13  ;;  %vm510_vm9 = vcmp.eq.s32.totalorder %v454_v34, %v5044_v13 }
  0xe6   : > { %v3807_v31 = vsel %vm508_vm7, 1.0, %v4839_v15  ;;  %v3809_v35 = vsel %vm510_vm9, 1.0, %v4839_v15 }
  0xe7   : > { %3820 = vmatmul.msk.f32.gmra.mxu0 %vm554_vm0, %v3804_v25 }
  0xed   : > { %v499_v52 = vpop.permute.xlu2 %498 }
  0xee   : > { %vm517_vm1 = vcmp.eq.s32.totalorder %v499_v52, %v5044_v13 }
  0xef   : > { %3821 = vmatmul.msk.f32.gmra.mxu0 %vm554_vm0, %v3805_v27  ;;  %v3816_v53 = vsel %vm517_vm1, 1.0, %v4839_v15 }
  0xf4   : > { %v460_v36 = vpop.permute.xlu1 %459  ;;  %v486_v46 = vpop.permute.xlu0 %485 }
  0xf5   : > { %vm511_vm11 = vcmp.eq.s32.totalorder %v460_v36, %v5044_v13  ;;  %vm515_vm14 = vcmp.eq.s32.totalorder %v486_v46, %v5044_v13  ;;  %v3919_v36 = vld [vmem:[#allocation7 + $0xa8] sm:$0xf] }
  0xf6   : > { %v3810_v39 = vsel %vm511_vm11, 1.0, %v4839_v15  ;;  %v3814_v47 = vsel %vm515_vm14, 1.0, %v4839_v15 }
  0xf7   : > { %3822 = vmatmul.msk.f32.gmra.mxu0 %vm554_vm0, %v3806_v29 }
  0xfc   : > { %v473_v40 = vpop.permute.xlu1 %472 }
  0xfd   : > { %vm513_vm12 = vcmp.eq.s32.totalorder %v473_v40, %v5044_v13  ;;  %v3921_v40 = vld [vmem:[#allocation7 + $0xb4] sm:$0xf0] }
  0xfe   : > { %v3812_v41 = vsel %vm513_vm12, 1.0, %v4839_v15 }
  0xff   : > { %3823 = vmatmul.msk.f32.gmra.mxu0 %vm554_vm0, %v3807_v31  ;;  %3828 = vmatmul.msk.f32.gmra.mxu1 %vm554_vm0, %v3812_v41  ;;  %v3927_v41 = vld [vmem:[#allocation7 + $0xb0] sm:$0xf] }
 0x100   : > { %v3928_v46 = vor.u32 %v4126_v43, %v3927_v41  ;;  %v3859_v43 = vld [vmem:[#allocation7 + $0x30] sm:$0xf] }
 0x102   : > { %1302 = vmatpush.bf16.msrb.mxu0 %v3928_v46  ;;  %4173 = vmatpush.bf16.msra.mxu3 %v3928_v46  ;;  %v4109_v46 = vld [vmem:[#allocation7 + $0x34] sm:$0xf] }
 0x107   : > { %3824 = vmatmul.msk.f32.gmra.mxu0 %vm554_vm0, %v3808_v33  ;;  %3829 = vmatmul.msk.f32.gmra.mxu1 %vm554_vm0, %v3813_v44  ;;  %v3924_v44 = vor.u32 %v4124_v38, %v3921_v40 }
 0x109   : > { %1253 = vmatpush.bf16.msra.mxu2 %v3924_v44  ;;  %v4110_v44 = vld [vmem:[#allocation7 + $0x38] sm:$0xf0] }
 0x10c   : > { %v493_v49 = vpop.permute.xlu1 %492 }
 0x10d   : > { %vm516_vm15 = vcmp.eq.s32.totalorder %v493_v49, %v5044_v13  ;;  %v4122_v49 = vld [vmem:[#allocation7 + $0x98] sm:$0xf0] }
 0x10e   : > { %v3815_v50 = vsel %vm516_vm15, 1.0, %v4839_v15 }
 0x10f   : > { %3825 = vmatmul.msk.f32.gmra.mxu0 %vm554_vm0, %v3809_v35  ;;  %3830 = vmatmul.msk.f32.gmra.mxu1 %vm554_vm0, %v3814_v47  ;;  %v3907_v47 = vld [vmem:[#allocation7 + $0x90] sm:$0xf] }
 0x110   : > { %v3908_v52 = vor.u32 %v4122_v49, %v3907_v47  ;;  %v3860_v47 = vor.u32 %v4110_v44, %v3859_v43  ;;  %v3861_v49 = vld [vmem:[#allocation7 + $0x3c] sm:$0xf0] }
 0x117   : > { %3826 = vmatmul.msk.f32.gmra.mxu0 %vm554_vm0, %v3810_v39  ;;  %3831 = vmatmul.msk.f32.gmra.mxu1 %vm554_vm0, %v3815_v50  ;;  %v3920_v39 = vor.u32 %v4125_v37, %v3919_v36  ;;  %v4121_v50 = vld [vmem:[#allocation7 + $0x94] sm:$0xf]  ;;  %v3879_v36 = vld [vmem:[#allocation7 + $0x50] sm:$0xf]  ;;  %v4114_v37 = vld [vmem:[#allocation7 + $0x58] sm:$0xf0] }
 0x119   : > { %1204 = vmatpush.bf16.msrb.mxu1 %v3920_v39  ;;  %v3880_v39 = vor.u32 %v4114_v37, %v3879_v36 }
 0x11d   : > { %1205 = vmatpush.bf16.msrb.mxu1 %v3908_v52  ;;  %v4111_v52 = vld [vmem:[#allocation7 + $0x40] sm:$0xf0] }
 0x11f   : > { %3832 = vmatmul.msk.f32.gmra.mxu1 %vm554_vm0, %v3816_v53  ;;  %vm714_vm0 = vweird.f32 %v4312_v58  ;;  %v3909_v53 = vld [vmem:[#allocation7 + $0x9c] sm:$0xf0] }
 0x120   : > { %v5118_v63 = vsel %vm714_vm0, %v4312_v58, %v713_v62  ;;  %v4123_v58 = vld [vmem:[#allocation7 + $0xa0] sm:$0xf0]  ;;  %v3912_v59 = vor.u32 %v4121_v50, %v3909_v53  ;;  %v3867_v50 = vld [vmem:[#allocation7 + $0x38] sm:$0xf] }
 0x121   : > { %v3916_v60 = vor.u32 %v4123_v58, %v3915_v57  ;;  %v4119_v62 = vld [vmem:[#allocation7 + $0x80] sm:$0xf0]  ;;  %v3864_v57 = vor.u32 %v4109_v46, %v3861_v49  ;;  %v3868_v58 = vor.u32 %v4111_v52, %v3867_v50 }
 0x122   : > { %1254 = vmatpush.bf16.msra.mxu2 %v3912_v59  ;;  %v3847_v59 = vld [vmem:[#allocation7 + $0x18] sm:$0xf] }
 0x123   : > { %1303 = vmatpush.bf16.msrb.mxu0 %v3916_v60  ;;  %4174 = vmatpush.bf16.msra.mxu3 %v3916_v60  ;;  %v4107_v60 = vld [vmem:[#allocation7 + $0x20] sm:$0xf0] }
 0x144   : > { %v5085_v42 = vpop.f32.mrf.mxu0 }
 0x145   : > { %677 = vadd.xlane.f32.xlu1 %v5085_v42 }
 0x154   : > { %v5091_v45 = vpop.f32.mrf.mxu0 }
 0x155   : > { %679 = vadd.xlane.f32.xlu2 %v5091_v45  ;;  %v5153_v20 = vpop.f32.mrf.mxu1 }
 0x15c   : > { %v5097_v48 = vpop.f32.mrf.mxu0 }
 0x15d   : > { %681 = vadd.xlane.f32.xlu0 %v5097_v48 }
 0x164   : > { %v5103_v51 = vpop.f32.mrf.mxu0 }
 0x165   : > { %683 = vadd.xlane.f32.xlu2 %v5103_v51 }
 0x16c   : > { %v5109_v54 = vpop.f32.mrf.mxu0 }
 0x16d   : > { %685 = vadd.xlane.f32.xlu1 %v5109_v54 }
 0x174   : > { %v5112_v55 = vpop.f32.mrf.mxu0 }
 0x175   : > { %687 = vadd.xlane.f32.xlu2 %v5112_v55 }
 0x17c   : > { %v5115_v56 = vpop.f32.mrf.mxu0  ;;  %v5163_v26 = vpop.f32.mrf.mxu1 }
 0x17d   : > { %689 = vadd.xlane.f32.xlu2 %v5115_v56 }
 0x184   : > { %v5126_v4 = vpop.f32.mrf.mxu0  ;;  %v5172_v31 = vpop.f32.mrf.mxu1 }
 0x18c   : > { %v5133_v8 = vpop.f32.mrf.mxu0  ;;  %v5180_v34 = vpop.f32.mrf.mxu1 }
 0x194   : > { %v5148_v17 = vpop.f32.mrf.mxu0  ;;  %v5183_v35 = vpop.f32.mrf.mxu1 }
 0x1b8   : > { %v678_v0 = vpop.xlane.xlu1 %677 }
 0x1b9   : > { %v716_v1 = vmul.f32 %v5118_v63, %v678_v0  ;;  %v4118_v0 = vld [vmem:[#allocation7 + $0x7c] sm:$0xf] }
 0x1bb   : > { %v5122_v2 = vsub.f32 %v5085_v42, %v716_v1  ;;  %v3896_v1 = vor.u32 %v4119_v62, %v3895_v61  ;;  %v4106_v61 = vld [vmem:[#allocation7 + $0x1c] sm:$0xf]  ;;  %v3848_v62 = vor.u32 %v4107_v60, %v3847_v59  ;;  %v5206_v59 = vpop.f32.mrf.mxu1 }
 0x1bd   : > { %v748_v3 = vmul.f32 %v5122_v2, %v5122_v2  ;;  %1206 = vmatpush.bf16.msrb.mxu1 %v3896_v1  ;;  %v3855_v1 = vld [vmem:[#allocation7 + $0x20] sm:$0xf] }
 0x1bf   : > { %764 = vadd.xlane.f32.xlu0 %v748_v3  ;;  %v3897_v3 = vld [vmem:[#allocation7 + $0x84] sm:$0xf0] }
 0x1c7   : > { %691 = vadd.xlane.f32.xlu0 %v5126_v4 }
 0x1c8   : > { %v680_v5 = vpop.xlane.xlu2 %679 }
 0x1c9   : > { %v717_v6 = vmul.f32 %v5118_v63, %v680_v5  ;;  %v3903_v5 = vld [vmem:[#allocation7 + $0x80] sm:$0xf] }
 0x1cb   : > { %v5131_v7 = vsub.f32 %v5091_v45, %v717_v6  ;;  %v4120_v6 = vld [vmem:[#allocation7 + $0x88] sm:$0xf0] }
 0x1cd   : > { %v749_v9 = vmul.f32 %v5131_v7, %v5131_v7 }
 0x1cf   : > { %766 = vadd.xlane.f32.xlu1 %v749_v9  ;;  %693 = vadd.xlane.f32.xlu0 %v5133_v8  ;;  %v3900_v9 = vor.u32 %v4118_v0, %v3897_v3  ;;  %v3849_v0 = vld [vmem:[#allocation7 + $0x24] sm:$0xf0]  ;;  %v4108_v3 = vld [vmem:[#allocation7 + $0x28] sm:$0xf0] }
 0x1d0   : > { %v682_v10 = vpop.xlane.xlu0 %681 }
 0x1d1   : > { %v718_v11 = vmul.f32 %v5118_v63, %v682_v10  ;;  %v3904_v10 = vor.u32 %v4120_v6, %v3903_v5  ;;  %1255 = vmatpush.bf16.msra.mxu2 %v3900_v9  ;;  %v3852_v5 = vor.u32 %v4106_v61, %v3849_v0  ;;  %v3856_v6 = vor.u32 %v4108_v3, %v3855_v1 }
 0x1d3   : > { %v5140_v12 = vsub.f32 %v5097_v48, %v718_v11  ;;  %1304 = vmatpush.bf16.msrb.mxu0 %v3904_v10  ;;  %v3883_v11 = vld [vmem:[#allocation7 + $0x60] sm:$0xf]  ;;  %4175 = vmatpush.bf16.msra.mxu3 %v3904_v10 }
 0x1d5   : > { %v750_v13 = vmul.f32 %v5140_v12, %v5140_v12 }
 0x1d7   : > { %768 = vadd.xlane.f32.xlu1 %v750_v13  ;;  %v4116_v13 = vld [vmem:[#allocation7 + $0x68] sm:$0xf0] }
 0x1d8   : > { %v684_v14 = vpop.xlane.xlu2 %683 }
 0x1d9   : > { %v719_v15 = vmul.f32 %v5118_v63, %v684_v14  ;;  %v4115_v14 = vld [vmem:[#allocation7 + $0x64] sm:$0xf] }
 0x1db   : > { %v5146_v16 = vsub.f32 %v5103_v51, %v719_v15  ;;  %v3884_v15 = vor.u32 %v4116_v13, %v3883_v11  ;;  %v3835_v11 = vld [vmem:[#allocation7] sm:$0xf]  ;;  %v4104_v13 = vld [vmem:[#allocation7 + $0x8] sm:$0xf0] }
 0x1dd   : > { %v751_v18 = vmul.f32 %v5146_v16, %v5146_v16  ;;  %1207 = vmatpush.bf16.msrb.mxu1 %v3884_v15  ;;  %v3836_v15 = vor.u32 %v4104_v13, %v3835_v11 }
 0x1df   : > { %770 = vadd.xlane.f32.xlu2 %v751_v18  ;;  %695 = vadd.xlane.f32.xlu1 %v5148_v17  ;;  %v3885_v18 = vld [vmem:[#allocation7 + $0x6c] sm:$0xf0] }
 0x1e0   : > { %v686_v19 = vpop.xlane.xlu1 %685 }
 0x1e1   : > { %v720_v21 = vmul.f32 %v5118_v63, %v686_v19  ;;  %v3891_v19 = vld [vmem:[#allocation7 + $0x68] sm:$0xf] }
 0x1e3   : > { %v5157_v22 = vsub.f32 %v5109_v54, %v720_v21  ;;  %v4117_v21 = vld [vmem:[#allocation7 + $0x70] sm:$0xf0] }
 0x1e5   : > { %v752_v23 = vmul.f32 %v5157_v22, %v5157_v22 }
 0x1e7   : > { %772 = vadd.xlane.f32.xlu2 %v752_v23  ;;  %697 = vadd.xlane.f32.xlu1 %v5153_v20  ;;  %v3888_v23 = vor.u32 %v4115_v14, %v3885_v18  ;;  %v4103_v14 = vld [vmem:[#allocation7 + $0x4] sm:$0xf]  ;;  %v3837_v18 = vld [vmem:[#allocation7 + $0xc] sm:$0xf0] }
 0x1e8   : > { %v688_v24 = vpop.xlane.xlu2 %687 }
 0x1e9   : > { %v721_v25 = vmul.f32 %v5118_v63, %v688_v24  ;;  %v3892_v24 = vor.u32 %v4117_v21, %v3891_v19  ;;  %1256 = vmatpush.bf16.msra.mxu2 %v3888_v23  ;;  %v3843_v19 = vld [vmem:[#allocation7 + $0x8] sm:$0xf]  ;;  %v4105_v21 = vld [vmem:[#allocation7 + $0x10] sm:$0xf0] }
 0x1eb   : > { %v5166_v27 = vsub.f32 %v5112_v55, %v721_v25  ;;  %1305 = vmatpush.bf16.msrb.mxu0 %v3892_v24  ;;  %v3871_v25 = vld [vmem:[#allocation7 + $0x48] sm:$0xf]  ;;  %4176 = vmatpush.bf16.msra.mxu3 %v3892_v24 }
 0x1ed   : > { %v753_v28 = vmul.f32 %v5166_v27, %v5166_v27 }
 0x1ef   : > { %699 = vadd.xlane.f32.xlu2 %v5163_v26  ;;  %774 = vadd.xlane.f32.xlu0 %v753_v28  ;;  %v4113_v28 = vld [vmem:[#allocation7 + $0x50] sm:$0xf0] }
 0x1f0   : > { %v690_v29 = vpop.xlane.xlu2 %689  ;;  %1306 = vmatpush.bf16.msrb.mxu0 %v3880_v39  ;;  %4177 = vmatpush.bf16.msra.mxu3 %v3880_v39 }
 0x1f1   : > { %v722_v30 = vmul.f32 %v5118_v63, %v690_v29  ;;  %v4112_v29 = vld [vmem:[#allocation7 + $0x4c] sm:$0xf] }
 0x1f3   : > { %v5175_v32 = vsub.f32 %v5115_v56, %v722_v30  ;;  %v3872_v30 = vor.u32 %v4113_v28, %v3871_v25  ;;  %v3840_v25 = vor.u32 %v4103_v14, %v3837_v18  ;;  %v3844_v28 = vor.u32 %v4105_v21, %v3843_v19 }
 0x1f4   : > { %1307 = vmatpush.bf16.msrb.mxu0 %v3868_v58  ;;  %4178 = vmatpush.bf16.msra.mxu3 %v3868_v58 }
 0x1f5   : > { %v754_v33 = vmul.f32 %v5175_v32, %v5175_v32  ;;  %1208 = vmatpush.bf16.msrb.mxu1 %v3872_v30 }
 0x1f7   : > { %701 = vadd.xlane.f32.xlu2 %v5172_v31  ;;  %776 = vadd.xlane.f32.xlu0 %v754_v33  ;;  %v3873_v33 = vld [vmem:[#allocation7 + $0x54] sm:$0xf0] }
 0x1f8   : > { %v3876_v38 = vor.u32 %v4112_v29, %v3873_v33  ;;  %1308 = vmatpush.bf16.msrb.mxu0 %v3856_v6  ;;  %4179 = vmatpush.bf16.msra.mxu3 %v3856_v6 }
 0x1f9   : > { %1209 = vmatpush.bf16.msrb.mxu1 %v3860_v47 }
 0x1fa   : > { %1257 = vmatpush.bf16.msra.mxu2 %v3876_v38 }
 0x1fc   : > { %1309 = vmatpush.bf16.msrb.mxu0 %v3844_v28  ;;  %4180 = vmatpush.bf16.msra.mxu3 %v3844_v28 }
 0x1fd   : > { %1210 = vmatpush.bf16.msrb.mxu1 %v3848_v62 }
 0x1fe   : > { %1258 = vmatpush.bf16.msra.mxu2 %v3864_v57 }
 0x1ff   : > { %703 = vadd.xlane.f32.xlu0 %v5180_v34 }
 0x201   : > { %1211 = vmatpush.bf16.msrb.mxu1 %v3836_v15  ;;  %v5215_v15 = vld [vmem:[#allocation13] ss:$0 sm:$0xff] }
 0x202   : > { %1259 = vmatpush.bf16.msra.mxu2 %v3852_v5 }
 0x206   : > { %1260 = vmatpush.bf16.msra.mxu2 %v3840_v25 }
 0x207   : > { %705 = vadd.xlane.f32.xlu0 %v5183_v35 }
 0x232   : > { %v765_v40 = vpop.xlane.xlu0 %764 }
 0x233   : > { %v796_v41 = vmul.f32 %v765_v40, %v5118_v63 }
 0x235   : > { %v5187_v53 = vadd.f32 1e-05, %v796_v41 }
 0x237   : > { %4313 = vrsqrt.f32 %v5187_v53  ;;  %vm834_vm3 = vweird.f32 %v5187_v53 }
 0x23a   : > { %v692_v9 = vpop.xlane.xlu0 %691 }
 0x23b   : > { %v723_v10 = vmul.f32 %v5118_v63, %v692_v9 }
 0x23d   : > { %v4314_v23 = vpop.eup %4313  ;;  %v5192_v24 = vsub.f32 %v5126_v4, %v723_v10 }
 0x23e   : > { %v829_v29 = vmul.f32 %v4314_v23, %v5187_v53  ;;  %vm835_vm2 = vweird.f32 %v4314_v23 }
 0x23f   : > { %v755_v30 = vmul.f32 %v5192_v24, %v5192_v24  ;;  %vm836_vm4 = vmor %vm834_vm3, %vm835_vm2 }
 0x240   : > { %v830_v33 = vmul.f32 %v4314_v23, %v829_v29 }
 0x241   : > { %778 = vadd.xlane.f32.xlu1 %v755_v30  ;;  %v5221_v30 = vld [vmem:[#allocation13 + $0x1] ss:$0 sm:$0xff] }
 0x242   : > { %v767_v36 = vpop.xlane.xlu1 %766  ;;  %v694_v37 = vpop.xlane.xlu0 %693  ;;  %v831_v43 = vmul.f32 0.5, %v830_v33 }
 0x243   : > { %v797_v38 = vmul.f32 %v767_v36, %v5118_v63  ;;  %v724_v39 = vmul.f32 %v5118_v63, %v694_v37 }
 0x244   : > { %v832_v46 = vsub.f32 1.5, %v831_v43 }
 0x245   : > { %v813_v40 = vadd.f32 1e-05, %v797_v38  ;;  %v5200_v41 = vsub.f32 %v5133_v8, %v724_v39 }
 0x246   : > { %v833_v57 = vmul.f32 %v4314_v23, %v832_v46 }
 0x247   : > { %4315 = vrsqrt.f32 %v813_v40  ;;  %v756_v44 = vmul.f32 %v5200_v41, %v5200_v41  ;;  %vm844_vm6 = vweird.f32 %v813_v40 }
 0x248   : > { %v837_v61 = vsel %vm836_vm4, %v4314_v23, %v833_v57 }
 0x249   : > { %780 = vadd.xlane.f32.xlu1 %v756_v44  ;;  %v988_v10 = vmul.f32 %v837_v61, %v5122_v2 }
 0x24a   : > { %v769_v47 = vpop.xlane.xlu1 %768 }
 0x24b   : > { %v798_v49 = vmul.f32 %v769_v47, %v5118_v63  ;;  %v1004_v2 = vmul.f32 %v988_v10, %v5215_v15 }
 0x24d   : > { %v4316_v50 = vpop.eup %4315  ;;  %v814_v52 = vadd.f32 1e-05, %v798_v49 }
 0x24e   : > { %v839_v58 = vmul.f32 %v4316_v50, %v813_v40  ;;  %vm845_vm5 = vweird.f32 %v4316_v50 }
 0x24f   : > { %4317 = vrsqrt.f32 %v814_v52  ;;  %vm846_vm7 = vmor %vm844_vm6, %vm845_vm5  ;;  %vm854_vm9 = vweird.f32 %v814_v52 }
 0x250   : > { %v840_v60 = vmul.f32 %v4316_v50, %v839_v58 }
 0x251   : > { %707 = vadd.xlane.f32.xlu1 %v5206_v59 }
 0x252   : > { %v841_v62 = vmul.f32 0.5, %v840_v60  ;;  %v771_v0 = vpop.xlane.xlu2 %770  ;;  %v696_v1 = vpop.xlane.xlu1 %695 }
 0x253   : > { %v799_v3 = vmul.f32 %v771_v0, %v5118_v63  ;;  %v725_v5 = vmul.f32 %v5118_v63, %v696_v1 }
 0x254   : > { %v842_v6 = vsub.f32 1.5, %v841_v62 }
 0x255   : > { %v4318_v9 = vpop.eup %4317  ;;  %v815_v53 = vadd.f32 1e-05, %v799_v3  ;;  %v5213_v11 = vsub.f32 %v5148_v17, %v725_v5 }
 0x256   : > { %v843_v13 = vmul.f32 %v4316_v50, %v842_v6  ;;  %v849_v14 = vmul.f32 %v4318_v9, %v814_v52  ;;  %vm855_vm8 = vweird.f32 %v4318_v9 }
 0x257   : > { %4319 = vrsqrt.f32 %v815_v53  ;;  %v757_v18 = vmul.f32 %v5213_v11, %v5213_v11  ;;  %vm856_vm10 = vmor %vm854_vm9, %vm855_vm8  ;;  %vm864_vm12 = vweird.f32 %v815_v53 }
 0x258   : > { %v847_v19 = vsel %vm846_vm7, %v4316_v50, %v843_v13  ;;  %v850_v21 = vmul.f32 %v4318_v9, %v849_v14 }
 0x259   : > { %v989_v23 = vmul.f32 %v847_v19, %v5131_v7  ;;  %782 = vadd.xlane.f32.xlu2 %v757_v18  ;;  %v1020_v7 = vadd.f32 %v1004_v2, %v5221_v30 }
 0x25a   : > { %v851_v25 = vmul.f32 0.5, %v850_v21  ;;  %v773_v28 = vpop.xlane.xlu2 %772  ;;  %v698_v29 = vpop.xlane.xlu1 %697 }
 0x25b   : > { %v800_v33 = vmul.f32 %v773_v28, %v5118_v63  ;;  %v726_v36 = vmul.f32 %v5118_v63, %v698_v29  ;;  %v1005_v37 = vmul.f32 %v989_v23, %v5215_v15 }
 0x25c   : > { %v852_v38 = vsub.f32 1.5, %v851_v25 }
 0x25d   : > { %v4320_v39 = vpop.eup %4319  ;;  %v816_v40 = vadd.f32 1e-05, %v800_v33  ;;  %v5227_v43 = vsub.f32 %v5153_v20, %v726_v36  ;;  %v1021_v44 = vadd.f32 %v1005_v37, %v5221_v30 }
 0x25e   : > { %v853_v46 = vmul.f32 %v4318_v9, %v852_v38  ;;  %v859_v47 = vmul.f32 %v4320_v39, %v815_v53  ;;  %vm865_vm11 = vweird.f32 %v4320_v39 }
 0x25f   : > { %4321 = vrsqrt.f32 %v816_v40  ;;  %v758_v49 = vmul.f32 %v5227_v43, %v5227_v43  ;;  %v1036_v50 = vpack.c.bf16 %v1021_v44, %v1020_v7  ;;  %vm866_vm13 = vmor %vm864_vm12, %vm865_vm11  ;;  %vm874_vm15 = vweird.f32 %v816_v40 }
 0x260   : > { %v860_v57 = vmul.f32 %v4320_v39, %v859_v47  ;;  %v857_v58 = vsel %vm856_vm10, %v4318_v9, %v853_v46 }
 0x261   : > { %784 = vadd.xlane.f32.xlu2 %v758_v49  ;;  %1212 = vmatmul.bf16.vlgmr.msrb.gmra.mxu1 %v1036_v50  ;;  %v990_v6 = vmul.f32 %v857_v58, %v5140_v12 }
 0x262   : > { %v861_v60 = vmul.f32 0.5, %v860_v57  ;;  %1261 = vmatmul.bf16.vlgmr.msra.gmra.mxu2 %v1036_v50  ;;  %1310 = vmatmul.bf16.vlgmr.msrb.gmra.mxu0 %v1036_v50  ;;  %v700_v61 = vpop.xlane.xlu2 %699  ;;  %v775_v62 = vpop.xlane.xlu0 %774 }
 0x263   : > { %v727_v0 = vmul.f32 %v5118_v63, %v700_v61  ;;  %v801_v1 = vmul.f32 %v775_v62, %v5118_v63  ;;  %v1006_v23 = vmul.f32 %v990_v6, %v5215_v15 }
 0x264   : > { %v862_v3 = vsub.f32 1.5, %v861_v60 }
 0x265   : > { %v4322_v5 = vpop.eup %4321  ;;  %v5237_v52 = vsub.f32 %v5163_v26, %v727_v0  ;;  %v817_v10 = vadd.f32 1e-05, %v801_v1  ;;  %v1022_v37 = vadd.f32 %v1006_v23, %v5221_v30 }
 0x266   : > { %v863_v13 = vmul.f32 %v4320_v39, %v862_v3  ;;  %v869_v9 = vmul.f32 %v4322_v5, %v816_v40  ;;  %vm875_vm14 = vweird.f32 %v4322_v5 }
 0x267   : > { %4323 = vrsqrt.f32 %v817_v10  ;;  %v759_v14 = vmul.f32 %v5237_v52, %v5237_v52  ;;  %vm876_vm1 = vmor %vm874_vm15, %vm875_vm14  ;;  %vm884_vm2 = vweird.f32 %v817_v10 }
 0x268   : > { %v867_v18 = vsel %vm866_vm13, %v4320_v39, %v863_v13  ;;  %v870_v19 = vmul.f32 %v4322_v5, %v869_v9 }
 0x269   : > { %v991_v21 = vmul.f32 %v867_v18, %v5146_v16  ;;  %786 = vadd.xlane.f32.xlu0 %v759_v14 }
 0x26a   : > { %v871_v12 = vmul.f32 0.5, %v870_v19  ;;  %v702_v2 = vpop.xlane.xlu2 %701  ;;  %v777_v25 = vpop.xlane.xlu0 %776 }
 0x26b   : > { %v728_v28 = vmul.f32 %v5118_v63, %v702_v2  ;;  %v1007_v53 = vmul.f32 %v991_v21, %v5215_v15 }
 0x26c   : > { %v872_v29 = vsub.f32 1.5, %v871_v12 }
 0x26d   : > { %v4324_v33 = vpop.eup %4323  ;;  %v5246_v36 = vsub.f32 %v5172_v31, %v728_v28  ;;  %v1023_v38 = vadd.f32 %v1007_v53, %v5221_v30 }
 0x26e   : > { %v873_v16 = vmul.f32 %v4322_v5, %v872_v29  ;;  %v879_v39 = vmul.f32 %v4324_v33, %v817_v10  ;;  %vm885_vm0 = vweird.f32 %v4324_v33 }
 0x26f   : > { %v1037_v7 = vpack.c.bf16 %v1023_v38, %v1022_v37  ;;  %v760_v44 = vmul.f32 %v5246_v36, %v5246_v36  ;;  %vm886_vm3 = vmor %vm884_vm2, %vm885_vm0 }
 0x270   : > { %v880_v46 = vmul.f32 %v4324_v33, %v879_v39  ;;  %v877_v47 = vsel %vm876_vm1, %v4322_v5, %v873_v16 }
 0x271   : > { %1217 = vmatmul.bf16.gmra.mxu1 %v1037_v7  ;;  %788 = vadd.xlane.f32.xlu1 %v760_v44  ;;  %v992_v60 = vmul.f32 %v877_v47, %v5157_v22 }
 0x272   : > { %v881_v49 = vmul.f32 0.5, %v880_v46  ;;  %1266 = vmatmul.bf16.gmra.mxu2 %v1037_v7  ;;  %1315 = vmatmul.bf16.gmra.mxu0 %v1037_v7  ;;  %v704_v50 = vpop.xlane.xlu0 %703 }
 0x273   : > { %v729_v57 = vmul.f32 %v5118_v63, %v704_v50  ;;  %v1008_v3 = vmul.f32 %v992_v60, %v5215_v15 }
 0x274   : > { %v882_v58 = vsub.f32 1.5, %v881_v49 }
 0x275   : > { %v5255_v61 = vsub.f32 %v5180_v34, %v729_v57  ;;  %v1024_v10 = vadd.f32 %v1008_v3, %v5221_v30 }
 0x276   : > { %v883_v62 = vmul.f32 %v4324_v33, %v882_v58 }
 0x277   : > { %v761_v40 = vmul.f32 %v5255_v61, %v5255_v61 }
 0x278   : > { %v887_v0 = vsel %vm886_vm3, %v4324_v33, %v883_v62 }
 0x279   : > { %v993_v1 = vmul.f32 %v887_v0, %v5166_v27  ;;  %790 = vadd.xlane.f32.xlu2 %v761_v40  ;;  %v802_v27 = vmul.f32 %v777_v25, %v5118_v63 }
 0x27a   : > { %v706_v5 = vpop.xlane.xlu0 %705 }
 0x27b   : > { %v730_v6 = vmul.f32 %v5118_v63, %v706_v5  ;;  %v1009_v22 = vmul.f32 %v993_v1, %v5215_v15  ;;  %v818_v19 = vadd.f32 1e-05, %v802_v27 }
 0x27d   : > { %v5264_v13 = vsub.f32 %v5183_v35, %v730_v6  ;;  %v1025_v9 = vadd.f32 %v1009_v22, %v5221_v30  ;;  %4325 = vrsqrt.f32 %v818_v19  ;;  %vm894_vm5 = vweird.f32 %v818_v19 }
 0x27f   : > { %v1038_v14 = vpack.c.bf16 %v1025_v9, %v1024_v10  ;;  %v762_v18 = vmul.f32 %v5264_v13, %v5264_v13 }
 0x281   : > { %1222 = vmatmul.bf16.gmra.mxu1 %v1038_v14  ;;  %792 = vadd.xlane.f32.xlu0 %v762_v18 }
 0x282   : > { %1271 = vmatmul.bf16.gmra.mxu2 %v1038_v14  ;;  %1320 = vmatmul.bf16.gmra.mxu0 %v1038_v14 }
 0x283   : > { %v4326_v21 = vpop.eup %4325 }
 0x284   : > { %v889_v23 = vmul.f32 %v4326_v21, %v818_v19  ;;  %vm895_vm4 = vweird.f32 %v4326_v21 }
 0x285   : > { %vm896_vm6 = vmor %vm894_vm5, %vm895_vm4 }
 0x286   : > { %v890_v12 = vmul.f32 %v4326_v21, %v889_v23 }
 0x288   : > { %v891_v29 = vmul.f32 0.5, %v890_v12 }
 0x28a   : > { %v892_v33 = vsub.f32 1.5, %v891_v29 }
 0x28c   : > { %v893_v7 = vmul.f32 %v4326_v21, %v892_v33 }
 0x28e   : > { %v897_v46 = vsel %vm896_vm6, %v4326_v21, %v893_v7 }
 0x28f   : > { %v994_v60 = vmul.f32 %v897_v46, %v5175_v32 }
 0x291   : > { %v1010_v6 = vmul.f32 %v994_v60, %v5215_v15 }
 0x293   : > { %v1026_v18 = vadd.f32 %v1010_v6, %v5221_v30 }
 0x2b4   : > { %v779_v2 = vpop.xlane.xlu1 %778 }
 0x2b5   : > { %v803_v28 = vmul.f32 %v779_v2, %v5118_v63 }
 0x2b7   : > { %v819_v53 = vadd.f32 1e-05, %v803_v28 }
 0x2b9   : > { %4327 = vrsqrt.f32 %v819_v53  ;;  %vm904_vm8 = vweird.f32 %v819_v53 }
 0x2bc   : > { %v781_v37 = vpop.xlane.xlu1 %780 }
 0x2bd   : > { %v804_v38 = vmul.f32 %v781_v37, %v5118_v63 }
 0x2bf   : > { %v4328_v16 = vpop.eup %4327  ;;  %v820_v39 = vadd.f32 1e-05, %v804_v38 }
 0x2c0   : > { %v899_v25 = vmul.f32 %v4328_v16, %v819_v53  ;;  %vm905_vm7 = vweird.f32 %v4328_v16 }
 0x2c1   : > { %4329 = vrsqrt.f32 %v820_v39  ;;  %vm906_vm9 = vmor %vm904_vm8, %vm905_vm7  ;;  %vm914_vm11 = vweird.f32 %v820_v39 }
 0x2c2   : > { %v900_v44 = vmul.f32 %v4328_v16, %v899_v25 }
 0x2c4   : > { %v901_v47 = vmul.f32 0.5, %v900_v44  ;;  %v708_v49 = vpop.xlane.xlu1 %707 }
 0x2c5   : > { %v731_v50 = vmul.f32 %v5118_v63, %v708_v49 }
 0x2c6   : > { %v902_v57 = vsub.f32 1.5, %v901_v47 }
 0x2c7   : > { %v4330_v58 = vpop.eup %4329  ;;  %v5276_v62 = vsub.f32 %v5206_v59, %v731_v50 }
 0x2c8   : > { %v903_v40 = vmul.f32 %v4328_v16, %v902_v57  ;;  %v909_v0 = vmul.f32 %v4330_v58, %v820_v39  ;;  %vm915_vm10 = vweird.f32 %v4330_v58 }
 0x2c9   : > { %v763_v1 = vmul.f32 %v5276_v62, %v5276_v62  ;;  %vm916_vm12 = vmor %vm914_vm11, %vm915_vm10 }
 0x2ca   : > { %v907_v3 = vsel %vm906_vm9, %v4328_v16, %v903_v40  ;;  %v910_v10 = vmul.f32 %v4330_v58, %v909_v0 }
 0x2cb   : > { %v995_v5 = vmul.f32 %v907_v3, %v5192_v24  ;;  %794 = vadd.xlane.f32.xlu1 %v763_v1 }
 0x2cc   : > { %v783_v22 = vpop.xlane.xlu2 %782  ;;  %v911_v19 = vmul.f32 0.5, %v910_v10 }
 0x2cd   : > { %v805_v32 = vmul.f32 %v783_v22, %v5118_v63  ;;  %v1011_v9 = vmul.f32 %v995_v5, %v5215_v15 }
 0x2ce   : > { %v912_v23 = vsub.f32 1.5, %v911_v19 }
 0x2cf   : > { %v821_v14 = vadd.f32 1e-05, %v805_v32  ;;  %v1027_v27 = vadd.f32 %v1011_v9, %v5221_v30 }
 0x2d0   : > { %v913_v29 = vmul.f32 %v4330_v58, %v912_v23 }
 0x2d1   : > { %4331 = vrsqrt.f32 %v821_v14  ;;  %v1039_v21 = vpack.c.bf16 %v1027_v27, %v1026_v18  ;;  %vm924_vm14 = vweird.f32 %v821_v14 }
 0x2d2   : > { %v917_v16 = vsel %vm916_vm12, %v4330_v58, %v913_v29 }
 0x2d3   : > { %1227 = vmatmul.bf16.gmra.mxu1 %v1039_v21  ;;  %1276 = vmatmul.bf16.gmra.mxu2 %v1039_v21  ;;  %v996_v50 = vmul.f32 %v917_v16, %v5200_v41 }
 0x2d4   : > { %1325 = vmatmul.bf16.gmra.mxu0 %v1039_v21  ;;  %v785_v24 = vpop.xlane.xlu2 %784 }
 0x2d5   : > { %v806_v12 = vmul.f32 %v785_v24, %v5118_v63  ;;  %v1012_v3 = vmul.f32 %v996_v50, %v5215_v15 }
 0x2d7   : > { %v4332_v2 = vpop.eup %4331  ;;  %v822_v28 = vadd.f32 1e-05, %v806_v12 }
 0x2d8   : > { %v919_v53 = vmul.f32 %v4332_v2, %v821_v14  ;;  %vm925_vm13 = vweird.f32 %v4332_v2 }
 0x2d9   : > { %4333 = vrsqrt.f32 %v822_v28  ;;  %vm926_vm15 = vmor %vm924_vm14, %vm925_vm13  ;;  %vm934_vm0 = vweird.f32 %v822_v28 }
 0x2da   : > { %v920_v33 = vmul.f32 %v4332_v2, %v919_v53 }
 0x2dc   : > { %v921_v37 = vmul.f32 0.5, %v920_v33  ;;  %v787_v38 = vpop.xlane.xlu0 %786 }
 0x2dd   : > { %v807_v7 = vmul.f32 %v787_v38, %v5118_v63 }
 0x2de   : > { %v922_v25 = vsub.f32 1.5, %v921_v37  ;;  %v1213_v44 = vpop.f32.mrf.mxu1 }
 0x2df   : > { %v4334_v46 = vpop.eup %4333  ;;  %v823_v47 = vadd.f32 1e-05, %v807_v7  ;;  %v1311_v49 = vpop.f32.mrf.mxu0 }
 0x2e0   : > { %v923_v57 = vmul.f32 %v4332_v2, %v922_v25  ;;  %v929_v60 = vmul.f32 %v4334_v46, %v822_v28  ;;  %v1352_v9 = vpack.c.bf16 %v1311_v49, %v1311_v49  ;;  %vm935_vm1 = vweird.f32 %v4334_v46 }
 0x2e1   : > { %4335 = vrsqrt.f32 %v823_v47  ;;  %vm5298_vm2 = vmor %vm934_vm0, %vm935_vm1  ;;  %vm944_vm4 = vweird.f32 %v823_v47 }
 0x2e2   : > { %v927_v39 = vsel %vm926_vm15, %v4332_v2, %v923_v57  ;;  %v930_v40 = vmul.f32 %v4334_v46, %v929_v60  ;;  %v1807_v53 = vunpack.c.l.b16 %v1352_v9 }
 0x2e3   : > { %v997_v0 = vmul.f32 %v927_v39, %v5213_v11  ;;  %v1028_v11 = vadd.f32 %v1012_v3, %v5221_v30 }
 0x2e4   : > { %v931_v58 = vmul.f32 0.5, %v930_v40  ;;  %v789_v1 = vpop.xlane.xlu1 %788 }
 0x2e5   : > { %v1262_v5 = vpop.f32.mrf.mxu2  ;;  %v808_v6 = vmul.f32 %v789_v1, %v5118_v63  ;;  %v1013_v22 = vmul.f32 %v997_v0, %v5215_v15 }
 0x2e6   : > { %v932_v10 = vsub.f32 1.5, %v931_v58  ;;  %v1215_v41 = vpop.f32.mrf.mxu1  ;;  %v1351_v12 = vpack.c.bf16 %v1262_v5, %v1213_v44 }
 0x2e7   : > { %v4336_v32 = vpop.eup %4335  ;;  %v5293_v14 = vadd.f32 1e-05, %v808_v6  ;;  %v1313_v18 = vpop.f32.mrf.mxu0  ;;  %v1029_v27 = vadd.f32 %v1013_v22, %v5221_v30 }
 0x2e8   : > { %v939_v19 = vmul.f32 %v4336_v32, %v823_v47  ;;  %v933_v21 = vmul.f32 %v4334_v46, %v932_v10  ;;  %v1354_v24 = vpack.c.bf16 %v1313_v18, %v1313_v18  ;;  %vm945_vm3 = vweird.f32 %v4336_v32 }
 0x2e9   : > { %4337 = vrsqrt.f32 %v5293_v14  ;;  %v1040_v2 = vpack.c.bf16 %v1029_v27, %v1028_v11  ;;  %v1399_v28 = vrot.slane %v1351_v12, 4  ;;  %vm946_vm5 = vmor %vm944_vm4, %vm945_vm3  ;;  %vm954_vm7 = vweird.f32 %v5293_v14 }
 0x2ea   : > { %v940_v23 = vmul.f32 %v4336_v32, %v939_v19  ;;  %v1808_v29 = vunpack.c.l.b16 %v1354_v24  ;;  %v937_v16 = vsel %vm5298_vm2, %v4334_v46, %v933_v21  ;;  %vm1607_vm2 = vcmask 130048  }
 0x2eb   : > { %1232 = vmatmul.bf16.gmra.mxu1 %v1040_v2  ;;  %1281 = vmatmul.bf16.gmra.mxu2 %v1040_v2  ;;  %v998_v40 = vmul.f32 %v937_v16, %v5227_v43  ;;  %v1419_v3 = vunpack.c.l.b16 %v1399_v28 }
 0x2ec   : > { %v941_v37 = vmul.f32 0.5, %v940_v23  ;;  %v791_v38 = vpop.xlane.xlu2 %790  ;;  %1330 = vmatmul.bf16.gmra.mxu0 %v1040_v2  ;;  %v1809_v44 = vpack.c.b16 %v1808_v29, %v1807_v53  ;;  %v1415_v23 = vunpack.c.l.b16 %v1351_v12 }
 0x2ed   : > { %v1264_v7 = vpop.f32.mrf.mxu2  ;;  %v809_v25 = vmul.f32 %v791_v38, %v5118_v63  ;;  %v1014_v47 = vmul.f32 %v998_v40, %v5215_v15 }
 0x2ee   : > { %v942_v49 = vsub.f32 1.5, %v941_v37  ;;  %v1353_v50 = vpack.c.bf16 %v1264_v7, %v1215_v41  ;;  %1821 = vmatpush.bf16.msrb.mxu3 %v1809_v44  ;;  %v1218_v39 = vpop.f32.mrf.mxu1 }
 0x2ef   : > { %v4338_v57 = vpop.eup %4337  ;;  %v825_v60 = vadd.f32 1e-05, %v809_v25  ;;  %v1030_v24 = vadd.f32 %v1014_v47, %v5221_v30 }
 0x2f0   : > { %v943_v0 = vmul.f32 %v4336_v32, %v942_v49  ;;  %v949_v58 = vmul.f32 %v4338_v57, %v5293_v14  ;;  %v1400_v46 = vrot.slane %v1353_v50, 4  ;;  %v1416_v19 = vunpack.c.l.b16 %v1353_v50 }
 0x2f1   : > { %4339 = vrsqrt.f32 %v825_v60  ;;  %vm955_vm6 = vweird.f32 %v4338_v57  ;;  %vm964_vm10 = vweird.f32 %v825_v60 }
 0x2f2   : > { %v947_v1 = vsel %vm946_vm5, %v4336_v32, %v943_v0  ;;  %v950_v5 = vmul.f32 %v4338_v57, %v949_v58  ;;  %v1420_v6 = vunpack.c.l.b16 %v1400_v46  ;;  %vm956_vm8 = vmor %vm954_vm7, %vm955_vm6  ;;  %v1417_v33 = vpack.c.b16 %v1416_v19, %v1415_v23 }
 0x2f3   : > { %v999_v22 = vmul.f32 %v947_v1, %v5237_v52 }
 0x2f4   : > { %v951_v10 = vmul.f32 0.5, %v950_v5  ;;  %v1421_v41 = vpack.c.b16 %v1420_v6, %v1419_v3 }
 0x2f5   : > { %v1267_v9 = vpop.f32.mrf.mxu2  ;;  %v1015_v18 = vmul.f32 %v999_v22, %v5215_v15 }
 0x2f6   : > { %v952_v43 = vsub.f32 1.5, %v951_v10  ;;  %1430 = vmatpush.bf16.xpose.msra.mxu0 %v1421_v41  ;;  %v1220_v52 = vpop.f32.mrf.mxu1  ;;  %v1355_v53 = vpack.c.bf16 %v1267_v9, %v1218_v39 }
 0x2f7   : > { %v4340_v27 = vpop.eup %4339  ;;  %v1031_v11 = vadd.f32 %v1015_v18, %v5221_v30 }
 0x2f8   : > { %v953_v21 = vmul.f32 %v4338_v57, %v952_v43  ;;  %v959_v32 = vmul.f32 %v4340_v27, %v825_v60  ;;  %vm965_vm9 = vweird.f32 %v4340_v27  ;;  %v1401_v25 = vrot.slane %v1355_v53, 4 }
 0x2f9   : > { %v1041_v29 = vpack.c.bf16 %v1031_v11, %v1030_v24  ;;  %vm966_vm11 = vmor %vm964_vm10, %vm965_vm9  ;;  %v1437_v5 = vunpack.c.l.b16 %v1355_v53  ;;  %v793_v24 = vpop.xlane.xlu0 %792 }
 0x2fa   : > { %v960_v2 = vmul.f32 %v4340_v27, %v959_v32  ;;  %v957_v37 = vsel %vm956_vm8, %v4338_v57, %v953_v21  ;;  %v1441_v50 = vunpack.c.l.b16 %v1401_v25  ;;  %v810_v23 = vmul.f32 %v793_v24, %v5118_v63 }
 0x2fb   : > { %1237 = vmatmul.bf16.gmra.mxu1 %v1041_v29  ;;  %1286 = vmatmul.bf16.gmra.mxu2 %v1041_v29  ;;  %v1000_v12 = vmul.f32 %v957_v37, %v5246_v36 }
 0x2fc   : > { %v961_v38 = vmul.f32 0.5, %v960_v2  ;;  %1335 = vmatmul.bf16.vlgmr.msra.gmra.mxu3 %v1041_v29  ;;  %v5322_v2 = vpop.f32.mrf.mxu0 }
 0x2fd   : > { %v1269_v16 = vpop.f32.mrf.mxu2  ;;  %1431 = vmatmul.bf16.vlgmr.msra.gmra.mxu0 %v1417_v33  ;;  %v1016_v0 = vmul.f32 %v1000_v12, %v5215_v15 }
 0x2fe   : > { %v962_v7 = vsub.f32 1.5, %v961_v38  ;;  %v1357_v44 = vpack.c.bf16 %v1269_v16, %v1220_v52  ;;  %v1223_v40 = vpop.f32.mrf.mxu1  ;;  %v826_v52 = vadd.f32 1e-05, %v810_v23 }
 0x2ff   : > { %v1032_v36 = vadd.f32 %v1016_v0, %v5221_v30 }
 0x300   : > { %v963_v49 = vmul.f32 %v4340_v27, %v962_v7  ;;  %v1402_v14 = vrot.slane %v1357_v44, 4  ;;  %v1438_v3 = vunpack.c.l.b16 %v1357_v44  ;;  %4341 = vrsqrt.f32 %v826_v52 }
 0x301   : > { %vm974_vm13 = vweird.f32 %v826_v52 }
 0x302   : > { %v967_v28 = vsel %vm966_vm11, %v4340_v27, %v963_v49  ;;  %v1442_v39 = vunpack.c.l.b16 %v1402_v14  ;;  %v1439_v10 = vpack.c.b16 %v1438_v3, %v1437_v5 }
 0x303   : > { %v1001_v57 = vmul.f32 %v967_v28, %v5255_v61 }
 0x304   : > { %v1443_v58 = vpack.c.b16 %v1442_v39, %v1441_v50  ;;  %v5324_v33 = vpop.f32.mrf.mxu0 }
 0x305   : > { %v1272_v46 = vpop.f32.mrf.mxu2  ;;  %v1017_v1 = vmul.f32 %v1001_v57, %v5215_v15 }
 0x306   : > { %1452 = vmatpush.bf16.xpose.msrb.mxu0 %v1443_v58  ;;  %v1359_v22 = vpack.c.bf16 %v1272_v46, %v1223_v40  ;;  %v1225_v61 = vpop.f32.mrf.mxu1  ;;  %v4342_v53 = vpop.eup %4341 }
 0x307   : > { %v1033_v60 = vadd.f32 %v1017_v1, %v5221_v30  ;;  %v969_v29 = vmul.f32 %v4342_v53, %v826_v52  ;;  %vm975_vm12 = vweird.f32 %v4342_v53 }
 0x308   : > { %v1403_v47 = vrot.slane %v1359_v22, 4  ;;  %v1459_v18 = vunpack.c.l.b16 %v1359_v22  ;;  %vm976_vm14 = vmor %vm974_vm13, %vm975_vm12 }
 0x309   : > { %v1042_v6 = vpack.c.bf16 %v1033_v60, %v1032_v36  ;;  %v970_v37 = vmul.f32 %v4342_v53, %v969_v29 }
 0x30a   : > { %v1463_v19 = vunpack.c.l.b16 %v1403_v47 }
 0x30b   : > { %1242 = vmatmul.bf16.gmra.mxu1 %v1042_v6  ;;  %1291 = vmatmul.bf16.gmra.mxu2 %v1042_v6  ;;  %v971_v25 = vmul.f32 0.5, %v970_v37 }
 0x30c   : > { %1340 = vmatmul.bf16.gmra.mxu3 %v1042_v6  ;;  %v5327_v12 = vpop.f32.mrf.mxu0 }
 0x30d   : > { %v1274_v41 = vpop.f32.mrf.mxu2  ;;  %1453 = vmatmul.bf16.vlgmr.msrb.gmra.mxu0 %v1439_v10  ;;  %v972_v44 = vsub.f32 1.5, %v971_v25 }
 0x30e   : > { %v1361_v9 = vpack.c.bf16 %v1274_v41, %v1225_v61 }
 0x30f   : > { %v973_v14 = vmul.f32 %v4342_v53, %v972_v44 }
 0x310   : > { %v1404_v43 = vrot.slane %v1361_v9, 4  ;;  %v1460_v27 = vunpack.c.l.b16 %v1361_v9 }
 0x311   : > { %v977_v39 = vsel %vm976_vm14, %v4342_v53, %v973_v14 }
 0x312   : > { %v5319_v11 = vpack.c.b16 %v1460_v27, %v1459_v18  ;;  %v1464_v21 = vunpack.c.l.b16 %v1404_v43  ;;  %v1002_v58 = vmul.f32 %v977_v39, %v5264_v13 }
 0x314   : > { %v1465_v32 = vpack.c.b16 %v1464_v21, %v1463_v19  ;;  %v5329_v40 = vpop.f32.mrf.mxu0  ;;  %v1018_v60 = vmul.f32 %v1002_v58, %v5215_v15 }
 0x316   : > { %1474 = vmatpush.bf16.xpose.msra.mxu1 %v1465_v32  ;;  %v1034_v10 = vadd.f32 %v1018_v60, %v5221_v30 }
 0x33e   : > { %v795_v38 = vpop.xlane.xlu1 %794 }
 0x33f   : > { %v811_v16 = vmul.f32 %v795_v38, %v5118_v63 }
 0x341   : > { %v827_v7 = vadd.f32 1e-05, %v811_v16 }
 0x343   : > { %4343 = vrsqrt.f32 %v827_v7  ;;  %vm984_vm1 = vweird.f32 %v827_v7 }
 0x349   : > { %v4344_v49 = vpop.eup %4343 }
 0x34a   : > { %v979_v28 = vmul.f32 %v4344_v49, %v827_v7  ;;  %vm985_vm15 = vweird.f32 %v4344_v49 }
 0x34b   : > { %vm986_vm0 = vmor %vm984_vm1, %vm985_vm15 }
 0x34c   : > { %v980_v50 = vmul.f32 %v4344_v49, %v979_v28 }
 0x34e   : > { %v981_v57 = vmul.f32 0.5, %v980_v50 }
 0x350   : > { %v982_v0 = vsub.f32 1.5, %v981_v57  ;;  %v1228_v3 = vpop.f32.mrf.mxu1 }
 0x351   : > { %v5335_v22 = vpop.f32.mrf.mxu0 }
 0x352   : > { %v983_v46 = vmul.f32 %v4344_v49, %v982_v0 }
 0x354   : > { %v987_v1 = vsel %vm986_vm0, %v4344_v49, %v983_v46 }
 0x355   : > { %v1003_v36 = vmul.f32 %v987_v1, %v5276_v62 }
 0x356   : > { %v1277_v5 = vpop.f32.mrf.mxu2 }
 0x357   : > { %v1019_v6 = vmul.f32 %v1003_v36, %v5215_v15  ;;  %v1363_v41 = vpack.c.bf16 %v1277_v5, %v1228_v3 }
 0x358   : > { %v1230_v47 = vpop.f32.mrf.mxu1 }
 0x359   : > { %v1035_v61 = vadd.f32 %v1019_v6, %v5221_v30  ;;  %v1405_v18 = vrot.slane %v1363_v41, 4  ;;  %v5339_v27 = vpop.f32.mrf.mxu0  ;;  %v1481_v23 = vunpack.c.l.b16 %v1363_v41 }
 0x35b   : > { %v1043_v13 = vpack.c.bf16 %v1035_v61, %v1034_v10  ;;  %v1485_v19 = vunpack.c.l.b16 %v1405_v18  ;;  %v1358_v18 = vpack.c.bf16 %v5324_v33, %v5324_v33 }
 0x35d   : > { %1247 = vmatmul.bf16.gmra.mxu1 %v1043_v13  ;;  %1296 = vmatmul.bf16.gmra.mxu2 %v1043_v13 }
 0x35e   : > { %1345 = vmatmul.bf16.gmra.mxu3 %v1043_v13  ;;  %v1279_v9 = vpop.f32.mrf.mxu2 }
 0x35f   : > { %v1365_v62 = vpack.c.bf16 %v1279_v9, %v1230_v47 }
 0x361   : > { %v1406_v43 = vrot.slane %v1365_v62, 4  ;;  %v1482_v32 = vunpack.c.l.b16 %v1365_v62 }
 0x363   : > { %v1486_v15 = vunpack.c.l.b16 %v1406_v43  ;;  %v1483_v52 = vpack.c.b16 %v1482_v32, %v1481_v23  ;;  %v1836_v23 = vunpack.c.l.b16 %v1358_v18 }
 0x365   : > { %v1487_v21 = vpack.c.b16 %v1486_v15, %v1485_v19 }
 0x367   : > { %1496 = vmatpush.bf16.xpose.msrb.mxu2 %v1487_v21  ;;  %v1356_v21 = vpack.c.bf16 %v5322_v2, %v5322_v2 }
 0x368   : > { %v1233_v24 = vpop.f32.mrf.mxu1 }
 0x369   : > { %v1331_v30 = vpop.f32.mrf.mxu0 }
 0x36a   : > { %v1368_v29 = vpack.c.bf16 %v1331_v30, %v1331_v30 }
 0x36c   : > { %v1919_v25 = vunpack.c.l.b16 %v1368_v29  ;;  %v1835_v29 = vunpack.c.l.b16 %v1356_v21 }
 0x36d   : > { %1475 = vmatmul.bf16.vlgmr.msra.gmra.mxu1 %v5319_v11 }
 0x36e   : > { %1497 = vmatmul.bf16.vlgmr.msrb.gmra.mxu2 %v1483_v52  ;;  %v1282_v53 = vpop.f32.mrf.mxu2 }
 0x36f   : > { %v1367_v7 = vpack.c.bf16 %v1282_v53, %v1233_v24 }
 0x370   : > { %v1235_v37 = vpop.f32.mrf.mxu1 }
 0x371   : > { %v1333_v38 = vpop.f32.mrf.mxu0  ;;  %v1407_v28 = vrot.slane %v1367_v7, 4  ;;  %v1503_v10 = vunpack.c.l.b16 %v1367_v7  ;;  %v1837_v7 = vpack.c.b16 %v1836_v23, %v1835_v29 }
 0x372   : > { %v1370_v16 = vpack.c.bf16 %v1333_v38, %v1333_v38 }
 0x373   : > { %v1507_v11 = vunpack.c.l.b16 %v1407_v28 }
 0x374   : > { %v1920_v44 = vunpack.c.l.b16 %v1370_v16 }
 0x376   : > { %v1921_v49 = vpack.c.b16 %v1920_v44, %v1919_v25  ;;  %v1284_v14 = vpop.f32.mrf.mxu2 }
 0x377   : > { %v1369_v50 = vpack.c.bf16 %v1284_v14, %v1235_v37 }
 0x378   : > { %1933 = vmatpush.bf16.msra.mxu3 %v1921_v49  ;;  %v1238_v39 = vpop.f32.mrf.mxu1 }
 0x379   : > { %v1408_v57 = vrot.slane %v1369_v50, 4  ;;  %v1504_v5 = vunpack.c.l.b16 %v1369_v50 }
 0x37a   : > { %v1432_v0 = vpop.f32.mrf.mxu0 }
 0x37b   : > { %v5342_v58 = vmul.f32 0.088388346, %v1432_v0  ;;  %v1508_v46 = vunpack.c.l.b16 %v1408_v57  ;;  %v1505_v47 = vpack.c.b16 %v1504_v5, %v1503_v10  ;;  %v1360_v10 = vpack.c.bf16 %v5327_v12, %v5327_v12 }
 0x37d   : > { %v1608_v1 = vsel %vm1607_vm2, %v5342_v58, -inf  ;;  %v1509_v3 = vpack.c.b16 %v1508_v46, %v1507_v11 }
 0x37e   : > { %1609 = vmax.xlane.f32.xlu2 %v1608_v1  ;;  %v1287_v36 = vpop.f32.mrf.mxu2 }
 0x37f   : > { %v1336_v60 = vpop.f32.mrf.mxu3  ;;  %1518 = vmatpush.bf16.xpose.msra.mxu2 %v1509_v3  ;;  %v1371_v13 = vpack.c.bf16 %v1287_v36, %v1238_v39  ;;  %v1362_v3 = vpack.c.bf16 %v5329_v40, %v5329_v40 }
 0x380   : > { %v1240_v61 = vpop.f32.mrf.mxu1  ;;  %v1372_v44 = vpack.c.bf16 %v1336_v60, %v1336_v60 }
 0x381   : > { %v1409_v43 = vrot.slane %v1371_v13, 4  ;;  %v1525_v50 = vunpack.c.l.b16 %v1371_v13  ;;  %v1864_v13 = vunpack.c.l.b16 %v1362_v3 }
 0x382   : > { %v1434_v6 = vpop.f32.mrf.mxu0  ;;  %v1947_v57 = vunpack.c.l.b16 %v1372_v44 }
 0x383   : > { %v5346_v41 = vmul.f32 0.088388346, %v1434_v6  ;;  %v1529_v52 = vunpack.c.l.b16 %v1409_v43 }
 0x385   : > { %v1611_v9 = vsel %vm1607_vm2, %v5346_v41, -inf }
 0x386   : > { %1612 = vmax.xlane.f32.xlu0 %v1611_v9  ;;  %v1289_v62 = vpop.f32.mrf.mxu2  ;;  %1519 = vmatmul.bf16.vlgmr.msra.gmra.mxu2 %v1505_v47 }
 0x387   : > { %v1373_v19 = vpack.c.bf16 %v1289_v62, %v1240_v61  ;;  %v1338_v15 = vpop.f32.mrf.mxu3  ;;  %v1863_v62 = vunpack.c.l.b16 %v1360_v10 }
 0x388   : > { %v1243_v37 = vpop.f32.mrf.mxu1  ;;  %v1374_v16 = vpack.c.bf16 %v1338_v15, %v1338_v15 }
 0x389   : > { %v1410_v32 = vrot.slane %v1373_v19, 4  ;;  %v1526_v2 = vunpack.c.l.b16 %v1373_v19  ;;  %v1865_v15 = vpack.c.b16 %v1864_v13, %v1863_v62 }
 0x38a   : > { %v1454_v24 = vpop.f32.mrf.mxu0  ;;  %v1948_v14 = vunpack.c.l.b16 %v1374_v16  ;;  %v1366_v16 = vpack.c.bf16 %v5339_v27, %v5339_v27 }
 0x38b   : > { %v5354_v30 = vmul.f32 0.088388346, %v1454_v24  ;;  %v1530_v53 = vunpack.c.l.b16 %v1410_v32  ;;  %v1527_v11 = vpack.c.b16 %v1526_v2, %v1525_v50  ;;  %v1364_v2 = vpack.c.bf16 %v5335_v22, %v5335_v22 }
 0x38c   : > { %v1949_v1 = vpack.c.b16 %v1948_v14, %v1947_v57  ;;  %v1892_v50 = vunpack.c.l.b16 %v1366_v16 }
 0x38d   : > { %v1614_v33 = vsel %vm1607_vm2, %v5354_v30, -inf  ;;  %v1531_v38 = vpack.c.b16 %v1530_v53, %v1529_v52 }
 0x38e   : > { %1615 = vmax.xlane.f32.xlu1 %v1614_v33  ;;  %v1292_v25 = vpop.f32.mrf.mxu2 }
 0x38f   : > { %1540 = vmatpush.bf16.xpose.msra.mxu0 %v1531_v38  ;;  %v1341_v49 = vpop.f32.mrf.mxu3  ;;  %v1375_v0 = vpack.c.bf16 %v1292_v25, %v1243_v37 }
 0x390   : > { %v1245_v36 = vpop.f32.mrf.mxu1  ;;  %v1376_v21 = vpack.c.bf16 %v1341_v49, %v1341_v49 }
 0x391   : > { %v1411_v5 = vrot.slane %v1375_v0, 4  ;;  %v1547_v24 = vunpack.c.l.b16 %v1375_v0 }
 0x392   : > { %v1456_v28 = vpop.f32.mrf.mxu0  ;;  %v1975_v23 = vunpack.c.l.b16 %v1376_v21 }
 0x393   : > { %v5358_v39 = vmul.f32 0.088388346, %v1456_v28  ;;  %v1551_v9 = vunpack.c.l.b16 %v1411_v5 }
 0x395   : > { %v1617_v46 = vsel %vm1607_vm2, %v5358_v39, -inf }
 0x396   : > { %1618 = vmax.xlane.f32.xlu2 %v1617_v46  ;;  %v1294_v60 = vpop.f32.mrf.mxu2  ;;  %1541 = vmatmul.bf16.vlgmr.msra.gmra.mxu0 %v1527_v11 }
 0x397   : > { %1849 = vmatpush.bf16.msrb.mxu0 %v1837_v7  ;;  %v1377_v6 = vpack.c.bf16 %v1294_v60, %v1245_v36  ;;  %v1343_v47 = vpop.f32.mrf.mxu3 }
 0x398   : > { %v1378_v19 = vpack.c.bf16 %v1343_v47, %v1343_v47 }
 0x399   : > { %v1412_v61 = vrot.slane %v1377_v6, 4  ;;  %v1548_v40 = vunpack.c.l.b16 %v1377_v6 }
 0x39a   : > { %v1976_v32 = vunpack.c.l.b16 %v1378_v19 }
 0x39b   : > { %1961 = vmatpush.bf16.msra.mxu0 %v1949_v1  ;;  %v1552_v18 = vunpack.c.l.b16 %v1412_v61  ;;  %v1549_v52 = vpack.c.b16 %v1548_v40, %v1547_v24  ;;  %v1891_v1 = vunpack.c.l.b16 %v1364_v2 }
 0x39c   : > { %v1977_v53 = vpack.c.b16 %v1976_v32, %v1975_v23 }
 0x39d   : > { %v1553_v43 = vpack.c.b16 %v1552_v18, %v1551_v9  ;;  %v1893_v36 = vpack.c.b16 %v1892_v50, %v1891_v1 }
 0x39f   : > { %1562 = vmatpush.bf16.xpose.msrb.mxu1 %v1553_v43 }
 0x3a6   : > { %1563 = vmatmul.bf16.vlgmr.msrb.gmra.mxu1 %v1549_v52 }
 0x3a7   : > { %1877 = vmatpush.bf16.msra.mxu1 %v1865_v15 }
 0x3ab   : > { %1989 = vmatpush.bf16.msrb.mxu1 %v1977_v53 }
 0x3da   : > { %v1248_v12 = vpop.f32.mrf.mxu1 }
 0x3e0   : > { %v1297_v29 = vpop.f32.mrf.mxu2 }
 0x3e1   : > { %v1346_v37 = vpop.f32.mrf.mxu3  ;;  %v1379_v38 = vpack.c.bf16 %v1297_v29, %v1248_v12 }
 0x3e2   : > { %v1250_v33 = vpop.f32.mrf.mxu1  ;;  %v1380_v60 = vpack.c.bf16 %v1346_v37, %v1346_v37 }
 0x3e3   : > { %v1413_v25 = vrot.slane %v1379_v38, 4  ;;  %v1569_v18 = vunpack.c.l.b16 %v1379_v38 }
 0x3e4   : > { %v2003_v19 = vunpack.c.l.b16 %v1380_v60 }
 0x3e5   : > { %v1573_v0 = vunpack.c.l.b16 %v1413_v25 }
 0x3e8   : > { %v1299_v7 = vpop.f32.mrf.mxu2 }
 0x3e9   : > { %v1381_v44 = vpack.c.bf16 %v1299_v7, %v1250_v33  ;;  %v1348_v57 = vpop.f32.mrf.mxu3 }
 0x3ea   : > { %v1476_v49 = vpop.f32.mrf.mxu1  ;;  %v1382_v3 = vpack.c.bf16 %v1348_v57, %v1348_v57 }
 0x3eb   : > { %v1414_v14 = vrot.slane %v1381_v44, 4  ;;  %v5370_v28 = vmul.f32 0.088388346, %v1476_v49  ;;  %v1570_v22 = vunpack.c.l.b16 %v1381_v44 }
 0x3ec   : > { %v2004_v47 = vunpack.c.l.b16 %v1382_v3 }
 0x3ed   : > { %v1574_v11 = vunpack.c.l.b16 %v1414_v14  ;;  %v1620_v46 = vsel %vm1607_vm2, %v5370_v28, -inf  ;;  %v1571_v21 = vpack.c.b16 %v1570_v22, %v1569_v18 }
 0x3ee   : > { %1621 = vmax.xlane.f32.xlu0 %v1620_v46 }
 0x3ef   : > { %v1575_v27 = vpack.c.b16 %v1574_v11, %v1573_v0 }
 0x3f1   : > { %v1610_v5 = vpop.xlane.xlu2 %1609  ;;  %v1498_v6 = vpop.f32.mrf.mxu2  ;;  %1584 = vmatpush.bf16.xpose.msrb.mxu2 %v1575_v27 }
 0x3f2   : > { %v1656_v10 = vsub.f32 %v5342_v58, %v1610_v5  ;;  %v5375_v61 = vmul.f32 0.088388346, %v1498_v6  ;;  %v1478_v13 = vpop.f32.mrf.mxu1  ;;  %v2005_v58 = vpack.c.b16 %v2004_v47, %v2003_v19 }
 0x3f3   : > { %v5377_v9 = vmul.f32 0.088388346, %v1478_v13 }
 0x3f4   : > { %v1672_v62 = vmul.f32 1.442695, %v1656_v10  ;;  %v1626_v43 = vsel %vm1607_vm2, %v5375_v61, -inf }
 0x3f5   : > { %1627 = vmax.xlane.f32.xlu2 %v1626_v43  ;;  %v1623_v15 = vsel %vm1607_vm2, %v5377_v9, -inf }
 0x3f6   : > { %4345 = vpow2.f32 %v1672_v62  ;;  %1624 = vmax.xlane.f32.xlu1 %v1623_v15 }
 0x3f8   : > { %1585 = vmatmul.bf16.vlgmr.msrb.gmra.mxu2 %v1571_v21 }
 0x3f9   : > { %1905 = vmatpush.bf16.msra.mxu2 %v1893_v36  ;;  %v1613_v40 = vpop.xlane.xlu0 %1612  ;;  %v1500_v32 = vpop.f32.mrf.mxu2 }
 0x3fa   : > { %v1657_v24 = vsub.f32 %v5346_v41, %v1613_v40  ;;  %v1598_v23 = vmul.f32 0.088388346, %v1500_v32 }
 0x3fc   : > { %v5384_v52 = vpop.eup %4345  ;;  %v1674_v53 = vmul.f32 1.442695, %v1657_v24  ;;  %v1629_v12 = vsel %vm1607_vm2, %v1598_v23, -inf }
 0x3fd   : > { %2017 = vmatpush.bf16.msrb.mxu2 %v2005_v58  ;;  %1630 = vmax.xlane.f32.xlu0 %v1629_v12  ;;  %v1704_v29 = vsel %vm1607_vm2, %v5384_v52, 0.0 }
 0x3fe   : > { %4347 = vpow2.f32 %v1674_v53  ;;  %1705 = vadd.xlane.f32.xlu1 %v1704_v29 }
 0x401   : > { %v1616_v37 = vpop.xlane.xlu1 %1615 }
 0x402   : > { %v1658_v33 = vsub.f32 %v5354_v30, %v1616_v37 }
 0x404   : > { %v5390_v38 = vpop.eup %4347  ;;  %v1676_v16 = vmul.f32 1.442695, %v1658_v33 }
 0x405   : > { %v1707_v41 = vsel %vm1607_vm2, %v5390_v38, 0.0 }
 0x406   : > { %4349 = vpow2.f32 %v1676_v16  ;;  %1708 = vadd.xlane.f32.xlu2 %v1707_v41 }
 0x409   : > { %v1619_v7 = vpop.xlane.xlu2 %1618  ;;  %v1520_v44 = vpop.f32.mrf.mxu2 }
 0x40a   : > { %v1659_v25 = vsub.f32 %v5358_v39, %v1619_v7  ;;  %v5395_v2 = vmul.f32 0.088388346, %v1520_v44 }
 0x40c   : > { %v5397_v49 = vpop.eup %4349  ;;  %v1678_v14 = vmul.f32 1.442695, %v1659_v25  ;;  %v1632_v30 = vsel %vm1607_vm2, %v5395_v2, -inf }
 0x40d   : > { %v1710_v50 = vsel %vm1607_vm2, %v5397_v49, 0.0  ;;  %1633 = vmax.xlane.f32.xlu0 %v1632_v30 }
 0x40e   : > { %4351 = vpow2.f32 %v1678_v14  ;;  %1711 = vadd.xlane.f32.xlu2 %v1710_v50 }
 0x411   : > { %v1522_v57 = vpop.f32.mrf.mxu2 }
 0x412   : > { %v5403_v0 = vmul.f32 0.088388346, %v1522_v57 }
 0x413   : > { %v1542_v39 = vpop.f32.mrf.mxu0 }
 0x414   : > { %v5405_v11 = vpop.eup %4351  ;;  %v1635_v1 = vsel %vm1607_vm2, %v5403_v0, -inf  ;;  %v5411_v27 = vmul.f32 0.088388346, %v1542_v39 }
 0x415   : > { %v1713_v46 = vsel %vm1607_vm2, %v5405_v11, 0.0  ;;  %1636 = vmax.xlane.f32.xlu1 %v1635_v1 }
 0x416   : > { %1714 = vadd.xlane.f32.xlu0 %v1713_v46  ;;  %v1638_v60 = vsel %vm1607_vm2, %v5411_v27, -inf }
 0x41b   : > { %v1544_v3 = vpop.f32.mrf.mxu0 }
 0x41c   : > { %v5413_v36 = vmul.f32 0.088388346, %v1544_v3 }
 0x41d   : > { %1639 = vmax.xlane.f32.xlu1 %v1638_v60 }
 0x41e   : > { %v1641_v5 = vsel %vm1607_vm2, %v5413_v36, -inf }
 0x41f   : > { %1642 = vmax.xlane.f32.xlu2 %v1641_v5 }
 0x423   : > { %v1564_v43 = vpop.f32.mrf.mxu1 }
 0x42b   : > { %v1566_v12 = vpop.f32.mrf.mxu1 }
 0x42c   : > { %v5434_v37 = vmul.f32 0.088388346, %v1566_v12 }
 0x42e   : > { %v1647_v25 = vsel %vm1607_vm2, %v5434_v37, -inf }
 0x461   : > { %v1622_v6 = vpop.xlane.xlu0 %1621 }
 0x462   : > { %v1660_v22 = vsub.f32 %v5370_v28, %v1622_v6 }
 0x464   : > { %v1680_v10 = vmul.f32 1.442695, %v1660_v22 }
 0x466   : > { %4353 = vpow2.f32 %v1680_v10 }
 0x468   : > { %v1628_v13 = vpop.xlane.xlu2 %1627 }
 0x469   : > { %v1662_v47 = vsub.f32 %v5375_v61, %v1628_v13  ;;  %v1625_v18 = vpop.xlane.xlu1 %1624 }
 0x46a   : > { %v1661_v62 = vsub.f32 %v5377_v9, %v1625_v18 }
 0x46b   : > { %v1684_v19 = vmul.f32 1.442695, %v1662_v47 }
 0x46c   : > { %v5422_v15 = vpop.eup %4353  ;;  %v1682_v21 = vmul.f32 1.442695, %v1661_v62 }
 0x46d   : > { %4355 = vpow2.f32 %v1684_v19  ;;  %v1716_v58 = vsel %vm1607_vm2, %v5422_v15, 0.0 }
 0x46e   : > { %4357 = vpow2.f32 %v1682_v21  ;;  %1717 = vadd.xlane.f32.xlu0 %v1716_v58 }
 0x470   : > { %v1631_v28 = vpop.xlane.xlu0 %1630 }
 0x471   : > { %v1663_v40 = vsub.f32 %v1598_v23, %v1631_v28  ;;  %v1706_v32 = vpop.xlane.xlu1 %1705  ;;  %v5436_v23 = vmul.f32 0.088388346, %v1564_v43 }
 0x472   : > { %4359 = vrcp.f32 %v1706_v32 }
 0x473   : > { %v5426_v24 = vpop.eup %4355  ;;  %v1686_v61 = vmul.f32 1.442695, %v1663_v40  ;;  %v1644_v30 = vsel %vm1607_vm2, %v5436_v23, -inf }
 0x474   : > { %v5428_v53 = vpop.eup %4357  ;;  %v1722_v9 = vsel %vm1607_vm2, %v5426_v24, 0.0 }
 0x475   : > { %4361 = vpow2.f32 %v1686_v61  ;;  %1723 = vadd.xlane.f32.xlu2 %v1722_v9  ;;  %v1719_v29 = vsel %vm1607_vm2, %v5428_v53, 0.0 }
 0x476   : > { %1720 = vadd.xlane.f32.xlu1 %v1719_v29 }
 0x478   : > { %v4360_v16 = vpop.eup %4359 }
 0x479   : > { %v1709_v33 = vpop.xlane.xlu2 %1708  ;;  %v1768_v14 = vmul.f32 %v4360_v16, %v5384_v52 }
 0x47a   : > { %4363 = vrcp.f32 %v1709_v33 }
 0x47b   : > { %v5438_v41 = vpop.eup %4361  ;;  %v1586_v7 = vpop.f32.mrf.mxu2  ;;  %v1784_v39 = vpack.c.bf16 %v1768_v14, %v1768_v14 }
 0x47c   : > { %v1725_v44 = vsel %vm1607_vm2, %v5438_v41, 0.0  ;;  %v5447_v57 = vmul.f32 0.088388346, %v1586_v7 }
 0x47d   : > { %1648 = vmax.xlane.f32.xlu2 %v1647_v25  ;;  %1726 = vadd.xlane.f32.xlu0 %v1725_v44  ;;  %v1802_v13 = vunpack.c.l.b16 %v1784_v39 }
 0x47e   : > { %1645 = vmax.xlane.f32.xlu1 %v1644_v30  ;;  %v1650_v10 = vsel %vm1607_vm2, %v5447_v57, -inf }
 0x480   : > { %v4364_v50 = vpop.eup %4363  ;;  %v1634_v3 = vpop.xlane.xlu0 %1633 }
 0x481   : > { %v1769_v46 = vmul.f32 %v4364_v50, %v5390_v38  ;;  %v1712_v1 = vpop.xlane.xlu2 %1711  ;;  %v1664_v60 = vsub.f32 %v5395_v2, %v1634_v3 }
 0x482   : > { %4365 = vrcp.f32 %v1712_v1 }
 0x483   : > { %v1785_v5 = vpack.c.bf16 %v1769_v46, %v1769_v46  ;;  %v1588_v6 = vpop.f32.mrf.mxu2  ;;  %v1688_v52 = vmul.f32 1.442695, %v1664_v60  ;;  %v4134_v60 = vld [vmem:[#allocation8 + $0x38] sm:$0xff] }
 0x484   : > { %v5451_v22 = vmul.f32 0.088388346, %v1588_v6 }
 0x485   : > { %v1803_v47 = vunpack.c.l.b16 %v1785_v5  ;;  %1651 = vmax.xlane.f32.xlu0 %v1650_v10  ;;  %4367 = vpow2.f32 %v1688_v52  ;;  %v4133_v52 = vld [vmem:[#allocation8 + $0x30] sm:$0xff] }
 0x486   : > { %v1653_v38 = vsel %vm1607_vm2, %v5451_v22, -inf }
 0x487   : > { %1654 = vmax.xlane.f32.xlu1 %v1653_v38  ;;  %v1804_v18 = vpack.c.b16 %v1803_v47, %v1802_v13 }
 0x488   : > { %v1637_v62 = vpop.xlane.xlu1 %1636  ;;  %v4366_v43 = vpop.eup %4365 }
 0x489   : > { %3929 = vmatmul.msk.bf16.vlgmr.msrb.gmra.mxu3 %vm1607_vm2, %v1804_v18  ;;  %v1715_v2 = vpop.xlane.xlu0 %1714  ;;  %v1665_v19 = vsub.f32 %v5403_v0, %v1637_v62  ;;  %v1770_v28 = vmul.f32 %v4366_v43, %v5397_v49 }
 0x48a   : > { %4369 = vrcp.f32 %v1715_v2  ;;  %2096 = vmatpush.bf16.msrb.mxu3 %v4134_v60 }
 0x48b   : > { %v5459_v21 = vpop.eup %4367  ;;  %v1690_v58 = vmul.f32 1.442695, %v1665_v19  ;;  %v1786_v61 = vpack.c.bf16 %v1770_v28, %v1770_v28  ;;  %v4132_v19 = vld [vmem:[#allocation8 + $0x28] sm:$0xff] }
 0x48c   : > { %v1728_v40 = vsel %vm1607_vm2, %v5459_v21, 0.0 }
 0x48d   : > { %4371 = vpow2.f32 %v1690_v58  ;;  %1729 = vadd.xlane.f32.xlu2 %v1728_v40  ;;  %v1830_v49 = vunpack.c.l.b16 %v1786_v61 }
 0x48e   : > { %2097 = vmatpush.bf16.msrb.mxu3 %v4133_v52 }
 0x490   : > { %v4370_v32 = vpop.eup %4369  ;;  %v1640_v12 = vpop.xlane.xlu1 %1639 }
 0x491   : > { %v1771_v9 = vmul.f32 %v4370_v32, %v5405_v11  ;;  %v1666_v29 = vsub.f32 %v5411_v27, %v1640_v12  ;;  %v4131_v12 = vld [vmem:[#allocation8 + $0x20] sm:$0xff] }
 0x492   : > { %v1643_v0 = vpop.xlane.xlu2 %1642  ;;  %2098 = vmatpush.bf16.msrb.mxu3 %v4132_v19 }
 0x493   : > { %v1787_v33 = vpack.c.bf16 %v1771_v9, %v1771_v9  ;;  %v5466_v16 = vpop.eup %4371  ;;  %v1692_v7 = vmul.f32 1.442695, %v1666_v29  ;;  %v1667_v25 = vsub.f32 %v5413_v36, %v1643_v0 }
 0x494   : > { %v1731_v14 = vsel %vm1607_vm2, %v5466_v16, 0.0 }
 0x495   : > { %v1831_v44 = vunpack.c.l.b16 %v1787_v33  ;;  %4373 = vpow2.f32 %v1692_v7  ;;  %v1694_v30 = vmul.f32 1.442695, %v1667_v25  ;;  %1732 = vadd.xlane.f32.xlu0 %v1731_v14  ;;  %v4130_v7 = vld [vmem:[#allocation8 + $0x18] sm:$0xff] }
 0x496   : > { %2099 = vmatpush.bf16.msrb.mxu3 %v4131_v12 }
 0x497   : > { %v1832_v50 = vpack.c.b16 %v1831_v44, %v1830_v49  ;;  %4375 = vpow2.f32 %v1694_v30 }
 0x499   : > { %3930 = vmatmul.msk.bf16.vlgmr.msrb.gmra.mxu0 %vm1607_vm2, %v1832_v50 }
 0x49a   : > { %2100 = vmatpush.bf16.msrb.mxu3 %v4130_v7 }
 0x49b   : > { %v5472_v11 = vpop.eup %4373 }
 0x49c   : > { %v1734_v27 = vsel %vm1607_vm2, %v5472_v11, 0.0 }
 0x49d   : > { %v5476_v39 = vpop.eup %4375  ;;  %1735 = vadd.xlane.f32.xlu1 %v1734_v27 }
 0x49e   : > { %v1737_v36 = vsel %vm1607_vm2, %v5476_v39, 0.0 }
 0x49f   : > { %1738 = vadd.xlane.f32.xlu2 %v1737_v36 }
 0x4e1   : > { %v1718_v46 = vpop.xlane.xlu0 %1717 }
 0x4e2   : > { %4377 = vrcp.f32 %v1718_v46  ;;  %v4129_v46 = vld [vmem:[#allocation8 + $0x10] sm:$0xff] }
 0x4e3   : > { %2101 = vmatpush.bf16.msrb.mxu3 %v4129_v46 }
 0x4e8   : > { %v1724_v1 = vpop.xlane.xlu2 %1723  ;;  %v4378_v5 = vpop.eup %4377 }
 0x4e9   : > { %v1721_v3 = vpop.xlane.xlu1 %1720  ;;  %v1772_v6 = vmul.f32 %v4378_v5, %v5422_v15  ;;  %v4127_v5 = vld [vmem:[#allocation8] sm:$0xff] }
 0x4ea   : > { %4379 = vrcp.f32 %v1721_v3  ;;  %v4128_v3 = vld [vmem:[#allocation8 + $0x8] sm:$0xff] }
 0x4eb   : > { %4381 = vrcp.f32 %v1724_v1  ;;  %v1788_v18 = vpack.c.bf16 %v1772_v6, %v1772_v6  ;;  %2102 = vmatpush.bf16.msrb.mxu3 %v4128_v3 }
 0x4ed   : > { %v1858_v61 = vunpack.c.l.b16 %v1788_v18 }
 0x4ef   : > { %2103 = vmatpush.bf16.msrb.mxu3 %v4127_v5 }
 0x4f0   : > { %v4380_v10 = vpop.eup %4379  ;;  %v1649_v13 = vpop.xlane.xlu2 %1648 }
 0x4f1   : > { %v1727_v47 = vpop.xlane.xlu0 %1726  ;;  %v4382_v38 = vpop.eup %4381  ;;  %v1773_v62 = vmul.f32 %v4380_v10, %v5428_v53  ;;  %v1669_v2 = vsub.f32 %v5434_v37, %v1649_v13 }
 0x4f2   : > { %4383 = vrcp.f32 %v1727_v47  ;;  %v1646_v43 = vpop.xlane.xlu1 %1645  ;;  %v1774_v15 = vmul.f32 %v4382_v38, %v5426_v24 }
 0x4f3   : > { %v1668_v58 = vsub.f32 %v5436_v23, %v1646_v43  ;;  %v1789_v28 = vpack.c.bf16 %v1773_v62, %v1773_v62  ;;  %v1698_v40 = vmul.f32 1.442695, %v1669_v2 }
 0x4f4   : > { %v1790_v37 = vpack.c.bf16 %v1774_v15, %v1774_v15 }
 0x4f5   : > { %v1696_v32 = vmul.f32 1.442695, %v1668_v58  ;;  %v1859_v9 = vunpack.c.l.b16 %v1789_v28  ;;  %4385 = vpow2.f32 %v1698_v40 }
 0x4f6   : > { %v1886_v50 = vunpack.c.l.b16 %v1790_v37 }
 0x4f7   : > { %4387 = vpow2.f32 %v1696_v32  ;;  %v1860_v53 = vpack.c.b16 %v1859_v9, %v1858_v61 }
 0x4f8   : > { %v4384_v29 = vpop.eup %4383 }
 0x4f9   : > { %v1775_v33 = vmul.f32 %v4384_v29, %v5438_v41  ;;  %v1652_v0 = vpop.xlane.xlu0 %1651  ;;  %3931 = vmatmul.msk.bf16.vlgmr.msra.gmra.mxu1 %vm1607_vm2, %v1860_v53 }
 0x4fa   : > { %v1670_v23 = vsub.f32 %v5447_v57, %v1652_v0  ;;  %v1655_v24 = vpop.xlane.xlu1 %1654 }
 0x4fb   : > { %v1791_v25 = vpack.c.bf16 %v1775_v33, %v1775_v33  ;;  %v5488_v49 = vpop.eup %4385  ;;  %v1671_v14 = vsub.f32 %v5451_v22, %v1655_v24 }
 0x4fc   : > { %v1700_v44 = vmul.f32 1.442695, %v1670_v23  ;;  %v1743_v41 = vsel %vm1607_vm2, %v5488_v49, 0.0 }
 0x4fd   : > { %v5491_v30 = vpop.eup %4387  ;;  %v1887_v27 = vunpack.c.l.b16 %v1791_v25  ;;  %v1702_v57 = vmul.f32 1.442695, %v1671_v14  ;;  %1744 = vadd.xlane.f32.xlu1 %v1743_v41 }
 0x4fe   : > { %4389 = vpow2.f32 %v1700_v44  ;;  %v1740_v36 = vsel %vm1607_vm2, %v5491_v30, 0.0 }
 0x4ff   : > { %v1888_v1 = vpack.c.b16 %v1887_v27, %v1886_v50  ;;  %1741 = vadd.xlane.f32.xlu0 %v1740_v36  ;;  %4391 = vpow2.f32 %v1702_v57 }
 0x500   : > { %v1730_v22 = vpop.xlane.xlu2 %1729 }
 0x501   : > { %3932 = vmatmul.msk.bf16.vlgmr.msra.gmra.mxu2 %vm1607_vm2, %v1888_v1  ;;  %4393 = vrcp.f32 %v1730_v22 }
 0x504   : > { %v5498_v60 = vpop.eup %4389 }
 0x505   : > { %v1746_v6 = vsel %vm1607_vm2, %v5498_v60, 0.0  ;;  %v5502_v52 = vpop.eup %4391 }
 0x506   : > { %1747 = vadd.xlane.f32.xlu2 %v1746_v6  ;;  %v1749_v10 = vsel %vm1607_vm2, %v5502_v52, 0.0 }
 0x507   : > { %1750 = vadd.xlane.f32.xlu0 %v1749_v10  ;;  %v4394_v47 = vpop.eup %4393 }
 0x508   : > { %v1733_v13 = vpop.xlane.xlu0 %1732  ;;  %v1776_v38 = vmul.f32 %v4394_v47, %v5459_v21 }
 0x509   : > { %4395 = vrcp.f32 %v1733_v13 }
 0x50a   : > { %v1792_v62 = vpack.c.bf16 %v1776_v38, %v1776_v38 }
 0x50c   : > { %v1914_v28 = vunpack.c.l.b16 %v1792_v62  ;;  %v1823_v12 = vpop.f32.mrf.mxu3 }
 0x50f   : > { %v4396_v18 = vpop.eup %4395 }
 0x510   : > { %v1777_v2 = vmul.f32 %v4396_v18, %v5466_v16  ;;  %v1736_v43 = vpop.xlane.xlu1 %1735 }
 0x511   : > { %4397 = vrcp.f32 %v1736_v43 }
 0x512   : > { %v1793_v19 = vpack.c.bf16 %v1777_v2, %v1777_v2  ;;  %v1739_v58 = vpop.xlane.xlu2 %1738 }
 0x513   : > { %4399 = vrcp.f32 %v1739_v58 }
 0x514   : > { %v1915_v40 = vunpack.c.l.b16 %v1793_v19  ;;  %v1825_v0 = vpop.f32.mrf.mxu3 }
 0x515   : > { %v2024_v23 = vpack.c.bf16 %v1825_v0, %v1823_v12 }
 0x516   : > { %v1916_v15 = vpack.c.b16 %v1915_v40, %v1914_v28  ;;  %v1851_v7 = vpop.f32.mrf.mxu0 }
 0x517   : > { %v4398_v32 = vpop.eup %4397 }
 0x518   : > { %v1778_v61 = vmul.f32 %v4398_v32, %v5472_v11  ;;  %3933 = vmatmul.msk.bf16.vlgmr.msra.gmra.mxu3 %vm1607_vm2, %v1916_v15 }
 0x519   : > { %v4400_v9 = vpop.eup %4399 }
 0x51a   : > { %v1794_v21 = vpack.c.bf16 %v1778_v61, %v1778_v61  ;;  %v1779_v29 = vmul.f32 %v4400_v9, %v5476_v39 }
 0x51c   : > { %v1795_v53 = vpack.c.bf16 %v1779_v29, %v1779_v29  ;;  %v1942_v16 = vunpack.c.l.b16 %v1794_v21 }
 0x51e   : > { %v1943_v37 = vunpack.c.l.b16 %v1795_v53  ;;  %v1853_v25 = vpop.f32.mrf.mxu0 }
 0x51f   : > { %v2025_v24 = vpack.c.bf16 %v1853_v25, %v1851_v7 }
 0x520   : > { %v1944_v33 = vpack.c.b16 %v1943_v37, %v1942_v16 }
 0x522   : > { %3934 = vmatmul.msk.bf16.vlgmr.msra.gmra.mxu0 %vm1607_vm2, %v1944_v33 }
 0x528   : > { %2104 = vmatmul.bf16.vlgmr.msrb.gmra.mxu3 %v2024_v23 }
 0x538   : > { %2109 = vmatmul.bf16.gmra.mxu3 %v2025_v24 }
 0x570   : > { %v1745_v11 = vpop.xlane.xlu1 %1744 }
 0x571   : > { %4401 = vrcp.f32 %v1745_v11 }
 0x572   : > { %v1742_v44 = vpop.xlane.xlu0 %1741 }
 0x573   : > { %4403 = vrcp.f32 %v1742_v44 }
 0x576   : > { %v1879_v14 = vpop.f32.mrf.mxu1 }
 0x577   : > { %v4402_v50 = vpop.eup %4401 }
 0x578   : > { %v1781_v27 = vmul.f32 %v4402_v50, %v5488_v49 }
 0x579   : > { %v4404_v39 = vpop.eup %4403  ;;  %v1748_v41 = vpop.xlane.xlu2 %1747 }
 0x57a   : > { %v1780_v57 = vmul.f32 %v4404_v39, %v5491_v30  ;;  %4405 = vrcp.f32 %v1748_v41  ;;  %v1797_v36 = vpack.c.bf16 %v1781_v27, %v1781_v27  ;;  %v1751_v46 = vpop.xlane.xlu0 %1750 }
 0x57b   : > { %4407 = vrcp.f32 %v1751_v46 }
 0x57c   : > { %v1796_v1 = vpack.c.bf16 %v1780_v57, %v1780_v57  ;;  %v1971_v22 = vunpack.c.l.b16 %v1797_v36 }
 0x57e   : > { %v1970_v3 = vunpack.c.l.b16 %v1796_v1  ;;  %v1881_v5 = vpop.f32.mrf.mxu1 }
 0x57f   : > { %v2026_v13 = vpack.c.bf16 %v1881_v5, %v1879_v14 }
 0x580   : > { %v4406_v6 = vpop.eup %4405  ;;  %v1972_v10 = vpack.c.b16 %v1971_v22, %v1970_v3 }
 0x581   : > { %v1782_v47 = vmul.f32 %v4406_v6, %v5498_v60  ;;  %v4408_v38 = vpop.eup %4407  ;;  %2114 = vmatmul.bf16.gmra.mxu3 %v2026_v13 }
 0x582   : > { %3935 = vmatmul.msk.bf16.vlgmr.msrb.gmra.mxu1 %vm1607_vm2, %v1972_v10  ;;  %v1783_v30 = vmul.f32 %v4408_v38, %v5502_v52 }
 0x583   : > { %v1798_v49 = vpack.c.bf16 %v1782_v47, %v1782_v47 }
 0x584   : > { %v1907_v18 = vpop.f32.mrf.mxu2  ;;  %v1799_v62 = vpack.c.bf16 %v1783_v30, %v1783_v30 }
 0x585   : > { %v1998_v2 = vunpack.c.l.b16 %v1798_v49 }
 0x586   : > { %v1999_v43 = vunpack.c.l.b16 %v1799_v62 }
 0x588   : > { %v2000_v19 = vpack.c.b16 %v1999_v43, %v1998_v2 }
 0x58a   : > { %3936 = vmatmul.msk.bf16.vlgmr.msrb.gmra.mxu2 %vm1607_vm2, %v2000_v19 }
 0x58c   : > { %v1909_v58 = vpop.f32.mrf.mxu2 }
 0x58d   : > { %v2027_v28 = vpack.c.bf16 %v1909_v58, %v1907_v18  ;;  %v4027_v58 = vld [vmem:[#allocation10 + $0x70] sm:$0xf] }
 0x591   : > { %2119 = vmatmul.bf16.gmra.mxu3 %v2027_v28  ;;  %v4150_v28 = vld [vmem:[#allocation10 + $0x74] sm:$0xf0] }
 0x59b   : > { %v1935_v40 = vpop.f32.mrf.mxu3 }
 0x59f   : > { %v1963_v32 = vpop.f32.mrf.mxu0 }
 0x5a3   : > { %v1937_v15 = vpop.f32.mrf.mxu3 }
 0x5a4   : > { %v2028_v60 = vpack.c.bf16 %v1937_v15, %v1935_v40  ;;  %v4149_v40 = vld [vmem:[#allocation10 + $0x74] sm:$0xf] }
 0x5a6   : > { %2124 = vmatmul.bf16.gmra.mxu3 %v2028_v60  ;;  %v4029_v60 = vld [vmem:[#allocation10 + $0x78] sm:$0xf0] }
 0x5a7   : > { %v1965_v52 = vpop.f32.mrf.mxu0 }
 0x5a8   : > { %v2029_v21 = vpack.c.bf16 %v1965_v52, %v1963_v32 }
 0x5ab   : > { %v2105_v61 = vpop.f32.mrf.mxu3 }
 0x5ac   : > { %v5519_v9 = vadd.f32 %v2105_v61, %v5085_v42  ;;  %v4032_v61 = vor.u32 %v4149_v40, %v4029_v60  ;;  %v3979_v60 = vld [vmem:[#allocation10 + $0x10] sm:$0xf] }
 0x5ae   : > { %2161 = vadd.xlane.f32.xlu1 %v5519_v9  ;;  %2671 = vmatpush.bf16.msra.mxu1 %v4032_v61  ;;  %v4137_v61 = vld [vmem:[#allocation10 + $0x14] sm:$0xf] }
 0x5b3   : > { %v2107_v12 = vpop.f32.mrf.mxu3 }
 0x5b4   : > { %v5523_v29 = vadd.f32 %v2107_v12, %v5091_v45  ;;  %v4019_v12 = vld [vmem:[#allocation10 + $0x60] sm:$0xf] }
 0x5b6   : > { %2163 = vadd.xlane.f32.xlu2 %v5523_v29  ;;  %2129 = vmatmul.bf16.gmra.mxu3 %v2029_v21  ;;  %v4148_v21 = vld [vmem:[#allocation10 + $0x64] sm:$0xf0] }
 0x5bb   : > { %v2110_v53 = vpop.f32.mrf.mxu3 }
 0x5bc   : > { %v5527_v16 = vadd.f32 %v2110_v53, %v5097_v48  ;;  %v4147_v53 = vld [vmem:[#allocation10 + $0x64] sm:$0xf] }
 0x5be   : > { %2165 = vadd.xlane.f32.xlu0 %v5527_v16 }
 0x5c3   : > { %v2112_v37 = vpop.f32.mrf.mxu3 }
 0x5c4   : > { %v5531_v42 = vadd.f32 %v2112_v37, %v5103_v51 }
 0x5c6   : > { %2167 = vadd.xlane.f32.xlu1 %v5531_v42 }
 0x5ff   : > { %v1991_v33 = vpop.f32.mrf.mxu1 }
 0x604   : > { %v2115_v0 = vpop.f32.mrf.mxu3 }
 0x605   : > { %v5535_v45 = vadd.f32 %v2115_v0, %v5109_v54  ;;  %v4020_v0 = vor.u32 %v4148_v21, %v4019_v12  ;;  %v3981_v21 = vld [vmem:[#allocation10 + $0x18] sm:$0xf0] }
 0x607   : > { %v1993_v23 = vpop.f32.mrf.mxu1  ;;  %2169 = vadd.xlane.f32.xlu2 %v5535_v45 }
 0x608   : > { %v2030_v7 = vpack.c.bf16 %v1993_v23, %v1991_v33  ;;  %v4021_v23 = vld [vmem:[#allocation10 + $0x68] sm:$0xf0] }
 0x60a   : > { %2134 = vmatmul.bf16.gmra.mxu3 %v2030_v7  ;;  %v4024_v7 = vor.u32 %v4147_v53, %v4021_v23 }
 0x60c   : > { %v2117_v48 = vpop.f32.mrf.mxu3  ;;  %2672 = vmatpush.bf16.msra.mxu1 %v4024_v7  ;;  %v4136_v7 = vld [vmem:[#allocation10 + $0x4] sm:$0xf0] }
 0x60d   : > { %v5539_v25 = vadd.f32 %v2117_v48, %v5112_v55  ;;  %v2019_v24 = vpop.f32.mrf.mxu2 }
 0x60f   : > { %2171 = vadd.xlane.f32.xlu0 %v5539_v25 }
 0x614   : > { %v2120_v51 = vpop.f32.mrf.mxu3 }
 0x615   : > { %v5543_v11 = vadd.f32 %v2120_v51, %v5115_v56  ;;  %v2021_v44 = vpop.f32.mrf.mxu2  ;;  %v4146_v51 = vld [vmem:[#allocation10 + $0x54] sm:$0xf0] }
 0x616   : > { %v2031_v14 = vpack.c.bf16 %v2021_v44, %v2019_v24  ;;  %v4011_v24 = vld [vmem:[#allocation10 + $0x50] sm:$0xf]  ;;  %v4145_v44 = vld [vmem:[#allocation10 + $0x54] sm:$0xf] }
 0x617   : > { %2173 = vadd.xlane.f32.xlu0 %v5543_v11 }
 0x61a   : > { %2139 = vmatmul.bf16.gmra.mxu3 %v2031_v14 }
 0x61c   : > { %v2122_v27 = vpop.f32.mrf.mxu3 }
 0x61d   : > { %v5557_v36 = vadd.f32 %v2122_v27, %v5126_v4 }
 0x621   : > { %v2162_v54 = vpop.xlane.xlu1 %2161 }
 0x622   : > { %v2193_v50 = vmul.f32 %v2162_v54, %v5118_v63  ;;  %v4012_v54 = vor.u32 %v4146_v51, %v4011_v24 }
 0x624   : > { %v5548_v39 = vsub.f32 %v5519_v9, %v2193_v50 }
 0x626   : > { %v2225_v55 = vmul.f32 %v5548_v39, %v5548_v39 }
 0x628   : > { %2241 = vadd.xlane.f32.xlu1 %v2225_v55 }
 0x629   : > { %v2164_v41 = vpop.xlane.xlu2 %2163  ;;  %v2125_v1 = vpop.f32.mrf.mxu3 }
 0x62a   : > { %v2194_v56 = vmul.f32 %v2164_v41, %v5118_v63  ;;  %v5567_v6 = vadd.f32 %v2125_v1, %v5133_v8  ;;  %v4003_v41 = vld [vmem:[#allocation10 + $0x40] sm:$0xf] }
 0x62c   : > { %v5554_v57 = vsub.f32 %v5523_v29, %v2194_v56  ;;  %v4144_v56 = vld [vmem:[#allocation10 + $0x44] sm:$0xf0] }
 0x62e   : > { %v2226_v46 = vmul.f32 %v5554_v57, %v5554_v57 }
 0x630   : > { %2243 = vadd.xlane.f32.xlu2 %v2226_v46  ;;  %2175 = vadd.xlane.f32.xlu1 %v5557_v36  ;;  %v4143_v46 = vld [vmem:[#allocation10 + $0x44] sm:$0xf] }
 0x631   : > { %v2166_v22 = vpop.xlane.xlu0 %2165  ;;  %v2127_v10 = vpop.f32.mrf.mxu3 }
 0x632   : > { %v2195_v3 = vmul.f32 %v2166_v22, %v5118_v63  ;;  %v5577_v49 = vadd.f32 %v2127_v10, %v5148_v17 }
 0x634   : > { %v5564_v5 = vsub.f32 %v5527_v16, %v2195_v3  ;;  %v4004_v3 = vor.u32 %v4144_v56, %v4003_v41 }
 0x636   : > { %v2227_v4 = vmul.f32 %v5564_v5, %v5564_v5 }
 0x638   : > { %2177 = vadd.xlane.f32.xlu1 %v5567_v6  ;;  %2245 = vadd.xlane.f32.xlu2 %v2227_v4  ;;  %v4005_v4 = vld [vmem:[#allocation10 + $0x48] sm:$0xf0] }
 0x639   : > { %v2168_v13 = vpop.xlane.xlu1 %2167  ;;  %v2130_v30 = vpop.f32.mrf.mxu3  ;;  %v4008_v10 = vor.u32 %v4143_v46, %v4005_v4 }
 0x63a   : > { %v2196_v47 = vmul.f32 %v2168_v13, %v5118_v63  ;;  %v5583_v18 = vadd.f32 %v2130_v30, %v5153_v20  ;;  %v4028_v20 = vor.u32 %v4150_v28, %v4027_v58  ;;  %v3995_v13 = vld [vmem:[#allocation10 + $0x30] sm:$0xf]  ;;  %v4139_v58 = vld [vmem:[#allocation10 + $0x24] sm:$0xf] }
 0x63c   : > { %v5574_v38 = vsub.f32 %v5531_v42, %v2196_v47  ;;  %2622 = vmatpush.bf16.msrb.mxu0 %v4028_v20  ;;  %v4142_v47 = vld [vmem:[#allocation10 + $0x34] sm:$0xf0] }
 0x63d   : > { %v3996_v30 = vor.u32 %v4142_v47, %v3995_v13 }
 0x63e   : > { %v2228_v8 = vmul.f32 %v5574_v38, %v5574_v38 }
 0x640   : > { %2247 = vadd.xlane.f32.xlu0 %v2228_v8  ;;  %2179 = vadd.xlane.f32.xlu2 %v5577_v49  ;;  %v4141_v8 = vld [vmem:[#allocation10 + $0x34] sm:$0xf] }
 0x641   : > { %v2132_v32 = vpop.f32.mrf.mxu3  ;;  %2623 = vmatpush.bf16.msrb.mxu0 %v4020_v0  ;;  %v3984_v0 = vor.u32 %v4137_v61, %v3981_v21 }
 0x642   : > { %v5597_v37 = vadd.f32 %v2132_v32, %v5163_v26  ;;  %v4013_v26 = vld [vmem:[#allocation10 + $0x58] sm:$0xf0]  ;;  %v4138_v32 = vld [vmem:[#allocation10 + $0x14] sm:$0xf0] }
 0x643   : > { %v4016_v55 = vor.u32 %v4145_v44, %v4013_v26  ;;  %v3980_v12 = vor.u32 %v4138_v32, %v3979_v60 }
 0x645   : > { %2624 = vmatpush.bf16.msrb.mxu0 %v4012_v54  ;;  %2673 = vmatpush.bf16.msra.mxu1 %v4016_v55 }
 0x648   : > { %2181 = vadd.xlane.f32.xlu2 %v5583_v18 }
 0x649   : > { %2625 = vmatpush.bf16.msrb.mxu0 %v4004_v3  ;;  %2674 = vmatpush.bf16.msra.mxu1 %v4008_v10 }
 0x64d   : > { %2626 = vmatpush.bf16.msrb.mxu0 %v3996_v30 }
 0x67a   : > { %v2170_v62 = vpop.xlane.xlu2 %2169 }
 0x67b   : > { %v2197_v2 = vmul.f32 %v2170_v62, %v5118_v63  ;;  %v3997_v62 = vld [vmem:[#allocation10 + $0x38] sm:$0xf0] }
 0x67d   : > { %v5588_v43 = vsub.f32 %v5535_v45, %v2197_v2 }
 0x67f   : > { %v2229_v17 = vmul.f32 %v5588_v43, %v5588_v43 }
 0x681   : > { %2249 = vadd.xlane.f32.xlu0 %v2229_v17  ;;  %v4000_v17 = vor.u32 %v4141_v8, %v3997_v62 }
 0x682   : > { %v2172_v19 = vpop.xlane.xlu0 %2171 }
 0x683   : > { %v2198_v15 = vmul.f32 %v2172_v19, %v5118_v63  ;;  %2675 = vmatpush.bf16.msra.mxu1 %v4000_v17  ;;  %v4140_v19 = vld [vmem:[#allocation10 + $0x24] sm:$0xf0] }
 0x685   : > { %v5594_v52 = vsub.f32 %v5539_v25, %v2198_v15  ;;  %v3989_v15 = vld [vmem:[#allocation10 + $0x28] sm:$0xf0] }
 0x686   : > { %v3992_v20 = vor.u32 %v4139_v58, %v3989_v15 }
 0x687   : > { %v2230_v33 = vmul.f32 %v5594_v52, %v5594_v52 }
 0x688   : > { %2676 = vmatpush.bf16.msra.mxu1 %v3992_v20 }
 0x689   : > { %2183 = vadd.xlane.f32.xlu0 %v5597_v37  ;;  %2251 = vadd.xlane.f32.xlu1 %v2230_v33 }
 0x68a   : > { %v2174_v48 = vpop.xlane.xlu0 %2173 }
 0x68b   : > { %v2199_v14 = vmul.f32 %v2174_v48, %v5118_v63  ;;  %v4135_v48 = vld [vmem:[#allocation10 + $0x4] sm:$0xf] }
 0x68c   : > { %2677 = vmatpush.bf16.msra.mxu1 %v3984_v0 }
 0x68d   : > { %v2135_v50 = vpop.f32.mrf.mxu3  ;;  %v5604_v27 = vsub.f32 %v5543_v11, %v2199_v14  ;;  %v3973_v14 = vld [vmem:[#allocation10 + $0x8] sm:$0xf0] }
 0x68e   : > { %v5607_v1 = vadd.f32 %v2135_v50, %v5172_v31  ;;  %v3987_v31 = vld [vmem:[#allocation10 + $0x20] sm:$0xf]  ;;  %v3976_v54 = vor.u32 %v4135_v48, %v3973_v14 }
 0x68f   : > { %v2231_v22 = vmul.f32 %v5604_v27, %v5604_v27  ;;  %v3988_v40 = vor.u32 %v4140_v19, %v3987_v31  ;;  %v5641_v48 = vld [vmem:[#allocation13 + $0x2] ss:$0 sm:$0xff] }
 0x690   : > { %2678 = vmatpush.bf16.msra.mxu1 %v3976_v54 }
 0x691   : > { %2185 = vadd.xlane.f32.xlu0 %v5607_v1  ;;  %2253 = vadd.xlane.f32.xlu1 %v2231_v22 }
 0x692   : > { %2627 = vmatpush.bf16.msrb.mxu0 %v3988_v40 }
 0x695   : > { %v2137_v2 = vpop.f32.mrf.mxu3 }
 0x696   : > { %v5613_v28 = vadd.f32 %v2137_v2, %v5180_v34  ;;  %2628 = vmatpush.bf16.msrb.mxu0 %v3980_v12  ;;  %v3971_v34 = vld [vmem:[#allocation10] sm:$0xf] }
 0x697   : > { %v3972_v44 = vor.u32 %v4136_v7, %v3971_v34 }
 0x699   : > { %2187 = vadd.xlane.f32.xlu1 %v5613_v28 }
 0x69a   : > { %2629 = vmatpush.bf16.msrb.mxu0 %v3972_v44 }
 0x69b   : > { %v2242_v53 = vpop.xlane.xlu1 %2241 }
 0x69c   : > { %v2273_v23 = vmul.f32 %v2242_v53, %v5118_v63 }
 0x69d   : > { %v2140_v33 = vpop.f32.mrf.mxu3 }
 0x69e   : > { %v2289_v24 = vadd.f32 1e-05, %v2273_v23  ;;  %v5618_v51 = vadd.f32 %v2140_v33, %v5183_v35 }
 0x6a0   : > { %4409 = vrsqrt.f32 %v2289_v24  ;;  %vm2311_vm4 = vweird.f32 %v2289_v24 }
 0x6a1   : > { %2189 = vadd.xlane.f32.xlu1 %v5618_v51 }
 0x6a3   : > { %v2244_v26 = vpop.xlane.xlu2 %2243  ;;  %v2176_v50 = vpop.xlane.xlu1 %2175 }
 0x6a4   : > { %v2274_v55 = vmul.f32 %v2244_v26, %v5118_v63  ;;  %v2200_v41 = vmul.f32 %v2176_v50, %v5118_v63 }
 0x6a5   : > { %v2142_v33 = vpop.f32.mrf.mxu3 }
 0x6a6   : > { %v4410_v56 = vpop.eup %4409  ;;  %v2290_v46 = vadd.f32 1e-05, %v2274_v55  ;;  %v5624_v22 = vsub.f32 %v5557_v36, %v2200_v41  ;;  %v5644_v14 = vadd.f32 %v2142_v33, %v5206_v59  ;;  %v5651_v41 = vld [vmem:[#allocation13 + $0x3] ss:$0 sm:$0xff] }
 0x6a7   : > { %v2306_v35 = vmul.f32 %v4410_v56, %v2289_v24  ;;  %vm2312_vm3 = vweird.f32 %v4410_v56 }
 0x6a8   : > { %4411 = vrsqrt.f32 %v2290_v46  ;;  %v2232_v3 = vmul.f32 %v5624_v22, %v5624_v22  ;;  %vm2313_vm5 = vmor %vm2311_vm4, %vm2312_vm3  ;;  %vm2321_vm7 = vweird.f32 %v2290_v46 }
 0x6a9   : > { %v2307_v4 = vmul.f32 %v4410_v56, %v2306_v35 }
 0x6aa   : > { %2255 = vadd.xlane.f32.xlu2 %v2232_v3 }
 0x6ab   : > { %v2308_v10 = vmul.f32 0.5, %v2307_v4  ;;  %v2178_v13 = vpop.xlane.xlu1 %2177  ;;  %v2246_v47 = vpop.xlane.xlu2 %2245 }
 0x6ac   : > { %v2201_v8 = vmul.f32 %v2178_v13, %v5118_v63  ;;  %v2275_v30 = vmul.f32 %v2246_v47, %v5118_v63 }
 0x6ad   : > { %v2309_v62 = vsub.f32 1.5, %v2308_v10 }
 0x6ae   : > { %v4412_v2 = vpop.eup %4411  ;;  %v5631_v17 = vsub.f32 %v5567_v6, %v2201_v8  ;;  %v2291_v31 = vadd.f32 1e-05, %v2275_v30 }
 0x6af   : > { %v2310_v19 = vmul.f32 %v4410_v56, %v2309_v62  ;;  %v2316_v58 = vmul.f32 %v4412_v2, %v2290_v46  ;;  %vm2322_vm6 = vweird.f32 %v4412_v2 }
 0x6b0   : > { %4413 = vrsqrt.f32 %v2291_v31  ;;  %v2233_v40 = vmul.f32 %v5631_v17, %v5631_v17  ;;  %vm2323_vm8 = vmor %vm2321_vm7, %vm2322_vm6  ;;  %vm2331_vm10 = vweird.f32 %v2291_v31 }
 0x6b1   : > { %v2317_v15 = vmul.f32 %v4412_v2, %v2316_v58  ;;  %v2314_v20 = vsel %vm2313_vm5, %v4410_v56, %v2310_v19 }
 0x6b2   : > { %2257 = vadd.xlane.f32.xlu2 %v2233_v40  ;;  %v2465_v23 = vmul.f32 %v2314_v20, %v5548_v39 }
 0x6b3   : > { %v2318_v60 = vmul.f32 0.5, %v2317_v15  ;;  %v2180_v32 = vpop.xlane.xlu2 %2179  ;;  %v2248_v61 = vpop.xlane.xlu0 %2247 }
 0x6b4   : > { %v2202_v12 = vmul.f32 %v2180_v32, %v5118_v63  ;;  %v2276_v21 = vmul.f32 %v2248_v61, %v5118_v63  ;;  %v2481_v39 = vmul.f32 %v2465_v23, %v5641_v48 }
 0x6b5   : > { %v2319_v53 = vsub.f32 1.5, %v2318_v60 }
 0x6b6   : > { %v4414_v0 = vpop.eup %4413  ;;  %v5639_v34 = vsub.f32 %v5577_v49, %v2202_v12  ;;  %v2292_v7 = vadd.f32 1e-05, %v2276_v21  ;;  %v2497_v10 = vadd.f32 %v2481_v39, %v5651_v41 }
 0x6b7   : > { %v2320_v24 = vmul.f32 %v4412_v2, %v2319_v53  ;;  %v2326_v44 = vmul.f32 %v4414_v0, %v2291_v31  ;;  %vm2332_vm9 = vweird.f32 %v4414_v0 }
 0x6b8   : > { %4415 = vrsqrt.f32 %v2292_v7  ;;  %v2234_v54 = vmul.f32 %v5639_v34, %v5639_v34  ;;  %vm2333_vm11 = vmor %vm2331_vm10, %vm2332_vm9  ;;  %vm2341_vm13 = vweird.f32 %v2292_v7 }
 0x6b9   : > { %v2324_v26 = vsel %vm2323_vm8, %v4412_v2, %v2320_v24  ;;  %v2327_v50 = vmul.f32 %v4414_v0, %v2326_v44 }
 0x6ba   : > { %v2466_v55 = vmul.f32 %v2324_v26, %v5554_v57  ;;  %2191 = vadd.xlane.f32.xlu2 %v5644_v14  ;;  %2259 = vadd.xlane.f32.xlu0 %v2234_v54 }
 0x6bb   : > { %v2328_v56 = vmul.f32 0.5, %v2327_v50  ;;  %v2182_v46 = vpop.xlane.xlu2 %2181 }
 0x6bc   : > { %v2482_v59 = vmul.f32 %v2466_v55, %v5641_v48  ;;  %v2203_v35 = vmul.f32 %v2182_v46, %v5118_v63 }
 0x6bd   : > { %v2329_v3 = vsub.f32 1.5, %v2328_v56 }
 0x6be   : > { %v4416_v4 = vpop.eup %4415  ;;  %v2498_v13 = vadd.f32 %v2482_v59, %v5651_v41  ;;  %v5658_v47 = vsub.f32 %v5583_v18, %v2203_v35 }
 0x6bf   : > { %v2330_v57 = vmul.f32 %v4414_v0, %v2329_v3  ;;  %v2336_v8 = vmul.f32 %v4416_v4, %v2292_v7  ;;  %vm2342_vm12 = vweird.f32 %v4416_v4 }
 0x6c0   : > { %v2513_v30 = vpack.c.bf16 %v2498_v13, %v2497_v10  ;;  %v2235_v62 = vmul.f32 %v5658_v47, %v5658_v47  ;;  %vm2343_vm14 = vmor %vm2341_vm13, %vm2342_vm12 }
 0x6c1   : > { %v2337_v2 = vmul.f32 %v4416_v4, %v2336_v8  ;;  %v2334_v19 = vsel %vm2333_vm11, %v4414_v0, %v2330_v57 }
 0x6c2   : > { %2630 = vmatmul.bf16.vlgmr.msrb.gmra.mxu0 %v2513_v30  ;;  %2679 = vmatmul.bf16.vlgmr.msra.gmra.mxu1 %v2513_v30  ;;  %v2467_v15 = vmul.f32 %v2334_v19, %v5564_v5 }
 0x6c3   : > { %v2338_v58 = vmul.f32 0.5, %v2337_v2  ;;  %2261 = vadd.xlane.f32.xlu0 %v2235_v62 }
 0x6c4   : > { %v2483_v61 = vmul.f32 %v2467_v15, %v5641_v48 }
 0x6c5   : > { %v2339_v40 = vsub.f32 1.5, %v2338_v58 }
 0x6c6   : > { %v2499_v12 = vadd.f32 %v2483_v61, %v5651_v41 }
 0x6c7   : > { %v2340_v20 = vmul.f32 %v4416_v4, %v2339_v40 }
 0x6c9   : > { %v2344_v60 = vsel %vm2343_vm14, %v4416_v4, %v2340_v20 }
 0x6ca   : > { %v2468_v32 = vmul.f32 %v2344_v60, %v5574_v38 }
 0x6cc   : > { %v2484_v31 = vmul.f32 %v2468_v32, %v5641_v48 }
 0x6ce   : > { %v2500_v21 = vadd.f32 %v2484_v31, %v5651_v41 }
 0x6d0   : > { %v2514_v53 = vpack.c.bf16 %v2500_v21, %v2499_v12 }
 0x6d2   : > { %2635 = vmatmul.bf16.gmra.mxu0 %v2514_v53  ;;  %2684 = vmatmul.bf16.gmra.mxu1 %v2514_v53 }
 0x6f4   : > { %v2250_v33 = vpop.xlane.xlu0 %2249 }
 0x6f5   : > { %v2277_v5 = vmul.f32 %v2250_v33, %v5118_v63 }
 0x6f7   : > { %v2293_v0 = vadd.f32 1e-05, %v2277_v5 }
 0x6f9   : > { %4417 = vrsqrt.f32 %v2293_v0  ;;  %vm2351_vm1 = vweird.f32 %v2293_v0 }
 0x6fc   : > { %v2252_v23 = vpop.xlane.xlu1 %2251  ;;  %v2184_v7 = vpop.xlane.xlu0 %2183 }
 0x6fd   : > { %v2278_v38 = vmul.f32 %v2252_v23, %v5118_v63  ;;  %v2204_v24 = vmul.f32 %v2184_v7, %v5118_v63 }
 0x6ff   : > { %v4418_v44 = vpop.eup %4417  ;;  %v2294_v54 = vadd.f32 1e-05, %v2278_v38  ;;  %v5672_v26 = vsub.f32 %v5597_v37, %v2204_v24 }
 0x700   : > { %v2346_v50 = vmul.f32 %v4418_v44, %v2293_v0  ;;  %vm2352_vm15 = vweird.f32 %v4418_v44 }
 0x701   : > { %4419 = vrsqrt.f32 %v2294_v54  ;;  %v2236_v39 = vmul.f32 %v5672_v26, %v5672_v26  ;;  %vm2353_vm0 = vmor %vm2351_vm1, %vm2352_vm15  ;;  %vm2361_vm3 = vweird.f32 %v2294_v54 }
 0x702   : > { %v2347_v55 = vmul.f32 %v4418_v44, %v2346_v50 }
 0x703   : > { %2263 = vadd.xlane.f32.xlu1 %v2236_v39 }
 0x704   : > { %v2348_v56 = vmul.f32 0.5, %v2347_v55  ;;  %v2254_v46 = vpop.xlane.xlu1 %2253  ;;  %v2186_v59 = vpop.xlane.xlu0 %2185 }
 0x705   : > { %v2205_v35 = vmul.f32 %v2186_v59, %v5118_v63  ;;  %v2279_v8 = vmul.f32 %v2254_v46, %v5118_v63  ;;  %v4158_v46 = vld [vmem:[#allocation11 + $0x38] sm:$0xff] }
 0x706   : > { %v2349_v3 = vsub.f32 1.5, %v2348_v56  ;;  %v4166_v59 = vld [vmem:[#allocation11 + $0x78] sm:$0xff]  ;;  %3152 = vmatpush.bf16.msra.mxu2 %v4158_v46 }
 0x707   : > { %v4420_v4 = vpop.eup %4419  ;;  %v5678_v10 = vsub.f32 %v5607_v1, %v2205_v35  ;;  %v2295_v40 = vadd.f32 1e-05, %v2279_v8  ;;  %3201 = vmatpush.bf16.msra.mxu3 %v4166_v59 }
 0x708   : > { %v2350_v13 = vmul.f32 %v4418_v44, %v2349_v3  ;;  %v2356_v57 = vmul.f32 %v4420_v4, %v2294_v54  ;;  %vm2362_vm2 = vweird.f32 %v4420_v4 }
 0x709   : > { %v2237_v30 = vmul.f32 %v5678_v10, %v5678_v10  ;;  %vm2363_vm4 = vmor %vm2361_vm3, %vm2362_vm2  ;;  %4421 = vrsqrt.f32 %v2295_v40  ;;  %vm2371_vm6 = vweird.f32 %v2295_v40 }
 0x70a   : > { %v2357_v62 = vmul.f32 %v4420_v4, %v2356_v57  ;;  %v2354_v2 = vsel %vm2353_vm0, %v4418_v44, %v2350_v13  ;;  %v4157_v13 = vld [vmem:[#allocation11 + $0x30] sm:$0xff] }
 0x70b   : > { %2265 = vadd.xlane.f32.xlu2 %v2237_v30  ;;  %v2469_v60 = vmul.f32 %v2354_v2, %v5588_v43  ;;  %v4165_v57 = vld [vmem:[#allocation11 + $0x70] sm:$0xff]  ;;  %3153 = vmatpush.bf16.msra.mxu2 %v4157_v13 }
 0x70c   : > { %v2358_v19 = vmul.f32 0.5, %v2357_v62  ;;  %v2188_v58 = vpop.xlane.xlu1 %2187  ;;  %3202 = vmatpush.bf16.msra.mxu3 %v4165_v57 }
 0x70d   : > { %v2206_v15 = vmul.f32 %v2188_v58, %v5118_v63  ;;  %v2485_v53 = vmul.f32 %v2469_v60, %v5641_v48  ;;  %v4156_v58 = vld [vmem:[#allocation11 + $0x28] sm:$0xff] }
 0x70e   : > { %v2359_v20 = vsub.f32 1.5, %v2358_v19 }
 0x70f   : > { %v5686_v32 = vsub.f32 %v5613_v28, %v2206_v15  ;;  %v4422_v0 = vpop.eup %4421  ;;  %v2501_v7 = vadd.f32 %v2485_v53, %v5651_v41  ;;  %v4164_v15 = vld [vmem:[#allocation11 + $0x68] sm:$0xff]  ;;  %3154 = vmatpush.bf16.msra.mxu2 %v4156_v58 }
 0x710   : > { %v2360_v61 = vmul.f32 %v4420_v4, %v2359_v20  ;;  %v2366_v44 = vmul.f32 %v4422_v0, %v2295_v40  ;;  %vm2372_vm5 = vweird.f32 %v4422_v0  ;;  %3203 = vmatpush.bf16.msra.mxu3 %v4164_v15  ;;  %v4152_v58 = vld [vmem:[#allocation11 + $0x8] sm:$0xff] }
 0x711   : > { %v2238_v31 = vmul.f32 %v5686_v32, %v5686_v32  ;;  %vm2373_vm7 = vmor %vm2371_vm6, %vm2372_vm5  ;;  %v4160_v15 = vld [vmem:[#allocation11 + $0x48] sm:$0xff] }
 0x712   : > { %v2364_v12 = vsel %vm2363_vm4, %v4420_v4, %v2360_v61  ;;  %v2367_v54 = vmul.f32 %v4422_v0, %v2366_v44 }
 0x713   : > { %v2470_v21 = vmul.f32 %v2364_v12, %v5594_v52  ;;  %2267 = vadd.xlane.f32.xlu0 %v2238_v31 }
 0x714   : > { %v2190_v33 = vpop.xlane.xlu1 %2189  ;;  %v2368_v56 = vmul.f32 0.5, %v2367_v54 }
 0x715   : > { %v2207_v5 = vmul.f32 %v2190_v33, %v5118_v63  ;;  %v2486_v43 = vmul.f32 %v2470_v21, %v5641_v48  ;;  %v4155_v33 = vld [vmem:[#allocation11 + $0x20] sm:$0xff] }
 0x716   : > { %v2369_v35 = vsub.f32 1.5, %v2368_v56  ;;  %3155 = vmatpush.bf16.msra.mxu2 %v4155_v33  ;;  %v4151_v33 = vld [vmem:[#allocation11] sm:$0xff] }
 0x717   : > { %v5695_v23 = vsub.f32 %v5618_v51, %v2207_v5  ;;  %v2502_v38 = vadd.f32 %v2486_v43, %v5651_v41  ;;  %v4163_v5 = vld [vmem:[#allocation11 + $0x60] sm:$0xff] }
 0x718   : > { %v2370_v62 = vmul.f32 %v4422_v0, %v2369_v35  ;;  %3204 = vmatpush.bf16.msra.mxu3 %v4163_v5  ;;  %v4153_v35 = vld [vmem:[#allocation11 + $0x10] sm:$0xff]  ;;  %v4159_v5 = vld [vmem:[#allocation11 + $0x40] sm:$0xff] }
 0x719   : > { %v2515_v24 = vpack.c.bf16 %v2502_v38, %v2501_v7  ;;  %v2239_v52 = vmul.f32 %v5695_v23, %v5695_v23 }
 0x71a   : > { %v2374_v20 = vsel %vm2373_vm7, %v4422_v0, %v2370_v62  ;;  %v675_v62 = vld [vmem:[#allocation13 + $0x6] ss:$8 sm:$0x3] }
 0x71b   : > { %2640 = vmatmul.bf16.gmra.mxu0 %v2515_v24  ;;  %2689 = vmatmul.bf16.gmra.mxu1 %v2515_v24  ;;  %v2471_v40 = vmul.f32 %v2374_v20, %v5604_v27  ;;  %v5721_v20 = vperm.slane %v675_v62, 0 }
 0x71c   : > { %2269 = vadd.xlane.f32.xlu1 %v2239_v52 }
 0x71d   : > { %v2256_v50 = vpop.xlane.xlu2 %2255  ;;  %v2487_v56 = vmul.f32 %v2471_v40, %v5641_v48 }
 0x71e   : > { %v2280_v39 = vmul.f32 %v2256_v50, %v5118_v63  ;;  %v4154_v50 = vld [vmem:[#allocation11 + $0x18] sm:$0xff] }
 0x71f   : > { %3156 = vmatpush.bf16.msra.mxu2 %v4154_v50  ;;  %v2503_v13 = vadd.f32 %v2487_v56, %v5651_v41 }
 0x720   : > { %v2296_v55 = vadd.f32 1e-05, %v2280_v39  ;;  %v4162_v39 = vld [vmem:[#allocation11 + $0x58] sm:$0xff] }
 0x721   : > { %3205 = vmatpush.bf16.msra.mxu3 %v4162_v39 }
 0x722   : > { %4423 = vrsqrt.f32 %v2296_v55  ;;  %vm2381_vm9 = vweird.f32 %v2296_v55 }
 0x723   : > { %3157 = vmatpush.bf16.msra.mxu2 %v4153_v35 }
 0x725   : > { %v2258_v3 = vpop.xlane.xlu2 %2257 }
 0x726   : > { %v2281_v4 = vmul.f32 %v2258_v3, %v5118_v63  ;;  %v4161_v3 = vld [vmem:[#allocation11 + $0x50] sm:$0xff] }
 0x727   : > { %3206 = vmatpush.bf16.msra.mxu3 %v4161_v3  ;;  %3158 = vmatpush.bf16.msra.mxu2 %v4152_v58 }
 0x728   : > { %v4424_v8 = vpop.eup %4423  ;;  %v5703_v30 = vadd.f32 1e-05, %v2281_v4 }
 0x729   : > { %v2376_v2 = vmul.f32 %v4424_v8, %v2296_v55  ;;  %vm2382_vm8 = vweird.f32 %v4424_v8 }
 0x72a   : > { %4425 = vrsqrt.f32 %v5703_v30  ;;  %vm2383_vm10 = vmor %vm2381_vm9, %vm2382_vm8  ;;  %vm2391_vm12 = vweird.f32 %v5703_v30 }
 0x72b   : > { %v2377_v19 = vmul.f32 %v4424_v8, %v2376_v2  ;;  %3207 = vmatpush.bf16.msra.mxu3 %v4160_v15  ;;  %3159 = vmatpush.bf16.msra.mxu2 %v4151_v33 }
 0x72d   : > { %v2378_v60 = vmul.f32 0.5, %v2377_v19  ;;  %v2192_v61 = vpop.xlane.xlu2 %2191  ;;  %v2260_v31 = vpop.xlane.xlu0 %2259 }
 0x72e   : > { %v2208_v12 = vmul.f32 %v2192_v61, %v5118_v63  ;;  %v2282_v21 = vmul.f32 %v2260_v31, %v5118_v63 }
 0x72f   : > { %v2379_v53 = vsub.f32 1.5, %v2378_v60  ;;  %v5723_v60 = vperm.slane %v675_v62, 1  ;;  %3208 = vmatpush.bf16.msra.mxu3 %v4159_v5 }
 0x730   : > { %v4426_v43 = vpop.eup %4425  ;;  %v5710_v7 = vsub.f32 %v5644_v14, %v2208_v12  ;;  %v2298_v0 = vadd.f32 1e-05, %v2282_v21 }
 0x731   : > { %v2380_v38 = vmul.f32 %v4424_v8, %v2379_v53  ;;  %v2386_v24 = vmul.f32 %v4426_v43, %v5703_v30  ;;  %vm2392_vm11 = vweird.f32 %v4426_v43 }
 0x732   : > { %4427 = vrsqrt.f32 %v2298_v0  ;;  %v2240_v52 = vmul.f32 %v5710_v7, %v5710_v7  ;;  %vm2393_vm13 = vmor %vm2391_vm12, %vm2392_vm11  ;;  %vm2401_vm15 = vweird.f32 %v2298_v0 }
 0x733   : > { %v2384_v44 = vsel %vm2383_vm10, %v4424_v8, %v2380_v38  ;;  %v2387_v54 = vmul.f32 %v4426_v43, %v2386_v24 }
 0x734   : > { %v2472_v27 = vmul.f32 %v2384_v44, %v5624_v22  ;;  %2271 = vadd.xlane.f32.xlu2 %v2240_v52 }
 0x735   : > { %v2388_v46 = vmul.f32 0.5, %v2387_v54 }
 0x736   : > { %v2488_v55 = vmul.f32 %v2472_v27, %v5641_v48 }
 0x737   : > { %v2389_v59 = vsub.f32 1.5, %v2388_v46 }
 0x738   : > { %v4428_v4 = vpop.eup %4427  ;;  %v2504_v57 = vadd.f32 %v2488_v55, %v5651_v41 }
 0x739   : > { %v2396_v8 = vmul.f32 %v4428_v4, %v2298_v0  ;;  %v2390_v22 = vmul.f32 %v4426_v43, %v2389_v59  ;;  %vm2402_vm14 = vweird.f32 %v4428_v4 }
 0x73a   : > { %v2516_v2 = vpack.c.bf16 %v2504_v57, %v2503_v13  ;;  %vm2403_vm1 = vmor %vm2401_vm15, %vm2402_vm14 }
 0x73b   : > { %v2397_v19 = vmul.f32 %v4428_v4, %v2396_v8  ;;  %v2394_v31 = vsel %vm2393_vm13, %v4426_v43, %v2390_v22 }
 0x73c   : > { %2645 = vmatmul.bf16.gmra.mxu0 %v2516_v2  ;;  %2694 = vmatmul.bf16.gmra.mxu1 %v2516_v2  ;;  %v2473_v38 = vmul.f32 %v2394_v31, %v5631_v17 }
 0x73d   : > { %v2398_v61 = vmul.f32 0.5, %v2397_v19 }
 0x73e   : > { %v2489_v17 = vmul.f32 %v2473_v38, %v5641_v48 }
 0x73f   : > { %v2399_v12 = vsub.f32 1.5, %v2398_v61  ;;  %v2631_v21 = vpop.f32.mrf.mxu0  ;;  %v2680_v53 = vpop.f32.mrf.mxu1 }
 0x740   : > { %v5726_v40 = vadd.f32 %v2631_v21, %v5721_v20  ;;  %v5729_v30 = vadd.f32 %v2680_v53, %v5723_v60 }
 0x741   : > { %v2400_v24 = vmul.f32 %v4428_v4, %v2399_v12 }
 0x742   : > { %v2720_v43 = vmul.f32 %v5726_v40, %v5726_v40  ;;  %v2721_v52 = vmul.f32 %v5729_v30, %v5729_v30 }
 0x743   : > { %v2404_v44 = vsel %vm2403_vm1, %v4428_v4, %v2400_v24  ;;  %v2505_v4 = vadd.f32 %v2489_v17, %v5651_v41 }
 0x744   : > { %v2474_v54 = vmul.f32 %v2404_v44, %v5639_v34  ;;  %v2752_v50 = vmul.f32 %v2720_v43, %v5726_v40  ;;  %v2753_v39 = vmul.f32 %v2721_v52, %v5729_v30 }
 0x746   : > { %v2784_v27 = vmul.f32 0.044715, %v2752_v50  ;;  %v2785_v0 = vmul.f32 0.044715, %v2753_v39  ;;  %v2490_v56 = vmul.f32 %v2474_v54, %v5641_v48 }
 0x747   : > { %v2633_v46 = vpop.f32.mrf.mxu0  ;;  %v2682_v55 = vpop.f32.mrf.mxu1 }
 0x748   : > { %v2816_v59 = vadd.f32 %v2784_v27, %v5726_v40  ;;  %v2817_v35 = vadd.f32 %v2785_v0, %v5729_v30  ;;  %v2634_v3 = vadd.f32 %v2633_v46, %v5721_v20  ;;  %v5745_v34 = vadd.f32 %v2682_v55, %v5723_v60 }
 0x749   : > { %v2506_v13 = vadd.f32 %v2490_v56, %v5651_v41 }
 0x74a   : > { %v2848_v57 = vmul.f32 0.7978846, %v2816_v59  ;;  %v2722_v8 = vmul.f32 %v2634_v3, %v2634_v3  ;;  %v2849_v62 = vmul.f32 0.7978846, %v2817_v35  ;;  %v2723_v22 = vmul.f32 %v5745_v34, %v5745_v34 }
 0x74b   : > { %v2517_v2 = vpack.c.bf16 %v2506_v13, %v2505_v4 }
 0x74c   : > { %v2754_v19 = vmul.f32 %v2722_v8, %v2634_v3  ;;  %v2755_v58 = vmul.f32 %v2723_v22, %v5745_v34  ;;  %4429 = vtanh.f32 %v2848_v57 }
 0x74d   : > { %2650 = vmatmul.bf16.gmra.mxu0 %v2517_v2  ;;  %2699 = vmatmul.bf16.gmra.mxu1 %v2517_v2  ;;  %4431 = vtanh.f32 %v2849_v62 }
 0x74e   : > { %v2786_v15 = vmul.f32 0.044715, %v2754_v19  ;;  %v2787_v61 = vmul.f32 0.044715, %v2755_v58 }
 0x74f   : > { %v2636_v31 = vpop.f32.mrf.mxu0  ;;  %v2685_v12 = vpop.f32.mrf.mxu1 }
 0x750   : > { %v2818_v21 = vadd.f32 %v2786_v15, %v2634_v3  ;;  %v5753_v53 = vadd.f32 %v2636_v31, %v5721_v20  ;;  %v5756_v33 = vadd.f32 %v2685_v12, %v5723_v60  ;;  %v2819_v5 = vadd.f32 %v2787_v61, %v5745_v34 }
 0x752   : > { %v2850_v38 = vmul.f32 0.7978846, %v2818_v21  ;;  %v2724_v24 = vmul.f32 %v5753_v53, %v5753_v53  ;;  %v2725_v43 = vmul.f32 %v5756_v33, %v5756_v33  ;;  %v2851_v52 = vmul.f32 0.7978846, %v2819_v5  ;;  %v4430_v44 = vpop.eup %4429  ;;  %v2262_v21 = vpop.xlane.xlu0 %2261 }
 0x753   : > { %v4432_v39 = vpop.eup %4431  ;;  %v2912_v0 = vadd.f32 1.0, %v4430_v44 }
 0x754   : > { %4433 = vtanh.f32 %v2850_v38  ;;  %v2756_v54 = vmul.f32 %v2724_v24, %v5753_v53  ;;  %v2757_v50 = vmul.f32 %v2725_v43, %v5756_v33  ;;  %v2913_v55 = vadd.f32 1.0, %v4432_v39 }
 0x755   : > { %4435 = vtanh.f32 %v2851_v52  ;;  %v2944_v2 = vmul.f32 0.5, %v2912_v0 }
 0x756   : > { %v2788_v17 = vmul.f32 0.044715, %v2756_v54  ;;  %v2789_v27 = vmul.f32 0.044715, %v2757_v50  ;;  %v2945_v61 = vmul.f32 0.5, %v2913_v55  ;;  %v2283_v50 = vmul.f32 %v2262_v21, %v5118_v63 }
 0x757   : > { %v2638_v56 = vpop.f32.mrf.mxu0  ;;  %v2687_v46 = vpop.f32.mrf.mxu1  ;;  %v2976_v52 = vmul.f32 %v2944_v2, %v5726_v40 }
 0x758   : > { %v2820_v59 = vadd.f32 %v2788_v17, %v5753_v53  ;;  %v2821_v35 = vadd.f32 %v2789_v27, %v5756_v33  ;;  %v2639_v4 = vadd.f32 %v2638_v56, %v5721_v20  ;;  %v2688_v13 = vadd.f32 %v2687_v46, %v5723_v60 }
 0x759   : > { %v2977_v39 = vmul.f32 %v2945_v61, %v5729_v30 }
 0x75a   : > { %v4434_v57 = vpop.eup %4433  ;;  %v2852_v8 = vmul.f32 0.7978846, %v2820_v59  ;;  %v2726_v62 = vmul.f32 %v2639_v4, %v2639_v4  ;;  %v2853_v58 = vmul.f32 0.7978846, %v2821_v35  ;;  %v2727_v15 = vmul.f32 %v2688_v13, %v2688_v13 }
 0x75b   : > { %v4436_v22 = vpop.eup %4435  ;;  %v2914_v19 = vadd.f32 1.0, %v4434_v57  ;;  %v2299_v57 = vadd.f32 1e-05, %v2283_v50 }
 0x75c   : > { %v2915_v31 = vadd.f32 1.0, %v4436_v22  ;;  %v2758_v12 = vmul.f32 %v2726_v62, %v2639_v4  ;;  %v2759_v38 = vmul.f32 %v2727_v15, %v2688_v13  ;;  %4437 = vtanh.f32 %v2852_v8 }
 0x75d   : > { %v2946_v5 = vmul.f32 0.5, %v2914_v19  ;;  %4439 = vtanh.f32 %v2853_v58  ;;  %vm2411_vm2 = vweird.f32 %v2299_v57 }
 0x75e   : > { %v2947_v24 = vmul.f32 0.5, %v2915_v31  ;;  %v2790_v43 = vmul.f32 0.044715, %v2758_v12  ;;  %v2791_v54 = vmul.f32 0.044715, %v2759_v38 }
 0x75f   : > { %v2978_v44 = vmul.f32 %v2946_v5, %v2634_v3 }
 0x760   : > { %v2979_v17 = vmul.f32 %v2947_v24, %v5745_v34  ;;  %v2822_v27 = vadd.f32 %v2790_v43, %v2639_v4  ;;  %v2823_v56 = vadd.f32 %v2791_v54, %v2688_v13 }
 0x761   : > { %v3008_v0 = vpack.c.bf16 %v2978_v44, %v2976_v52 }
 0x762   : > { %v3009_v46 = vpack.c.bf16 %v2979_v17, %v2977_v39  ;;  %v2854_v55 = vmul.f32 0.7978846, %v2822_v27  ;;  %v2855_v59 = vmul.f32 0.7978846, %v2823_v56  ;;  %v4438_v35 = vpop.eup %4437 }
 0x763   : > { %3160 = vmatmul.bf16.vlgmr.msra.gmra.mxu2 %v3008_v0  ;;  %v4440_v40 = vpop.eup %4439  ;;  %v2916_v3 = vadd.f32 1.0, %v4438_v35 }
 0x764   : > { %4441 = vtanh.f32 %v2854_v55  ;;  %3209 = vmatmul.bf16.vlgmr.msra.gmra.mxu3 %v3009_v46  ;;  %v2917_v8 = vadd.f32 1.0, %v4440_v40 }
 0x765   : > { %4443 = vtanh.f32 %v2855_v59  ;;  %v2948_v34 = vmul.f32 0.5, %v2916_v3 }
 0x766   : > { %4445 = vrsqrt.f32 %v2299_v57  ;;  %v2949_v19 = vmul.f32 0.5, %v2917_v8 }
 0x767   : > { %v2980_v31 = vmul.f32 %v2948_v34, %v5753_v53 }
 0x768   : > { %v2981_v21 = vmul.f32 %v2949_v19, %v5756_v33 }
 0x76a   : > { %v4442_v62 = vpop.eup %4441 }
 0x76b   : > { %v4444_v30 = vpop.eup %4443  ;;  %v2918_v22 = vadd.f32 1.0, %v4442_v62 }
 0x76c   : > { %v2919_v2 = vadd.f32 1.0, %v4444_v30  ;;  %v4446_v15 = vpop.eup %4445 }
 0x76d   : > { %v2950_v58 = vmul.f32 0.5, %v2918_v22  ;;  %v2406_v38 = vmul.f32 %v4446_v15, %v2299_v57  ;;  %vm2412_vm0 = vweird.f32 %v4446_v15 }
 0x76e   : > { %v2951_v61 = vmul.f32 0.5, %v2919_v2  ;;  %vm2413_vm3 = vmor %vm2411_vm2, %vm2412_vm0 }
 0x76f   : > { %v2982_v12 = vmul.f32 %v2950_v58, %v2639_v4  ;;  %v2407_v52 = vmul.f32 %v4446_v15, %v2406_v38 }
 0x770   : > { %v2983_v5 = vmul.f32 %v2951_v61, %v2688_v13 }
 0x771   : > { %v3010_v24 = vpack.c.bf16 %v2982_v12, %v2980_v31  ;;  %v2408_v39 = vmul.f32 0.5, %v2407_v52 }
 0x772   : > { %v3011_v43 = vpack.c.bf16 %v2983_v5, %v2981_v21 }
 0x773   : > { %3165 = vmatmul.bf16.gmra.mxu2 %v3010_v24  ;;  %v2409_v17 = vsub.f32 1.5, %v2408_v39 }
 0x774   : > { %3214 = vmatmul.bf16.gmra.mxu3 %v3011_v43 }
 0x775   : > { %v2410_v33 = vmul.f32 %v4446_v15, %v2409_v17 }
 0x776   : > { %v2264_v44 = vpop.xlane.xlu1 %2263 }
 0x777   : > { %v2284_v54 = vmul.f32 %v2264_v44, %v5118_v63  ;;  %v2414_v46 = vsel %vm2413_vm3, %v4446_v15, %v2410_v33 }
 0x778   : > { %v2475_v8 = vmul.f32 %v2414_v46, %v5658_v47 }
 0x779   : > { %v2300_v50 = vadd.f32 1e-05, %v2284_v54 }
 0x77a   : > { %v2491_v19 = vmul.f32 %v2475_v8, %v5641_v48 }
 0x77b   : > { %4447 = vrsqrt.f32 %v2300_v50  ;;  %vm2421_vm5 = vweird.f32 %v2300_v50 }
 0x77c   : > { %v2507_v12 = vadd.f32 %v2491_v19, %v5651_v41 }
 0x77e   : > { %v2266_v27 = vpop.xlane.xlu2 %2265 }
 0x77f   : > { %v2285_v53 = vmul.f32 %v2266_v27, %v5118_v63 }
 0x781   : > { %v4448_v4 = vpop.eup %4447  ;;  %v2301_v0 = vadd.f32 1e-05, %v2285_v53 }
 0x782   : > { %v2416_v13 = vmul.f32 %v4448_v4, %v2300_v50  ;;  %vm2422_vm4 = vweird.f32 %v4448_v4 }
 0x783   : > { %4449 = vrsqrt.f32 %v2301_v0  ;;  %vm2423_vm6 = vmor %vm2421_vm5, %vm2422_vm4  ;;  %vm2431_vm8 = vweird.f32 %v2301_v0 }
 0x784   : > { %v2417_v56 = vmul.f32 %v4448_v4, %v2416_v13 }
 0x786   : > { %v2418_v55 = vmul.f32 0.5, %v2417_v56  ;;  %v2268_v59 = vpop.xlane.xlu0 %2267 }
 0x787   : > { %v2286_v35 = vmul.f32 %v2268_v59, %v5118_v63 }
 0x788   : > { %v2419_v40 = vsub.f32 1.5, %v2418_v55 }
 0x789   : > { %v4450_v3 = vpop.eup %4449  ;;  %v2302_v62 = vadd.f32 1e-05, %v2286_v35 }
 0x78a   : > { %v2420_v30 = vmul.f32 %v4448_v4, %v2419_v40  ;;  %v2426_v22 = vmul.f32 %v4450_v3, %v2301_v0  ;;  %vm2432_vm7 = vweird.f32 %v4450_v3 }
 0x78b   : > { %4451 = vrsqrt.f32 %v2302_v62  ;;  %vm2433_vm9 = vmor %vm2431_vm8, %vm2432_vm7  ;;  %vm2441_vm11 = vweird.f32 %v2302_v62 }
 0x78c   : > { %v2424_v34 = vsel %vm2423_vm6, %v4448_v4, %v2420_v30  ;;  %v2427_v57 = vmul.f32 %v4450_v3, %v2426_v22 }
 0x78d   : > { %v2476_v2 = vmul.f32 %v2424_v34, %v5672_v26 }
 0x78e   : > { %v2428_v58 = vmul.f32 0.5, %v2427_v57 }
 0x78f   : > { %v2492_v15 = vmul.f32 %v2476_v2, %v5641_v48  ;;  %v2270_v38 = vpop.xlane.xlu1 %2269 }
 0x790   : > { %v2429_v61 = vsub.f32 1.5, %v2428_v58  ;;  %v2287_v52 = vmul.f32 %v2270_v38, %v5118_v63 }
 0x791   : > { %v4452_v31 = vpop.eup %4451  ;;  %v2508_v47 = vadd.f32 %v2492_v15, %v5651_v41 }
 0x792   : > { %v2436_v21 = vmul.f32 %v4452_v31, %v2302_v62  ;;  %v2430_v5 = vmul.f32 %v4450_v3, %v2429_v61  ;;  %vm2442_vm10 = vweird.f32 %v4452_v31  ;;  %v5792_v0 = vadd.f32 1e-05, %v2287_v52 }
 0x793   : > { %v2518_v24 = vpack.c.bf16 %v2508_v47, %v2507_v12  ;;  %vm2443_vm12 = vmor %vm2441_vm11, %vm2442_vm10 }
 0x794   : > { %v2437_v43 = vmul.f32 %v4452_v31, %v2436_v21  ;;  %v2434_v44 = vsel %vm2433_vm9, %v4450_v3, %v2430_v5  ;;  %4453 = vrsqrt.f32 %v5792_v0  ;;  %vm2451_vm14 = vweird.f32 %v5792_v0 }
 0x795   : > { %2655 = vmatmul.bf16.gmra.mxu0 %v2518_v24  ;;  %2704 = vmatmul.bf16.gmra.mxu1 %v2518_v24  ;;  %v2477_v53 = vmul.f32 %v2434_v44, %v5678_v10 }
 0x796   : > { %v2438_v26 = vmul.f32 0.5, %v2437_v43 }
 0x797   : > { %v2493_v10 = vmul.f32 %v2477_v53, %v5641_v48 }
 0x798   : > { %v2439_v54 = vsub.f32 1.5, %v2438_v26  ;;  %v2641_v50 = vpop.f32.mrf.mxu0  ;;  %v2690_v39 = vpop.f32.mrf.mxu1 }
 0x799   : > { %v5786_v17 = vadd.f32 %v2641_v50, %v5721_v20  ;;  %v5789_v27 = vadd.f32 %v2690_v39, %v5723_v60  ;;  %v2509_v57 = vadd.f32 %v2493_v10, %v5651_v41 }
 0x79a   : > { %v2440_v4 = vmul.f32 %v4452_v31, %v2439_v54  ;;  %v5810_v15 = vpop.eup %4453 }
 0x79b   : > { %v2728_v33 = vmul.f32 %v5786_v17, %v5786_v17  ;;  %v2729_v13 = vmul.f32 %v5789_v27, %v5789_v27  ;;  %v2446_v5 = vmul.f32 %v5810_v15, %v5792_v0  ;;  %vm2452_vm13 = vweird.f32 %v5810_v15 }
 0x79c   : > { %v2444_v56 = vsel %vm2443_vm12, %v4452_v31, %v2440_v4  ;;  %vm2453_vm15 = vmor %vm2451_vm14, %vm2452_vm13 }
 0x79d   : > { %v2478_v46 = vmul.f32 %v2444_v56, %v5686_v32  ;;  %v2760_v55 = vmul.f32 %v2728_v33, %v5786_v17  ;;  %v2761_v59 = vmul.f32 %v2729_v13, %v5789_v27  ;;  %v2447_v54 = vmul.f32 %v5810_v15, %v2446_v5 }
 0x79f   : > { %v2792_v35 = vmul.f32 0.044715, %v2760_v55  ;;  %v2793_v40 = vmul.f32 0.044715, %v2761_v59  ;;  %v2494_v3 = vmul.f32 %v2478_v46, %v5641_v48  ;;  %v2448_v13 = vmul.f32 0.5, %v2447_v54 }
 0x7a0   : > { %v2643_v8 = vpop.f32.mrf.mxu0  ;;  %v2692_v62 = vpop.f32.mrf.mxu1 }
 0x7a1   : > { %v2824_v30 = vadd.f32 %v2792_v35, %v5786_v17  ;;  %v2825_v22 = vadd.f32 %v2793_v40, %v5789_v27  ;;  %v2644_v32 = vadd.f32 %v2643_v8, %v5721_v20  ;;  %v2693_v34 = vadd.f32 %v2692_v62, %v5723_v60 }
 0x7a2   : > { %v2510_v2 = vadd.f32 %v2494_v3, %v5651_v41  ;;  %v2449_v59 = vsub.f32 1.5, %v2448_v13 }
 0x7a3   : > { %v2856_v19 = vmul.f32 0.7978846, %v2824_v30  ;;  %v2730_v58 = vmul.f32 %v2644_v32, %v2644_v32  ;;  %v2857_v61 = vmul.f32 0.7978846, %v2825_v22  ;;  %v2731_v31 = vmul.f32 %v2693_v34, %v2693_v34 }
 0x7a4   : > { %v2519_v12 = vpack.c.bf16 %v2510_v2, %v2509_v57  ;;  %v2450_v57 = vmul.f32 %v5810_v15, %v2449_v59 }
 0x7a5   : > { %v2762_v47 = vmul.f32 %v2730_v58, %v2644_v32  ;;  %v2763_v21 = vmul.f32 %v2731_v31, %v2693_v34  ;;  %4455 = vtanh.f32 %v2856_v19 }
 0x7a6   : > { %2660 = vmatmul.bf16.gmra.mxu0 %v2519_v12  ;;  %2709 = vmatmul.bf16.gmra.mxu1 %v2519_v12  ;;  %4457 = vtanh.f32 %v2857_v61 }
 0x7a7   : > { %v2794_v38 = vmul.f32 0.044715, %v2762_v47  ;;  %v2795_v24 = vmul.f32 0.044715, %v2763_v21  ;;  %v2272_v43 = vpop.xlane.xlu2 %2271 }
 0x7a8   : > { %v2288_v52 = vmul.f32 %v2272_v43, %v5118_v63 }
 0x7a9   : > { %v2826_v26 = vadd.f32 %v2794_v38, %v2644_v32  ;;  %v2827_v44 = vadd.f32 %v2795_v24, %v2693_v34  ;;  %v2454_v24 = vsel %vm2453_vm15, %v5810_v15, %v2450_v57 }
 0x7aa   : > { %v2304_v39 = vadd.f32 1e-05, %v2288_v52 }
 0x7ab   : > { %v2858_v50 = vmul.f32 0.7978846, %v2826_v26  ;;  %v2859_v53 = vmul.f32 0.7978846, %v2827_v44  ;;  %v4456_v4 = vpop.eup %4455 }
 0x7ac   : > { %v4458_v33 = vpop.eup %4457  ;;  %v2920_v56 = vadd.f32 1.0, %v4456_v4  ;;  %vm2461_vm0 = vweird.f32 %v2304_v39 }
 0x7ad   : > { %4459 = vtanh.f32 %v2858_v50  ;;  %v2921_v46 = vadd.f32 1.0, %v4458_v33 }
 0x7ae   : > { %4461 = vtanh.f32 %v2859_v53  ;;  %v2952_v40 = vmul.f32 0.5, %v2920_v56 }
 0x7af   : > { %4463 = vrsqrt.f32 %v2304_v39  ;;  %v2953_v62 = vmul.f32 0.5, %v2921_v46 }
 0x7b0   : > { %v2984_v58 = vmul.f32 %v2952_v40, %v5786_v17 }
 0x7b1   : > { %v2985_v31 = vmul.f32 %v2953_v62, %v5789_v27 }
 0x7b3   : > { %v4460_v55 = vpop.eup %4459 }
 0x7b4   : > { %v4462_v10 = vpop.eup %4461  ;;  %v2922_v35 = vadd.f32 1.0, %v4460_v55 }
 0x7b5   : > { %v4464_v3 = vpop.eup %4463  ;;  %v2923_v8 = vadd.f32 1.0, %v4462_v10 }
 0x7b6   : > { %v2456_v30 = vmul.f32 %v4464_v3, %v2304_v39  ;;  %v2954_v22 = vmul.f32 0.5, %v2922_v35  ;;  %vm2462_vm1 = vweird.f32 %v4464_v3 }
 0x7b7   : > { %v2955_v2 = vmul.f32 0.5, %v2923_v8  ;;  %vm2463_vm2 = vmor %vm2461_vm0, %vm2462_vm1 }
 0x7b8   : > { %v2457_v19 = vmul.f32 %v4464_v3, %v2456_v30  ;;  %v2986_v61 = vmul.f32 %v2954_v22, %v2644_v32 }
 0x7b9   : > { %v2987_v12 = vmul.f32 %v2955_v2, %v2693_v34  ;;  %v2646_v21 = vpop.f32.mrf.mxu0  ;;  %v2695_v5 = vpop.f32.mrf.mxu1  ;;  %v2479_v34 = vmul.f32 %v2454_v24, %v5695_v23 }
 0x7ba   : > { %v2458_v47 = vmul.f32 0.5, %v2457_v19  ;;  %v3012_v38 = vpack.c.bf16 %v2986_v61, %v2984_v58  ;;  %v5823_v43 = vadd.f32 %v2646_v21, %v5721_v20  ;;  %v5826_v26 = vadd.f32 %v2695_v5, %v5723_v60 }
 0x7bb   : > { %v3013_v17 = vpack.c.bf16 %v2987_v12, %v2985_v31  ;;  %v2495_v56 = vmul.f32 %v2479_v34, %v5641_v48 }
 0x7bc   : > { %v2459_v32 = vsub.f32 1.5, %v2458_v47  ;;  %3170 = vmatmul.bf16.gmra.mxu2 %v3012_v38  ;;  %v2732_v27 = vmul.f32 %v5823_v43, %v5823_v43  ;;  %v2733_v0 = vmul.f32 %v5826_v26, %v5826_v26 }
 0x7bd   : > { %3219 = vmatmul.bf16.gmra.mxu3 %v3013_v17 }
 0x7be   : > { %v2460_v15 = vmul.f32 %v4464_v3, %v2459_v32  ;;  %v2764_v52 = vmul.f32 %v2732_v27, %v5823_v43  ;;  %v2765_v44 = vmul.f32 %v2733_v0, %v5826_v26 }
 0x7c0   : > { %v2464_v54 = vsel %vm2463_vm2, %v4464_v3, %v2460_v15  ;;  %v2796_v53 = vmul.f32 0.044715, %v2764_v52  ;;  %v2797_v4 = vmul.f32 0.044715, %v2765_v44  ;;  %v2511_v3 = vadd.f32 %v2495_v56, %v5651_v41 }
 0x7c1   : > { %v2480_v50 = vmul.f32 %v2464_v54, %v5710_v7  ;;  %v2648_v33 = vpop.f32.mrf.mxu0  ;;  %v2697_v13 = vpop.f32.mrf.mxu1 }
 0x7c2   : > { %v2828_v46 = vadd.f32 %v2796_v53, %v5823_v43  ;;  %v2829_v23 = vadd.f32 %v2797_v4, %v5826_v26  ;;  %v5840_v39 = vadd.f32 %v2648_v33, %v5721_v20  ;;  %v5843_v55 = vadd.f32 %v2697_v13, %v5723_v60 }
 0x7c3   : > { %v2496_v59 = vmul.f32 %v2480_v50, %v5641_v48 }
 0x7c4   : > { %v2860_v10 = vmul.f32 0.7978846, %v2828_v46  ;;  %v2734_v7 = vmul.f32 %v5840_v39, %v5840_v39  ;;  %v2735_v35 = vmul.f32 %v5843_v55, %v5843_v55  ;;  %v2861_v40 = vmul.f32 0.7978846, %v2829_v23 }
 0x7c5   : > { %v2512_v8 = vadd.f32 %v2496_v59, %v5651_v41 }
 0x7c6   : > { %v2766_v62 = vmul.f32 %v2734_v7, %v5840_v39  ;;  %v2767_v30 = vmul.f32 %v2735_v35, %v5843_v55  ;;  %4465 = vtanh.f32 %v2860_v10 }
 0x7c7   : > { %v2520_v22 = vpack.c.bf16 %v2512_v8, %v2511_v3  ;;  %4467 = vtanh.f32 %v2861_v40 }
 0x7c8   : > { %v2798_v57 = vmul.f32 0.044715, %v2766_v62  ;;  %v2799_v48 = vmul.f32 0.044715, %v2767_v30 }
 0x7c9   : > { %2665 = vmatmul.bf16.gmra.mxu0 %v2520_v22  ;;  %2714 = vmatmul.bf16.gmra.mxu1 %v2520_v22 }
 0x7ca   : > { %v2830_v2 = vadd.f32 %v2798_v57, %v5840_v39  ;;  %v2831_v19 = vadd.f32 %v2799_v48, %v5843_v55  ;;  %v2651_v58 = vpop.f32.mrf.mxu0  ;;  %v2700_v61 = vpop.f32.mrf.mxu1 }
 0x7cb   : > { %v5857_v31 = vadd.f32 %v2651_v58, %v5721_v20  ;;  %v5860_v41 = vadd.f32 %v2700_v61, %v5723_v60 }
 0x7cc   : > { %v2862_v12 = vmul.f32 0.7978846, %v2830_v2  ;;  %v2863_v47 = vmul.f32 0.7978846, %v2831_v19  ;;  %v4466_v38 = vpop.eup %4465 }
 0x7cd   : > { %v2736_v21 = vmul.f32 %v5857_v31, %v5857_v31  ;;  %v2737_v5 = vmul.f32 %v5860_v41, %v5860_v41  ;;  %v4468_v24 = vpop.eup %4467  ;;  %v2924_v34 = vadd.f32 1.0, %v4466_v38 }
 0x7ce   : > { %4469 = vtanh.f32 %v2862_v12  ;;  %v2925_v44 = vadd.f32 1.0, %v4468_v24 }
 0x7cf   : > { %4471 = vtanh.f32 %v2863_v47  ;;  %v2768_v17 = vmul.f32 %v2736_v21, %v5857_v31  ;;  %v2769_v32 = vmul.f32 %v2737_v5, %v5860_v41  ;;  %v2956_v59 = vmul.f32 0.5, %v2924_v34 }
 0x7d0   : > { %v2957_v40 = vmul.f32 0.5, %v2925_v44 }
 0x7d1   : > { %v2800_v27 = vmul.f32 0.044715, %v2768_v17  ;;  %v2801_v0 = vmul.f32 0.044715, %v2769_v32  ;;  %v2988_v48 = vmul.f32 %v2956_v59, %v5823_v43 }
 0x7d2   : > { %v2653_v15 = vpop.f32.mrf.mxu0  ;;  %v2702_v52 = vpop.f32.mrf.mxu1  ;;  %v2989_v19 = vmul.f32 %v2957_v40, %v5826_v26 }
 0x7d3   : > { %v2832_v54 = vadd.f32 %v2800_v27, %v5857_v31  ;;  %v2833_v50 = vadd.f32 %v2801_v0, %v5860_v41  ;;  %v2654_v53 = vadd.f32 %v2653_v15, %v5721_v20  ;;  %v2703_v4 = vadd.f32 %v2702_v52, %v5723_v60  ;;  %v5876_v27 = vld [vmem:[#allocation13 + $0x7] ss:$0 sm:$0xff] }
 0x7d4   : > { %v4470_v33 = vpop.eup %4469 }
 0x7d5   : > { %v4472_v13 = vpop.eup %4471  ;;  %v2864_v56 = vmul.f32 0.7978846, %v2832_v54  ;;  %v2738_v46 = vmul.f32 %v2654_v53, %v2654_v53  ;;  %v2739_v23 = vmul.f32 %v2703_v4, %v2703_v4  ;;  %v2865_v10 = vmul.f32 0.7978846, %v2833_v50 }
 0x7d6   : > { %v2926_v7 = vadd.f32 1.0, %v4470_v33  ;;  %v2927_v35 = vadd.f32 1.0, %v4472_v13 }
 0x7d7   : > { %v2770_v3 = vmul.f32 %v2738_v46, %v2654_v53  ;;  %v2771_v8 = vmul.f32 %v2739_v23, %v2703_v4  ;;  %4473 = vtanh.f32 %v2864_v56 }
 0x7d8   : > { %v2958_v62 = vmul.f32 0.5, %v2926_v7  ;;  %v2959_v30 = vmul.f32 0.5, %v2927_v35  ;;  %4475 = vtanh.f32 %v2865_v10 }
 0x7d9   : > { %v2802_v22 = vmul.f32 0.044715, %v2770_v3  ;;  %v2803_v57 = vmul.f32 0.044715, %v2771_v8 }
 0x7da   : > { %v2990_v2 = vmul.f32 %v2958_v62, %v5840_v39  ;;  %v2991_v58 = vmul.f32 %v2959_v30, %v5843_v55 }
 0x7db   : > { %v2834_v61 = vadd.f32 %v2802_v22, %v2654_v53  ;;  %v2835_v12 = vadd.f32 %v2803_v57, %v2703_v4 }
 0x7dc   : > { %v3014_v47 = vpack.c.bf16 %v2990_v2, %v2988_v48  ;;  %v3015_v21 = vpack.c.bf16 %v2991_v58, %v2989_v19 }
 0x7dd   : > { %v2866_v5 = vmul.f32 0.7978846, %v2834_v61  ;;  %v2867_v38 = vmul.f32 0.7978846, %v2835_v12  ;;  %v4474_v24 = vpop.eup %4473 }
 0x7de   : > { %3175 = vmatmul.bf16.gmra.mxu2 %v3014_v47  ;;  %3224 = vmatmul.bf16.gmra.mxu3 %v3015_v21  ;;  %v4476_v17 = vpop.eup %4475  ;;  %v2928_v43 = vadd.f32 1.0, %v4474_v24 }
 0x7df   : > { %4477 = vtanh.f32 %v2866_v5  ;;  %v2929_v32 = vadd.f32 1.0, %v4476_v17 }
 0x7e0   : > { %4479 = vtanh.f32 %v2867_v38  ;;  %v2960_v34 = vmul.f32 0.5, %v2928_v43 }
 0x7e1   : > { %v2961_v54 = vmul.f32 0.5, %v2929_v32 }
 0x7e2   : > { %v2992_v56 = vmul.f32 %v2960_v34, %v5857_v31 }
 0x7e3   : > { %v2993_v59 = vmul.f32 %v2961_v54, %v5860_v41 }
 0x7e5   : > { %v4478_v39 = vpop.eup %4477 }
 0x7e6   : > { %v4480_v26 = vpop.eup %4479  ;;  %v3161_v0 = vpop.f32.mrf.mxu2  ;;  %v2930_v55 = vadd.f32 1.0, %v4478_v39 }
 0x7e7   : > { %v3162_v15 = vadd.f32 %v3161_v0, %v5876_v27  ;;  %v3210_v52 = vpop.f32.mrf.mxu3  ;;  %v2931_v44 = vadd.f32 1.0, %v4480_v26 }
 0x7e8   : > { %v2962_v50 = vmul.f32 0.5, %v2930_v55 }
 0x7e9   : > { %v3211_v33 = vadd.f32 %v3210_v52, %v3162_v15  ;;  %v2963_v13 = vmul.f32 0.5, %v2931_v44 }
 0x7ea   : > { %v2994_v46 = vmul.f32 %v2962_v50, %v2654_v53 }
 0x7eb   : > { %v5881_v23 = vadd.f32 %v3211_v33, %v5519_v9  ;;  %v2995_v10 = vmul.f32 %v2963_v13, %v2703_v4 }
 0x7ec   : > { %v3016_v7 = vpack.c.bf16 %v2994_v46, %v2992_v56 }
 0x7ed   : > { %3266 = vadd.xlane.f32.xlu0 %v5881_v23  ;;  %v3017_v35 = vpack.c.bf16 %v2995_v10, %v2993_v59 }
 0x7ee   : > { %3180 = vmatmul.bf16.gmra.mxu2 %v3016_v7  ;;  %v3163_v40 = vpop.f32.mrf.mxu2 }
 0x7ef   : > { %3229 = vmatmul.bf16.gmra.mxu3 %v3017_v35  ;;  %v3164_v3 = vadd.f32 %v3163_v40, %v5876_v27  ;;  %v3212_v8 = vpop.f32.mrf.mxu3 }
 0x7f1   : > { %v3213_v62 = vadd.f32 %v3212_v8, %v3164_v3 }
 0x7f3   : > { %v5887_v31 = vadd.f32 %v3213_v62, %v5523_v29 }
 0x7f5   : > { %3268 = vadd.xlane.f32.xlu1 %v5887_v31 }
 0x7f6   : > { %v3166_v9 = vpop.f32.mrf.mxu2 }
 0x7f7   : > { %v3167_v41 = vadd.f32 %v3166_v9, %v5876_v27  ;;  %v3215_v53 = vpop.f32.mrf.mxu3 }
 0x7f9   : > { %v3216_v4 = vadd.f32 %v3215_v53, %v3167_v41 }
 0x7fb   : > { %v5892_v30 = vadd.f32 %v3216_v4, %v5527_v16 }
 0x7fd   : > { %3270 = vadd.xlane.f32.xlu2 %v5892_v30 }
 0x7fe   : > { %v3168_v22 = vpop.f32.mrf.mxu2 }
 0x7ff   : > { %v3169_v57 = vadd.f32 %v3168_v22, %v5876_v27  ;;  %v3217_v48 = vpop.f32.mrf.mxu3 }
 0x801   : > { %v3218_v2 = vadd.f32 %v3217_v48, %v3169_v57 }
 0x803   : > { %v5897_v29 = vadd.f32 %v3218_v2, %v5531_v42 }
 0x805   : > { %3272 = vadd.xlane.f32.xlu0 %v5897_v29 }
 0x812   : > { %v2656_v19 = vpop.f32.mrf.mxu0  ;;  %v2705_v58 = vpop.f32.mrf.mxu1 }
 0x813   : > { %v5901_v61 = vadd.f32 %v2656_v19, %v5721_v20  ;;  %v5904_v16 = vadd.f32 %v2705_v58, %v5723_v60 }
 0x815   : > { %v2740_v12 = vmul.f32 %v5901_v61, %v5901_v61  ;;  %v2741_v47 = vmul.f32 %v5904_v16, %v5904_v16 }
 0x817   : > { %v2772_v21 = vmul.f32 %v2740_v12, %v5901_v61  ;;  %v2773_v42 = vmul.f32 %v2741_v47, %v5904_v16 }
 0x819   : > { %v2804_v5 = vmul.f32 0.044715, %v2772_v21  ;;  %v2805_v38 = vmul.f32 0.044715, %v2773_v42 }
 0x81a   : > { %v2658_v24 = vpop.f32.mrf.mxu0  ;;  %v2707_v17 = vpop.f32.mrf.mxu1 }
 0x81b   : > { %v2836_v43 = vadd.f32 %v2804_v5, %v5901_v61  ;;  %v2837_v32 = vadd.f32 %v2805_v38, %v5904_v16  ;;  %v2659_v39 = vadd.f32 %v2658_v24, %v5721_v20  ;;  %v2708_v26 = vadd.f32 %v2707_v17, %v5723_v60 }
 0x81d   : > { %v2868_v0 = vmul.f32 0.7978846, %v2836_v43  ;;  %v2742_v55 = vmul.f32 %v2659_v39, %v2659_v39  ;;  %v2743_v34 = vmul.f32 %v2708_v26, %v2708_v26  ;;  %v2869_v15 = vmul.f32 0.7978846, %v2837_v32 }
 0x81f   : > { %v2774_v52 = vmul.f32 %v2742_v55, %v2659_v39  ;;  %v2775_v44 = vmul.f32 %v2743_v34, %v2708_v26  ;;  %4481 = vtanh.f32 %v2868_v0 }
 0x820   : > { %4483 = vtanh.f32 %v2869_v15 }
 0x821   : > { %v2806_v54 = vmul.f32 0.044715, %v2774_v52  ;;  %v2807_v50 = vmul.f32 0.044715, %v2775_v44 }
 0x823   : > { %v2838_v33 = vadd.f32 %v2806_v54, %v2659_v39  ;;  %v2839_v13 = vadd.f32 %v2807_v50, %v2708_v26  ;;  %v2661_v56 = vpop.f32.mrf.mxu0  ;;  %v2710_v46 = vpop.f32.mrf.mxu1 }
 0x824   : > { %v5917_v59 = vadd.f32 %v2661_v56, %v5721_v20  ;;  %v5920_v10 = vadd.f32 %v2710_v46, %v5723_v60 }
 0x825   : > { %v2870_v7 = vmul.f32 0.7978846, %v2838_v33  ;;  %v2871_v35 = vmul.f32 0.7978846, %v2839_v13  ;;  %v4482_v8 = vpop.eup %4481 }
 0x826   : > { %v2744_v40 = vmul.f32 %v5917_v59, %v5917_v59  ;;  %v2745_v3 = vmul.f32 %v5920_v10, %v5920_v10  ;;  %v4484_v62 = vpop.eup %4483  ;;  %v2932_v22 = vadd.f32 1.0, %v4482_v8 }
 0x827   : > { %4485 = vtanh.f32 %v2870_v7  ;;  %v2933_v2 = vadd.f32 1.0, %v4484_v62 }
 0x828   : > { %4487 = vtanh.f32 %v2871_v35  ;;  %v2776_v9 = vmul.f32 %v2744_v40, %v5917_v59  ;;  %v2777_v41 = vmul.f32 %v2745_v3, %v5920_v10  ;;  %v2964_v17 = vmul.f32 0.5, %v2932_v22 }
 0x829   : > { %v2965_v55 = vmul.f32 0.5, %v2933_v2 }
 0x82a   : > { %v2808_v53 = vmul.f32 0.044715, %v2776_v9  ;;  %v2809_v4 = vmul.f32 0.044715, %v2777_v41  ;;  %v2996_v33 = vmul.f32 %v2964_v17, %v5901_v61 }
 0x82b   : > { %v2663_v57 = vpop.f32.mrf.mxu0  ;;  %v2712_v48 = vpop.f32.mrf.mxu1  ;;  %v2997_v56 = vmul.f32 %v2965_v55, %v5904_v16 }
 0x82c   : > { %v2840_v19 = vadd.f32 %v2808_v53, %v5917_v59  ;;  %v2841_v58 = vadd.f32 %v2809_v4, %v5920_v10  ;;  %v2664_v12 = vadd.f32 %v2663_v57, %v5721_v20  ;;  %v2713_v47 = vadd.f32 %v2712_v48, %v5723_v60 }
 0x82d   : > { %v4486_v21 = vpop.eup %4485 }
 0x82e   : > { %v4488_v42 = vpop.eup %4487  ;;  %v2872_v5 = vmul.f32 0.7978846, %v2840_v19  ;;  %v2746_v38 = vmul.f32 %v2664_v12, %v2664_v12  ;;  %v2747_v24 = vmul.f32 %v2713_v47, %v2713_v47  ;;  %v2873_v43 = vmul.f32 0.7978846, %v2841_v58 }
 0x82f   : > { %v2934_v32 = vadd.f32 1.0, %v4486_v21  ;;  %v2935_v0 = vadd.f32 1.0, %v4488_v42 }
 0x830   : > { %v2778_v34 = vmul.f32 %v2746_v38, %v2664_v12  ;;  %v2779_v15 = vmul.f32 %v2747_v24, %v2713_v47  ;;  %4489 = vtanh.f32 %v2872_v5 }
 0x831   : > { %v2966_v52 = vmul.f32 0.5, %v2934_v32  ;;  %v2967_v44 = vmul.f32 0.5, %v2935_v0  ;;  %4491 = vtanh.f32 %v2873_v43 }
 0x832   : > { %v2810_v54 = vmul.f32 0.044715, %v2778_v34  ;;  %v2811_v50 = vmul.f32 0.044715, %v2779_v15 }
 0x833   : > { %v2998_v13 = vmul.f32 %v2966_v52, %v2659_v39  ;;  %v2999_v46 = vmul.f32 %v2967_v44, %v2708_v26 }
 0x834   : > { %v2842_v7 = vadd.f32 %v2810_v54, %v2664_v12  ;;  %v2843_v35 = vadd.f32 %v2811_v50, %v2713_v47 }
 0x835   : > { %v3018_v40 = vpack.c.bf16 %v2998_v13, %v2996_v33  ;;  %v3019_v3 = vpack.c.bf16 %v2999_v46, %v2997_v56 }
 0x836   : > { %v2874_v8 = vmul.f32 0.7978846, %v2842_v7  ;;  %v2875_v62 = vmul.f32 0.7978846, %v2843_v35  ;;  %v4490_v9 = vpop.eup %4489 }
 0x837   : > { %3185 = vmatmul.bf16.gmra.mxu2 %v3018_v40  ;;  %3234 = vmatmul.bf16.gmra.mxu3 %v3019_v3  ;;  %v4492_v41 = vpop.eup %4491  ;;  %v2936_v53 = vadd.f32 1.0, %v4490_v9 }
 0x838   : > { %4493 = vtanh.f32 %v2874_v8  ;;  %v2937_v4 = vadd.f32 1.0, %v4492_v41 }
 0x839   : > { %4495 = vtanh.f32 %v2875_v62  ;;  %v2968_v16 = vmul.f32 0.5, %v2936_v53 }
 0x83a   : > { %v2969_v19 = vmul.f32 0.5, %v2937_v4 }
 0x83b   : > { %v3000_v5 = vmul.f32 %v2968_v16, %v5917_v59 }
 0x83c   : > { %v3001_v17 = vmul.f32 %v2969_v19, %v5920_v10 }
 0x83e   : > { %v4494_v61 = vpop.eup %4493 }
 0x83f   : > { %v4496_v22 = vpop.eup %4495  ;;  %v3171_v39 = vpop.f32.mrf.mxu2  ;;  %v2938_v57 = vadd.f32 1.0, %v4494_v61 }
 0x840   : > { %v3172_v26 = vadd.f32 %v3171_v39, %v5876_v27  ;;  %v3220_v48 = vpop.f32.mrf.mxu3  ;;  %v2939_v2 = vadd.f32 1.0, %v4496_v22 }
 0x841   : > { %v2970_v58 = vmul.f32 0.5, %v2938_v57 }
 0x842   : > { %v3221_v21 = vadd.f32 %v3220_v48, %v3172_v26  ;;  %v2971_v42 = vmul.f32 0.5, %v2939_v2 }
 0x843   : > { %v3002_v38 = vmul.f32 %v2970_v58, %v2664_v12 }
 0x844   : > { %v5937_v24 = vadd.f32 %v3221_v21, %v5535_v45  ;;  %v3003_v43 = vmul.f32 %v2971_v42, %v2713_v47 }
 0x845   : > { %v3020_v32 = vpack.c.bf16 %v3002_v38, %v3000_v5 }
 0x846   : > { %3274 = vadd.xlane.f32.xlu1 %v5937_v24  ;;  %v3021_v0 = vpack.c.bf16 %v3003_v43, %v3001_v17  ;;  %v2666_v55 = vpop.f32.mrf.mxu0  ;;  %v2715_v34 = vpop.f32.mrf.mxu1 }
 0x847   : > { %3190 = vmatmul.bf16.gmra.mxu2 %v3020_v32  ;;  %v2667_v15 = vadd.f32 %v2666_v55, %v5721_v20  ;;  %v2716_v52 = vadd.f32 %v2715_v34, %v5723_v60  ;;  %v3173_v59 = vpop.f32.mrf.mxu2 }
 0x848   : > { %3239 = vmatmul.bf16.gmra.mxu3 %v3021_v0  ;;  %v3174_v12 = vadd.f32 %v3173_v59, %v5876_v27  ;;  %v3222_v54 = vpop.f32.mrf.mxu3 }
 0x849   : > { %v2748_v45 = vmul.f32 %v2667_v15, %v2667_v15  ;;  %v2749_v44 = vmul.f32 %v2716_v52, %v2716_v52 }
 0x84a   : > { %v3223_v10 = vadd.f32 %v3222_v54, %v3174_v12 }
 0x84b   : > { %v2780_v47 = vmul.f32 %v2748_v45, %v2667_v15  ;;  %v2781_v50 = vmul.f32 %v2749_v44, %v2716_v52 }
 0x84c   : > { %v5945_v33 = vadd.f32 %v3223_v10, %v5539_v25 }
 0x84d   : > { %v2812_v13 = vmul.f32 0.044715, %v2780_v47  ;;  %v2813_v56 = vmul.f32 0.044715, %v2781_v50 }
 0x84e   : > { %v2668_v46 = vpop.f32.mrf.mxu0  ;;  %v2717_v7 = vpop.f32.mrf.mxu1  ;;  %3276 = vadd.xlane.f32.xlu2 %v5945_v33 }
 0x84f   : > { %v2844_v35 = vadd.f32 %v2812_v13, %v2667_v15  ;;  %v2845_v40 = vadd.f32 %v2813_v56, %v2716_v52  ;;  %v2669_v3 = vadd.f32 %v2668_v46, %v5721_v20  ;;  %v2718_v8 = vadd.f32 %v2717_v7, %v5723_v60 }
 0x851   : > { %v2876_v62 = vmul.f32 0.7978846, %v2844_v35  ;;  %v2750_v9 = vmul.f32 %v2669_v3, %v2669_v3  ;;  %v2751_v41 = vmul.f32 %v2718_v8, %v2718_v8  ;;  %v2877_v53 = vmul.f32 0.7978846, %v2845_v40 }
 0x853   : > { %v2782_v4 = vmul.f32 %v2750_v9, %v2669_v3  ;;  %v2783_v61 = vmul.f32 %v2751_v41, %v2718_v8  ;;  %4497 = vtanh.f32 %v2876_v62 }
 0x854   : > { %4499 = vtanh.f32 %v2877_v53 }
 0x855   : > { %v2814_v25 = vmul.f32 0.044715, %v2782_v4  ;;  %v2815_v22 = vmul.f32 0.044715, %v2783_v61 }
 0x857   : > { %v2846_v39 = vadd.f32 %v2814_v25, %v2669_v3  ;;  %v2847_v57 = vadd.f32 %v2815_v22, %v2718_v8 }
 0x859   : > { %v2878_v16 = vmul.f32 0.7978846, %v2846_v39  ;;  %v2879_v26 = vmul.f32 0.7978846, %v2847_v57  ;;  %v4498_v48 = vpop.eup %4497 }
 0x85a   : > { %v4500_v2 = vpop.eup %4499  ;;  %v2940_v20 = vadd.f32 1.0, %v4498_v48 }
 0x85b   : > { %4501 = vtanh.f32 %v2878_v16  ;;  %v2941_v60 = vadd.f32 1.0, %v4500_v2 }
 0x85c   : > { %4503 = vtanh.f32 %v2879_v26  ;;  %v2972_v17 = vmul.f32 0.5, %v2940_v20 }
 0x85d   : > { %v2973_v32 = vmul.f32 0.5, %v2941_v60 }
 0x85e   : > { %v3004_v12 = vmul.f32 %v2972_v17, %v2667_v15 }
 0x85f   : > { %v3005_v44 = vmul.f32 %v2973_v32, %v2716_v52 }
 0x861   : > { %v4502_v19 = vpop.eup %4501  ;;  %v3176_v58 = vpop.f32.mrf.mxu2 }
 0x862   : > { %v3225_v21 = vpop.f32.mrf.mxu3  ;;  %v4504_v42 = vpop.eup %4503  ;;  %v3177_v5 = vadd.f32 %v3176_v58, %v5876_v27  ;;  %v2942_v38 = vadd.f32 1.0, %v4502_v19 }
 0x863   : > { %v2943_v43 = vadd.f32 1.0, %v4504_v42  ;;  %v3267_v19 = vpop.xlane.xlu0 %3266 }
 0x864   : > { %v3226_v0 = vadd.f32 %v3225_v21, %v3177_v5  ;;  %v2974_v55 = vmul.f32 0.5, %v2942_v38 }
 0x865   : > { %v2975_v34 = vmul.f32 0.5, %v2943_v43 }
 0x866   : > { %v5952_v59 = vadd.f32 %v3226_v0, %v5543_v11  ;;  %v3006_v45 = vmul.f32 %v2974_v55, %v2669_v3 }
 0x867   : > { %v3007_v54 = vmul.f32 %v2975_v34, %v2718_v8 }
 0x868   : > { %3278 = vadd.xlane.f32.xlu0 %v5952_v59  ;;  %v3022_v10 = vpack.c.bf16 %v3006_v45, %v3004_v12 }
 0x869   : > { %v3023_v47 = vpack.c.bf16 %v3007_v54, %v3005_v44  ;;  %v3178_v50 = vpop.f32.mrf.mxu2  ;;  %v3269_v44 = vpop.xlane.xlu1 %3268 }
 0x86a   : > { %v3227_v13 = vpop.f32.mrf.mxu3  ;;  %3195 = vmatmul.bf16.gmra.mxu2 %v3022_v10  ;;  %v3179_v56 = vadd.f32 %v3178_v50, %v5876_v27  ;;  %v3299_v54 = vmul.f32 %v3269_v44, %v5118_v63 }
 0x86b   : > { %3244 = vmatmul.bf16.gmra.mxu3 %v3023_v47 }
 0x86c   : > { %v3228_v46 = vadd.f32 %v3227_v13, %v3179_v56  ;;  %v6013_v13 = vsub.f32 %v5887_v31, %v3299_v54 }
 0x86e   : > { %v5957_v7 = vadd.f32 %v3228_v46, %v5557_v36 }
 0x870   : > { %3280 = vadd.xlane.f32.xlu1 %v5957_v7  ;;  %v3271_v56 = vpop.xlane.xlu2 %3270 }
 0x871   : > { %v3181_v11 = vpop.f32.mrf.mxu2 }
 0x872   : > { %v3182_v15 = vadd.f32 %v3181_v11, %v5876_v27  ;;  %v3230_v52 = vpop.f32.mrf.mxu3 }
 0x874   : > { %v3231_v35 = vadd.f32 %v3230_v52, %v3182_v15 }
 0x876   : > { %v5962_v40 = vadd.f32 %v3231_v35, %v5567_v6 }
 0x878   : > { %3282 = vadd.xlane.f32.xlu2 %v5962_v40 }
 0x879   : > { %v3183_v3 = vpop.f32.mrf.mxu2 }
 0x87a   : > { %v3184_v8 = vadd.f32 %v3183_v3, %v5876_v27  ;;  %v3232_v62 = vpop.f32.mrf.mxu3  ;;  %v3300_v3 = vmul.f32 %v3271_v56, %v5118_v63 }
 0x87c   : > { %v3233_v9 = vadd.f32 %v3232_v62, %v3184_v8  ;;  %v3331_v62 = vmul.f32 %v6013_v13, %v6013_v13 }
 0x87e   : > { %v3259_v36 = vadd.f32 %v3233_v9, %v5577_v49 }
 0x880   : > { %3284 = vadd.xlane.f32.xlu0 %v3259_v36 }
 0x8b9   : > { %v3275_v15 = vpop.xlane.xlu1 %3274 }
 0x8ba   : > { %v3186_v41 = vpop.f32.mrf.mxu2  ;;  %v3235_v53 = vpop.f32.mrf.mxu3  ;;  %v3302_v8 = vmul.f32 %v3275_v15, %v5118_v63 }
 0x8bb   : > { %v3187_v4 = vadd.f32 %v3186_v41, %v5876_v27 }
 0x8bc   : > { %v6032_v9 = vsub.f32 %v5937_v24, %v3302_v8 }
 0x8bd   : > { %v3236_v61 = vadd.f32 %v3235_v53, %v3187_v4 }
 0x8bf   : > { %v5969_v25 = vadd.f32 %v3236_v61, %v5583_v18 }
 0x8c1   : > { %3286 = vadd.xlane.f32.xlu1 %v5969_v25 }
 0x8c2   : > { %v3188_v6 = vpop.f32.mrf.mxu2  ;;  %v3237_v39 = vpop.f32.mrf.mxu3 }
 0x8c3   : > { %v3189_v22 = vadd.f32 %v3188_v6, %v5876_v27 }
 0x8c5   : > { %v3238_v57 = vadd.f32 %v3237_v39, %v3189_v22 }
 0x8c7   : > { %v5974_v16 = vadd.f32 %v3238_v57, %v5597_v37  ;;  %v3298_v37 = vmul.f32 %v3267_v19, %v5118_v63 }
 0x8c9   : > { %3288 = vadd.xlane.f32.xlu2 %v5974_v16  ;;  %v5989_v5 = vsub.f32 %v5881_v23, %v3298_v37 }
 0x8ca   : > { %v3191_v49 = vpop.f32.mrf.mxu2 }
 0x8cb   : > { %v3192_v26 = vadd.f32 %v3191_v49, %v5876_v27  ;;  %v3240_v48 = vpop.f32.mrf.mxu3  ;;  %v3330_v17 = vmul.f32 %v5989_v5, %v5989_v5 }
 0x8cd   : > { %v3241_v2 = vadd.f32 %v3240_v48, %v3192_v26 }
 0x8cf   : > { %v5979_v18 = vadd.f32 %v3241_v2, %v5607_v1  ;;  %v3273_v1 = vpop.xlane.xlu0 %3272 }
 0x8d0   : > { %v3301_v38 = vmul.f32 %v3273_v1, %v5118_v63 }
 0x8d1   : > { %3290 = vadd.xlane.f32.xlu0 %v5979_v18 }
 0x8d2   : > { %v3193_v20 = vpop.f32.mrf.mxu2  ;;  %v5995_v43 = vsub.f32 %v5897_v29, %v3301_v38 }
 0x8d3   : > { %v3194_v60 = vadd.f32 %v3193_v20, %v5876_v27  ;;  %v3242_v58 = vpop.f32.mrf.mxu3 }
 0x8d5   : > { %v3243_v21 = vadd.f32 %v3242_v58, %v3194_v60 }
 0x8d7   : > { %v5985_v42 = vadd.f32 %v3243_v21, %v5613_v28  ;;  %v3333_v28 = vmul.f32 %v5995_v43, %v5995_v43 }
 0x8d9   : > { %3292 = vadd.xlane.f32.xlu1 %v5985_v42 }
 0x8db   : > { %v3279_v32 = vpop.xlane.xlu0 %3278 }
 0x8dc   : > { %v3304_v0 = vmul.f32 %v3279_v32, %v5118_v63 }
 0x8de   : > { %v6001_v23 = vsub.f32 %v5952_v59, %v3304_v0 }
 0x8e0   : > { %v3336_v45 = vmul.f32 %v6001_v23, %v6001_v23 }
 0x8e1   : > { %3346 = vadd.xlane.f32.xlu1 %v3330_v17 }
 0x8e3   : > { %v3281_v41 = vpop.xlane.xlu1 %3280 }
 0x8e4   : > { %v3305_v4 = vmul.f32 %v3281_v41, %v5118_v63 }
 0x8e6   : > { %v6044_v24 = vsub.f32 %v5957_v7, %v3305_v4 }
 0x8e8   : > { %v3337_v39 = vmul.f32 %v6044_v24, %v6044_v24 }
 0x8e9   : > { %3352 = vadd.xlane.f32.xlu1 %v3333_v28 }
 0x8ed   : > { %v3196_v55 = vpop.f32.mrf.mxu2 }
 0x8ee   : > { %v3197_v34 = vadd.f32 %v3196_v55, %v5876_v27  ;;  %v3245_v12 = vpop.f32.mrf.mxu3 }
 0x8f0   : > { %v3246_v29 = vadd.f32 %v3245_v12, %v3197_v34 }
 0x8f1   : > { %3358 = vadd.xlane.f32.xlu1 %v3336_v45 }
 0x8f2   : > { %v6008_v10 = vadd.f32 %v3246_v29, %v5618_v51 }
 0x8f3   : > { %v3285_v47 = vpop.xlane.xlu0 %3284 }
 0x8f4   : > { %3294 = vadd.xlane.f32.xlu2 %v6008_v10  ;;  %v3307_v59 = vmul.f32 %v3285_v47, %v5118_v63 }
 0x8f5   : > { %v3198_v50 = vpop.f32.mrf.mxu2 }
 0x8f6   : > { %v3199_v46 = vadd.f32 %v3198_v50, %v5876_v27  ;;  %v6016_v11 = vsub.f32 %v3259_v36, %v3307_v59  ;;  %v3247_v52 = vpop.f32.mrf.mxu3  ;;  %v6029_v27 = vsub.f32 %v5892_v30, %v3300_v3  ;;  %v3277_v36 = vpop.xlane.xlu2 %3276 }
 0x8f7   : > { %v3303_v53 = vmul.f32 %v3277_v36, %v5118_v63  ;;  %v6091_v36 = vld [vmem:[#allocation13 + $0x5] ss:$0 sm:$0xff] }
 0x8f8   : > { %v3248_v35 = vadd.f32 %v3247_v52, %v3199_v46  ;;  %v3339_v51 = vmul.f32 %v6016_v11, %v6016_v11  ;;  %v3332_v61 = vmul.f32 %v6029_v27, %v6029_v27 }
 0x8f9   : > { %v6041_v30 = vsub.f32 %v5945_v33, %v3303_v53 }
 0x8fa   : > { %v6025_v31 = vadd.f32 %v3248_v35, %v5644_v14  ;;  %3364 = vadd.xlane.f32.xlu1 %v3339_v51  ;;  %v3334_v14 = vmul.f32 %v6032_v9, %v6032_v9  ;;  %v6084_v35 = vld [vmem:[#allocation13 + $0x4] ss:$0 sm:$0xff] }
 0x8fb   : > { %v3335_v57 = vmul.f32 %v6041_v30, %v6041_v30 }
 0x8fc   : > { %3348 = vadd.xlane.f32.xlu2 %v3331_v62  ;;  %3296 = vadd.xlane.f32.xlu0 %v6025_v31 }
 0x8fe   : > { %v3283_v6 = vpop.xlane.xlu2 %3282 }
 0x8ff   : > { %v3306_v22 = vmul.f32 %v3283_v6, %v5118_v63 }
 0x901   : > { %v6052_v49 = vsub.f32 %v5962_v40, %v3306_v22 }
 0x903   : > { %v3338_v33 = vmul.f32 %v6052_v49, %v6052_v49 }
 0x904   : > { %3354 = vadd.xlane.f32.xlu2 %v3334_v14  ;;  %3350 = vadd.xlane.f32.xlu0 %v3332_v61 }
 0x90c   : > { %3360 = vadd.xlane.f32.xlu2 %v3337_v39  ;;  %3356 = vadd.xlane.f32.xlu0 %v3335_v57 }
 0x914   : > { %3362 = vadd.xlane.f32.xlu0 %v3338_v33 }
 0x934   : > { %v3287_v7 = vpop.xlane.xlu1 %3286 }
 0x935   : > { %v3308_v26 = vmul.f32 %v3287_v7, %v5118_v63 }
 0x937   : > { %v6058_v48 = vsub.f32 %v5969_v25, %v3308_v26 }
 0x939   : > { %v3340_v2 = vmul.f32 %v6058_v48, %v6058_v48 }
 0x93b   : > { %3366 = vadd.xlane.f32.xlu2 %v3340_v2 }
 0x93c   : > { %v3289_v20 = vpop.xlane.xlu2 %3288 }
 0x93d   : > { %v3309_v60 = vmul.f32 %v3289_v20, %v5118_v63 }
 0x93f   : > { %v6064_v40 = vsub.f32 %v5974_v16, %v3309_v60 }
 0x941   : > { %v3341_v19 = vmul.f32 %v6064_v40, %v6064_v40 }
 0x943   : > { %3368 = vadd.xlane.f32.xlu0 %v3341_v19 }
 0x944   : > { %v3291_v58 = vpop.xlane.xlu0 %3290 }
 0x945   : > { %v3310_v21 = vmul.f32 %v3291_v58, %v5118_v63 }
 0x947   : > { %v6070_v25 = vsub.f32 %v5979_v18, %v3310_v21 }
 0x949   : > { %v3342_v37 = vmul.f32 %v6070_v25, %v6070_v25 }
 0x94b   : > { %3370 = vadd.xlane.f32.xlu1 %v3342_v37 }
 0x94c   : > { %v3293_v1 = vpop.xlane.xlu1 %3292 }
 0x94d   : > { %v3311_v38 = vmul.f32 %v3293_v1, %v5118_v63 }
 0x94f   : > { %v6076_v16 = vsub.f32 %v5985_v42, %v3311_v38 }
 0x951   : > { %v3343_v17 = vmul.f32 %v6076_v16, %v6076_v16 }
 0x953   : > { %3372 = vadd.xlane.f32.xlu2 %v3343_v17 }
 0x954   : > { %v3347_v32 = vpop.xlane.xlu1 %3346 }
 0x955   : > { %v3378_v0 = vmul.f32 %v3347_v32, %v5118_v63 }
 0x957   : > { %v3394_v28 = vadd.f32 1e-05, %v3378_v0 }
 0x959   : > { %4505 = vrsqrt.f32 %v3394_v28  ;;  %vm3416_vm4 = vweird.f32 %v3394_v28 }
 0x95c   : > { %v3353_v18 = vpop.xlane.xlu1 %3352 }
 0x95d   : > { %v3381_v55 = vmul.f32 %v3353_v18, %v5118_v63 }
 0x95f   : > { %v4506_v34 = vpop.eup %4505  ;;  %v3397_v12 = vadd.f32 1e-05, %v3381_v55 }
 0x960   : > { %v3411_v45 = vmul.f32 %v4506_v34, %v3394_v28  ;;  %vm3417_vm3 = vweird.f32 %v4506_v34 }
 0x961   : > { %4507 = vrsqrt.f32 %v3397_v12  ;;  %vm3418_vm5 = vmor %vm3416_vm4, %vm3417_vm3  ;;  %vm3446_vm7 = vweird.f32 %v3397_v12 }
 0x962   : > { %v3412_v44 = vmul.f32 %v4506_v34, %v3411_v45 }
 0x964   : > { %v3413_v29 = vmul.f32 0.5, %v3412_v44  ;;  %v3359_v42 = vpop.xlane.xlu1 %3358 }
 0x965   : > { %v3384_v54 = vmul.f32 %v3359_v42, %v5118_v63 }
 0x966   : > { %v3414_v47 = vsub.f32 1.5, %v3413_v29 }
 0x967   : > { %v4508_v59 = vpop.eup %4507  ;;  %v3400_v50 = vadd.f32 1e-05, %v3384_v54  ;;  %v3295_v15 = vpop.xlane.xlu2 %3294 }
 0x968   : > { %v3415_v56 = vmul.f32 %v4506_v34, %v3414_v47  ;;  %v3441_v46 = vmul.f32 %v4508_v59, %v3397_v12  ;;  %v3312_v52 = vmul.f32 %v3295_v15, %v5118_v63  ;;  %vm3447_vm6 = vweird.f32 %v4508_v59 }
 0x969   : > { %4509 = vrsqrt.f32 %v3400_v50  ;;  %vm3448_vm8 = vmor %vm3446_vm7, %vm3447_vm6  ;;  %vm3476_vm10 = vweird.f32 %v3400_v50 }
 0x96a   : > { %v3419_v51 = vsel %vm3418_vm5, %v4506_v34, %v3415_v56  ;;  %v3442_v3 = vmul.f32 %v4508_v59, %v3441_v46  ;;  %v6089_v62 = vsub.f32 %v6008_v10, %v3312_v52 }
 0x96b   : > { %v3570_v8 = vmul.f32 %v3419_v51, %v5989_v5 }
 0x96c   : > { %v3443_v41 = vmul.f32 0.5, %v3442_v3  ;;  %v3344_v4 = vmul.f32 %v6089_v62, %v6089_v62 }
 0x96d   : > { %v3586_v53 = vmul.f32 %v3570_v8, %v6084_v35  ;;  %v3365_v61 = vpop.xlane.xlu1 %3364 }
 0x96e   : > { %v3444_v14 = vsub.f32 1.5, %v3443_v41  ;;  %3374 = vadd.xlane.f32.xlu0 %v3344_v4  ;;  %v3387_v5 = vmul.f32 %v3365_v61, %v5118_v63 }
 0x96f   : > { %v4510_v6 = vpop.eup %4509  ;;  %v3602_v22 = vadd.f32 %v3586_v53, %v6091_v36  ;;  %v3349_v57 = vpop.xlane.xlu2 %3348 }
 0x970   : > { %v3445_v39 = vmul.f32 %v4508_v59, %v3444_v14  ;;  %v3471_v10 = vmul.f32 %v4510_v6, %v3400_v50  ;;  %v3297_v33 = vpop.xlane.xlu0 %3296  ;;  %v3379_v7 = vmul.f32 %v3349_v57, %v5118_v63  ;;  %v3403_v26 = vadd.f32 1e-05, %v3387_v5 }
 0x971   : > { %3618 = vst [vmem:[%s6098_s2] sm:$0xff] %v3602_v22  ;;  %v3313_v2 = vmul.f32 %v3297_v33, %v5118_v63  ;;  %vm3477_vm9 = vweird.f32 %v4510_v6 }
 0x972   : > { %v3449_v20 = vsel %vm3448_vm8, %v4508_v59, %v3445_v39  ;;  %v3472_v60 = vmul.f32 %v4510_v6, %v3471_v10  ;;  %v3395_v58 = vadd.f32 1e-05, %v3379_v7  ;;  %4511 = vrsqrt.f32 %v3403_v26  ;;  %vm3478_vm11 = vmor %vm3476_vm10, %vm3477_vm9 }
 0x973   : > { %v3573_v19 = vmul.f32 %v3449_v20, %v5995_v43  ;;  %v6105_v37 = vsub.f32 %v6025_v31, %v3313_v2  ;;  %vm3506_vm14 = vweird.f32 %v3403_v26 }
 0x974   : > { %v3473_v21 = vmul.f32 0.5, %v3472_v60  ;;  %4513 = vrsqrt.f32 %v3395_v58  ;;  %vm3426_vm1 = vweird.f32 %v3395_v58 }
 0x975   : > { %v3589_v1 = vmul.f32 %v3573_v19, %v6084_v35  ;;  %v3345_v17 = vmul.f32 %v6105_v37, %v6105_v37 }
 0x976   : > { %v3474_v38 = vsub.f32 1.5, %v3473_v21 }
 0x977   : > { %v3605_v32 = vadd.f32 %v3589_v1, %v6091_v36  ;;  %3376 = vadd.xlane.f32.xlu1 %v3345_v17  ;;  %v3355_v43 = vpop.xlane.xlu2 %3354 }
 0x978   : > { %v3475_v0 = vmul.f32 %v4510_v6, %v3474_v38  ;;  %v3351_v28 = vpop.xlane.xlu0 %3350  ;;  %v4512_v18 = vpop.eup %4511  ;;  %v3382_v31 = vmul.f32 %v3355_v43, %v5118_v63 }
 0x979   : > { %3621 = vst [vmem:[%s6098_s2 + $0x18] sm:$0xff] %v3605_v32  ;;  %v3380_v55 = vmul.f32 %v3351_v28, %v5118_v63  ;;  %v3501_v12 = vmul.f32 %v4512_v18, %v3403_v26  ;;  %vm3507_vm12 = vweird.f32 %v4512_v18 }
 0x97a   : > { %v3479_v34 = vsel %vm3478_vm11, %v4510_v6, %v3475_v0  ;;  %v4514_v45 = vpop.eup %4513  ;;  %v3398_v29 = vadd.f32 1e-05, %v3382_v31  ;;  %vm3508_vm15 = vmor %vm3506_vm14, %vm3507_vm12 }
 0x97b   : > { %v3576_v44 = vmul.f32 %v3479_v34, %v6001_v23  ;;  %v6115_v42 = vadd.f32 1e-05, %v3380_v55  ;;  %v3421_v54 = vmul.f32 %v4514_v45, %v3395_v58  ;;  %v3502_v47 = vmul.f32 %v4512_v18, %v3501_v12 }
 0x97c   : > { %4515 = vrsqrt.f32 %v3398_v29  ;;  %vm3427_vm13 = vweird.f32 %v4514_v45  ;;  %vm3456_vm4 = vweird.f32 %v3398_v29 }
 0x97d   : > { %v3592_v59 = vmul.f32 %v3576_v44, %v6084_v35  ;;  %v3422_v50 = vmul.f32 %v4514_v45, %v3421_v54  ;;  %v3503_v56 = vmul.f32 0.5, %v3502_v47  ;;  %4517 = vrsqrt.f32 %v6115_v42  ;;  %vm3428_vm0 = vmor %vm3426_vm1, %vm3427_vm13 }
 0x97e   : > { %vm3436_vm6 = vweird.f32 %v6115_v42 }
 0x97f   : > { %v3608_v46 = vadd.f32 %v3592_v59, %v6091_v36  ;;  %v3423_v15 = vmul.f32 0.5, %v3422_v50  ;;  %v3504_v52 = vsub.f32 1.5, %v3503_v56  ;;  %v3361_v51 = vpop.xlane.xlu2 %3360 }
 0x980   : > { %v3357_v23 = vpop.xlane.xlu0 %3356  ;;  %v3385_v3 = vmul.f32 %v3361_v51, %v5118_v63 }
 0x981   : > { %3624 = vst [vmem:[%s6098_s2 + $0x30] sm:$0xff] %v3608_v46  ;;  %v3383_v8 = vmul.f32 %v3357_v23, %v5118_v63  ;;  %v3424_v41 = vsub.f32 1.5, %v3423_v15  ;;  %v3505_v53 = vmul.f32 %v4512_v18, %v3504_v52 }
 0x982   : > { %v4516_v4 = vpop.eup %4515  ;;  %v6123_v14 = vadd.f32 1e-05, %v3385_v3 }
 0x983   : > { %v6125_v61 = vadd.f32 1e-05, %v3383_v8  ;;  %v4518_v6 = vpop.eup %4517  ;;  %v3425_v22 = vmul.f32 %v4514_v45, %v3424_v41  ;;  %v3509_v5 = vsel %vm3508_vm15, %v4512_v18, %v3505_v53  ;;  %v3451_v39 = vmul.f32 %v4516_v4, %v3398_v29 }
 0x984   : > { %v3579_v10 = vmul.f32 %v3509_v5, %v6016_v11  ;;  %v3431_v57 = vmul.f32 %v4518_v6, %v6115_v42  ;;  %4519 = vrsqrt.f32 %v6123_v14  ;;  %vm3457_vm2 = vweird.f32 %v4516_v4 }
 0x985   : > { %v3429_v33 = vsel %vm3428_vm0, %v4514_v45, %v3425_v22  ;;  %v3452_v7 = vmul.f32 %v4516_v4, %v3451_v39  ;;  %4521 = vrsqrt.f32 %v6125_v61  ;;  %vm3437_vm3 = vweird.f32 %v4518_v6  ;;  %vm3458_vm5 = vmor %vm3456_vm4, %vm3457_vm2 }
 0x986   : > { %v3571_v26 = vmul.f32 %v3429_v33, %v6013_v13  ;;  %v3595_v2 = vmul.f32 %v3579_v10, %v6084_v35  ;;  %v3432_v20 = vmul.f32 %v4518_v6, %v3431_v57  ;;  %vm3438_vm7 = vmor %vm3436_vm6, %vm3437_vm3  ;;  %vm3486_vm10 = vweird.f32 %v6123_v14 }
 0x987   : > { %v3453_v60 = vmul.f32 0.5, %v3452_v7  ;;  %vm3466_vm12 = vweird.f32 %v6125_v61 }
 0x988   : > { %v3363_v19 = vpop.xlane.xlu0 %3362  ;;  %v3587_v58 = vmul.f32 %v3571_v26, %v6084_v35  ;;  %v3611_v11 = vadd.f32 %v3595_v2, %v6091_v36  ;;  %v3433_v21 = vmul.f32 0.5, %v3432_v20 }
 0x989   : > { %v3386_v1 = vmul.f32 %v3363_v19, %v5118_v63  ;;  %v3454_v38 = vsub.f32 1.5, %v3453_v60 }
 0x98a   : > { %v4520_v17 = vpop.eup %4519  ;;  %v3603_v32 = vadd.f32 %v3587_v58, %v6091_v36  ;;  %3627 = vst [vmem:[%s6098_s2 + $0x48] sm:$0xff] %v3611_v11  ;;  %v3434_v13 = vsub.f32 1.5, %v3433_v21 }
 0x98b   : > { %v3402_v0 = vadd.f32 1e-05, %v3386_v1  ;;  %v4522_v43 = vpop.eup %4521  ;;  %v3455_v28 = vmul.f32 %v4516_v4, %v3454_v38  ;;  %v3481_v18 = vmul.f32 %v4520_v17, %v6123_v14  ;;  %vm3487_vm8 = vweird.f32 %v4520_v17 }
 0x98c   : > { %3619 = vst [vmem:[%s6098_s2 + $0x8] sm:$0xff] %v3603_v32  ;;  %v3435_v31 = vmul.f32 %v4518_v6, %v3434_v13  ;;  %v3461_v55 = vmul.f32 %v4522_v43, %v6125_v61  ;;  %vm3467_vm9 = vweird.f32 %v4522_v43  ;;  %vm3488_vm11 = vmor %vm3486_vm10, %vm3487_vm8 }
 0x98d   : > { %4523 = vrsqrt.f32 %v3402_v0  ;;  %v3459_v34 = vsel %vm3458_vm5, %v4516_v4, %v3455_v28  ;;  %v3482_v12 = vmul.f32 %v4520_v17, %v3481_v18  ;;  %vm3468_vm13 = vmor %vm3466_vm12, %vm3467_vm9  ;;  %vm3496_vm15 = vweird.f32 %v3402_v0 }
 0x98e   : > { %v3574_v45 = vmul.f32 %v3459_v34, %v6032_v9  ;;  %v3439_v44 = vsel %vm3438_vm7, %v4518_v6, %v3435_v31  ;;  %v3462_v54 = vmul.f32 %v4522_v43, %v3461_v55 }
 0x98f   : > { %v3572_v29 = vmul.f32 %v3439_v44, %v6029_v27  ;;  %v3483_v47 = vmul.f32 0.5, %v3482_v12 }
 0x990   : > { %v3590_v59 = vmul.f32 %v3574_v45, %v6084_v35  ;;  %v3463_v50 = vmul.f32 0.5, %v3462_v54 }
 0x991   : > { %v3588_v42 = vmul.f32 %v3572_v29, %v6084_v35  ;;  %v3484_v56 = vsub.f32 1.5, %v3483_v47 }
 0x992   : > { %v3606_v15 = vadd.f32 %v3590_v59, %v6091_v36  ;;  %v3464_v52 = vsub.f32 1.5, %v3463_v50 }
 0x993   : > { %v4524_v46 = vpop.eup %4523  ;;  %v3604_v9 = vadd.f32 %v3588_v42, %v6091_v36  ;;  %v3485_v51 = vmul.f32 %v4520_v17, %v3484_v56 }
 0x994   : > { %v3491_v27 = vmul.f32 %v4524_v46, %v3402_v0  ;;  %3622 = vst [vmem:[%s6098_s2 + $0x20] sm:$0xff] %v3606_v15  ;;  %v3465_v23 = vmul.f32 %v4522_v43, %v3464_v52  ;;  %vm3497_vm14 = vweird.f32 %v4524_v46 }
 0x995   : > { %3620 = vst [vmem:[%s6098_s2 + $0x10] sm:$0xff] %v3604_v9  ;;  %v3489_v3 = vsel %vm3488_vm11, %v4520_v17, %v3485_v51  ;;  %vm3498_vm1 = vmor %vm3496_vm15, %vm3497_vm14 }
 0x996   : > { %v3492_v8 = vmul.f32 %v4524_v46, %v3491_v27  ;;  %v3577_v41 = vmul.f32 %v3489_v3, %v6044_v24  ;;  %v3469_v53 = vsel %vm3468_vm13, %v4522_v43, %v3465_v23 }
 0x997   : > { %v3575_v4 = vmul.f32 %v3469_v53, %v6041_v30 }
 0x998   : > { %v3493_v6 = vmul.f32 0.5, %v3492_v8  ;;  %v3593_v14 = vmul.f32 %v3577_v41, %v6084_v35 }
 0x999   : > { %v3591_v22 = vmul.f32 %v3575_v4, %v6084_v35 }
 0x99a   : > { %v3494_v5 = vsub.f32 1.5, %v3493_v6  ;;  %v3609_v61 = vadd.f32 %v3593_v14, %v6091_v36 }
 0x99b   : > { %v3607_v39 = vadd.f32 %v3591_v22, %v6091_v36 }
 0x99c   : > { %v3495_v10 = vmul.f32 %v4524_v46, %v3494_v5  ;;  %3625 = vst [vmem:[%s6098_s2 + $0x38] sm:$0xff] %v3609_v61 }
 0x99d   : > { %3623 = vst [vmem:[%s6098_s2 + $0x28] sm:$0xff] %v3607_v39 }
 0x99e   : > { %v3499_v24 = vsel %vm3498_vm1, %v4524_v46, %v3495_v10 }
 0x99f   : > { %v3578_v30 = vmul.f32 %v3499_v24, %v6052_v49 }
 0x9a1   : > { %v3594_v57 = vmul.f32 %v3578_v30, %v6084_v35 }
 0x9a3   : > { %v3610_v33 = vadd.f32 %v3594_v57, %v6091_v36 }
 0x9a5   : > { %3626 = vst [vmem:[%s6098_s2 + $0x40] sm:$0xff] %v3610_v33 }
 0x9ae   : > { %v3367_v7 = vpop.xlane.xlu2 %3366 }
 0x9af   : > { %v3388_v26 = vmul.f32 %v3367_v7, %v5118_v63 }
 0x9b1   : > { %v3404_v2 = vadd.f32 1e-05, %v3388_v26 }
 0x9b3   : > { %4525 = vrsqrt.f32 %v3404_v2  ;;  %vm3516_vm2 = vweird.f32 %v3404_v2 }
 0x9b6   : > { %v3369_v20 = vpop.xlane.xlu0 %3368 }
 0x9b7   : > { %v3389_v60 = vmul.f32 %v3369_v20, %v5118_v63 }
 0x9b9   : > { %v4526_v19 = vpop.eup %4525  ;;  %v3405_v58 = vadd.f32 1e-05, %v3389_v60 }
 0x9ba   : > { %v3511_v11 = vmul.f32 %v4526_v19, %v3404_v2  ;;  %vm3517_vm0 = vweird.f32 %v4526_v19 }
 0x9bb   : > { %4527 = vrsqrt.f32 %v3405_v58  ;;  %vm3518_vm3 = vmor %vm3516_vm2, %vm3517_vm0  ;;  %vm3526_vm5 = vweird.f32 %v3405_v58 }
 0x9bc   : > { %v3512_v21 = vmul.f32 %v4526_v19, %v3511_v11 }
 0x9be   : > { %v3513_v1 = vmul.f32 0.5, %v3512_v21  ;;  %v3371_v49 = vpop.xlane.xlu1 %3370 }
 0x9bf   : > { %v3390_v38 = vmul.f32 %v3371_v49, %v5118_v63 }
 0x9c0   : > { %v3514_v17 = vsub.f32 1.5, %v3513_v1 }
 0x9c1   : > { %v4528_v32 = vpop.eup %4527  ;;  %v3406_v13 = vadd.f32 1e-05, %v3390_v38 }
 0x9c2   : > { %v3515_v0 = vmul.f32 %v4526_v19, %v3514_v17  ;;  %v3521_v43 = vmul.f32 %v4528_v32, %v3405_v58  ;;  %vm3527_vm4 = vweird.f32 %v4528_v32 }
 0x9c3   : > { %4529 = vrsqrt.f32 %v3406_v13  ;;  %vm3528_vm6 = vmor %vm3526_vm5, %vm3527_vm4  ;;  %vm3536_vm8 = vweird.f32 %v3406_v13 }
 0x9c4   : > { %v3519_v28 = vsel %vm3518_vm3, %v4526_v19, %v3515_v0  ;;  %v3522_v18 = vmul.f32 %v4528_v32, %v3521_v43 }
 0x9c5   : > { %v3580_v31 = vmul.f32 %v3519_v28, %v6058_v48 }
 0x9c6   : > { %v3523_v55 = vmul.f32 0.5, %v3522_v18  ;;  %v3373_v34 = vpop.xlane.xlu2 %3372 }
 0x9c7   : > { %v3596_v12 = vmul.f32 %v3580_v31, %v6084_v35  ;;  %v3391_v45 = vmul.f32 %v3373_v34, %v5118_v63 }
 0x9c8   : > { %v3524_v44 = vsub.f32 1.5, %v3523_v55 }
 0x9c9   : > { %v4530_v54 = vpop.eup %4529  ;;  %v3612_v29 = vadd.f32 %v3596_v12, %v6091_v36  ;;  %v3407_v47 = vadd.f32 1e-05, %v3391_v45 }
 0x9ca   : > { %v3525_v59 = vmul.f32 %v4528_v32, %v3524_v44  ;;  %v3531_v50 = vmul.f32 %v4530_v54, %v3406_v13  ;;  %vm3537_vm7 = vweird.f32 %v4530_v54 }
 0x9cb   : > { %3628 = vst [vmem:[%s6098_s2 + $0x50] sm:$0xff] %v3612_v29  ;;  %4531 = vrsqrt.f32 %v3407_v47  ;;  %vm3538_vm9 = vmor %vm3536_vm8, %vm3537_vm7  ;;  %vm3546_vm11 = vweird.f32 %v3407_v47 }
 0x9cc   : > { %v3529_v48 = vsel %vm3528_vm6, %v4528_v32, %v3525_v59  ;;  %v3532_v42 = vmul.f32 %v4530_v54, %v3531_v50 }
 0x9cd   : > { %v3581_v56 = vmul.f32 %v3529_v48, %v6064_v40 }
 0x9ce   : > { %v3533_v46 = vmul.f32 0.5, %v3532_v42 }
 0x9cf   : > { %v3597_v15 = vmul.f32 %v3581_v56, %v6084_v35 }
 0x9d0   : > { %v3534_v52 = vsub.f32 1.5, %v3533_v46 }
 0x9d1   : > { %v4532_v9 = vpop.eup %4531  ;;  %v3613_v51 = vadd.f32 %v3597_v15, %v6091_v36 }
 0x9d2   : > { %v3535_v27 = vmul.f32 %v4530_v54, %v3534_v52  ;;  %v3541_v23 = vmul.f32 %v4532_v9, %v3407_v47  ;;  %vm3547_vm10 = vweird.f32 %v4532_v9 }
 0x9d3   : > { %3629 = vst [vmem:[%s6098_s2 + $0x58] sm:$0xff] %v3613_v51  ;;  %vm3548_vm12 = vmor %vm3546_vm11, %vm3547_vm10 }
 0x9d4   : > { %v3539_v3 = vsel %vm3538_vm9, %v4530_v54, %v3535_v27  ;;  %v3542_v8 = vmul.f32 %v4532_v9, %v3541_v23 }
 0x9d5   : > { %v3582_v41 = vmul.f32 %v3539_v3, %v6070_v25 }
 0x9d6   : > { %v3543_v40 = vmul.f32 0.5, %v3542_v8 }
 0x9d7   : > { %v3598_v53 = vmul.f32 %v3582_v41, %v6084_v35 }
 0x9d8   : > { %v3544_v4 = vsub.f32 1.5, %v3543_v40 }
 0x9d9   : > { %v3614_v6 = vadd.f32 %v3598_v53, %v6091_v36 }
 0x9da   : > { %v3545_v14 = vmul.f32 %v4532_v9, %v3544_v4 }
 0x9db   : > { %3630 = vst [vmem:[%s6098_s2 + $0x60] sm:$0xff] %v3614_v6 }
 0x9dc   : > { %v3549_v22 = vsel %vm3548_vm12, %v4532_v9, %v3545_v14 }
 0x9dd   : > { %v3583_v5 = vmul.f32 %v3549_v22, %v6076_v16 }
 0x9df   : > { %v3599_v61 = vmul.f32 %v3583_v5, %v6084_v35 }
 0x9e1   : > { %v3615_v39 = vadd.f32 %v3599_v61, %v6091_v36  ;;  %v3375_v10 = vpop.xlane.xlu0 %3374 }
 0x9e2   : > { %v3392_v25 = vmul.f32 %v3375_v10, %v5118_v63 }
 0x9e3   : > { %3631 = vst [vmem:[%s6098_s2 + $0x68] sm:$0xff] %v3615_v39 }
 0x9e4   : > { %v3408_v24 = vadd.f32 1e-05, %v3392_v25 }
 0x9e6   : > { %4533 = vrsqrt.f32 %v3408_v24  ;;  %vm3556_vm14 = vweird.f32 %v3408_v24 }
 0x9ea   : > { %v3377_v30 = vpop.xlane.xlu1 %3376 }
 0x9eb   : > { %v3393_v57 = vmul.f32 %v3377_v30, %v5118_v63 }
 0x9ec   : > { %v4534_v33 = vpop.eup %4533 }
 0x9ed   : > { %v3551_v7 = vmul.f32 %v4534_v33, %v3408_v24  ;;  %v3409_v26 = vadd.f32 1e-05, %v3393_v57  ;;  %vm3557_vm13 = vweird.f32 %v4534_v33 }
 0x9ee   : > { %vm3558_vm15 = vmor %vm3556_vm14, %vm3557_vm13 }
 0x9ef   : > { %v3552_v2 = vmul.f32 %v4534_v33, %v3551_v7  ;;  %4535 = vrsqrt.f32 %v3409_v26  ;;  %vm3566_vm0 = vweird.f32 %v3409_v26 }
 0x9f1   : > { %v3553_v16 = vmul.f32 0.5, %v3552_v2 }
 0x9f3   : > { %v3554_v20 = vsub.f32 1.5, %v3553_v16 }
 0x9f5   : > { %v4536_v60 = vpop.eup %4535  ;;  %v3555_v19 = vmul.f32 %v4534_v33, %v3554_v20 }
 0x9f6   : > { %v3561_v58 = vmul.f32 %v4536_v60, %v3409_v26  ;;  %vm3567_vm1 = vweird.f32 %v4536_v60 }
 0x9f7   : > { %v3559_v11 = vsel %vm3558_vm15, %v4534_v33, %v3555_v19  ;;  %vm3568_vm2 = vmor %vm3566_vm0, %vm3567_vm1 }
 0x9f8   : > { %v3584_v21 = vmul.f32 %v3559_v11, %v6089_v62  ;;  %v3562_v63 = vmul.f32 %v4536_v60, %v3561_v58 }
 0x9fa   : > { %v3600_v1 = vmul.f32 %v3584_v21, %v6084_v35  ;;  %v3563_v49 = vmul.f32 0.5, %v3562_v63 }
 0x9fc   : > { %v3616_v38 = vadd.f32 %v3600_v1, %v6091_v36  ;;  %v3564_v17 = vsub.f32 1.5, %v3563_v49 }
 0x9fe   : > { %3632 = vst [vmem:[%s6098_s2 + $0x70] sm:$0xff] %v3616_v38  ;;  %v3565_v32 = vmul.f32 %v4536_v60, %v3564_v17 }
 0xa00   : > { %v3569_v62 = vsel %vm3568_vm2, %v4536_v60, %v3565_v32 }
 0xa01   : > { %v3585_v13 = vmul.f32 %v3569_v62, %v6105_v37 }
 0xa03   : > { %v3601_v0 = vmul.f32 %v3585_v13, %v6084_v35 }
 0xa05   : > { %v3617_v43 = vadd.f32 %v3601_v0, %v6091_v36 }
 0xa07   : > { %3633 = vst [vmem:[%s6098_s2 + $0x78] sm:$0xff] %v3617_v43 }
 0xa08   : > { %4774 = shalt.err (!%p4771_p9)
}
 0xa09   : > { %s4841_s22 = smov 128   ;;  %s4842_s1 = smov 8  }
 0xa0a   : > { %4207 = dma.vmem_to_hbm [thread:$0]  (%p4986_p4), %s3649_s30, 2048, %s3651_s8, %s3635_s17, %s4841_s22, %s4841_s22, %s4842_s1  }
 0xa0b PF: > { %s3665_s2 = sand.u32 1, %s4813_s24   ;;  %p6249_p10 = scmp.ge.s32.totalorder %s4825_s27, 2 }
 0xa0c   : > { %s3666_s9 = scalar_lea.sflag [#allocation4], %s3665_s2 }
 0xa0d   : > { %p4233_p13 = pnand %p6249_p10, %p4990_p6 }
 0xa0f   : > { %p4234_p11 = pneg %p4233_p13 }
 0xa11   : > { %4808 = dma.done.wait (%p4234_p11), %s3666_s9, 2048  }
 0xa12   : > { %4810 = vsyncadd (%p4234_p11), %s3666_s9, 4294965248  ;;  %p23_p0 = scmp.ge.s32.totalorder %s4960_s11, 4   ;;  %s6250_s24 = smov %s4817_s25 }
 0xa13   : > { %s6251_s25 = smov %s4821_s26  ;;  %s6252_s26 = smov %s4971_s18 }
 0xa14   : > { %s6253_s27 = smov %s4960_s11  ;;  %25 = sbr.rel (!%p23_p0) target bundleno = 11 (0xb), region = 118 }
 0xa19   :  { %3672 = vsyncpa [#allocation3], 1 }
 0xa1a   :  { %3674 = vsyncpa [#allocation3 + $0x1], 1 }
 0xa1b   :  { %3675 = vsyncpa [#allocation6], 1 }
 0xa1c   :  { %3676 = vsyncpa [#allocation9], 1 }
 0xa1d   :  { %3677 = vsyncpa [#allocation12], 1 }
 0xa1e   :  { %3678 = vsyncpa [#allocation4], 1 }
 0xa1f   :  { %3680 = vsyncpa [#allocation4 + $0x1], 1 }

</bundles_post_ra>
